<compile_context>
chip_gen: v6e
topology: v6e:2x2x1
jax: 0.10.0
libtpu: 0.0.40
codegen_flags: <defaults>
</compile_context>

<pallas_src>
import jax
import jax.numpy as jnp
from jax import lax
from jax.experimental import pallas as pl
from jax.experimental.pallas import tpu as pltpu

RNN_SIZE = 15          # nn.LSTM hidden size, hard-coded in the PyTorch module
GATE_PAD = 128         # per-gate lane padding: one 128-lane tile per gate
BN_EPS = 1e-5


# ----------------------------------------------------------------------------
# Single fused kernel: LSTM recurrence + MLP head.
# ----------------------------------------------------------------------------
def _fused_kernel(x_ref,                              # (T, NB, 1)  f32
                  wih_ref, whh_ref, bias_ref,         # (1,4P) f32, (H,4P) bf16, (1,4P) f32
                  w1_ref, b1_ref, g1_ref, be1_ref,    # w1: (NB, H, hidden)
                  w2_ref, b2_ref, g2_ref, be2_ref,
                  w3_ref, b3_ref, g3_ref, be3_ref,
                  w4_ref, b4_ref,
                  o_ref,                              # (T, 4)
                  xwb_ref, hs_ref):                   # scratch: (T,NB,4P), (T,NB,H)
    T, NB, _ = x_ref.shape
    H = RNN_SIZE
    P = GATE_PAD
    f32 = jnp.float32

    # ---- Hoisted input contribution x_t*W_ih + (b_ih + b_hh), all T at once.
    # Padded lanes of W_ih / bias are zero, so pad lanes of xwb are zero.
    xwb_ref[...] = x_ref[...] * wih_ref[...] + bias_ref[...]       # (T, NB, 4P)

    whh = whh_ref[...]                                             # (H, 4P) bf16

    # ---- LSTM recurrence over the time axis, inside the kernel.
    def step(t, carry):
        h, c = carry                                               # (NB, H) f32
        # One fused (NB,H) @ (H,4P) bf16 matmul for all four gates (f32 acc).
        gates = xwb_ref[t] + jnp.dot(h.astype(jnp.bfloat16), whh,
                                     preferred_element_type=f32)   # (NB, 4P)
        # Gate blocks are 128-lane aligned, order [i, f, o, g]:
        #   one sigmoid over lanes [0, 3P), one tanh for the g block.
        sig = jax.nn.sigmoid(gates[:, :3 * P])
        i = sig[:, 0 * P:0 * P + H]
        f = sig[:, 1 * P:1 * P + H]
        o = sig[:, 2 * P:2 * P + H]
        g = jnp.tanh(gates[:, 3 * P:3 * P + H])
        c_new = f * c + i * g
        h_new = o * jnp.tanh(c_new)
        hs_ref[t] = h_new
        return h_new, c_new

    h0 = jnp.zeros((NB, H), f32)
    c0 = jnp.zeros((NB, H), f32)
    # Capped unroll: keeps LLO scheduling visibility without code-size /
    # vreg-pressure blowup when T (= batch) is large.
    lax.fori_loop(0, T, step, (h0, c0), unroll=min(T, 8))

    # ---- Fused MLP head (training-mode BatchNorm, biased two-pass variance).
    hidden = w1_ref.shape[2]

    def bn_train(h, gamma_ref, beta_ref):
        m = jnp.mean(h, axis=0, keepdims=True)
        d = h - m
        var = jnp.mean(d * d, axis=0, keepdims=True)
        return d * lax.rsqrt(var + BN_EPS) * gamma_ref[...] + beta_ref[...]

    # fc1: flat(hs) @ W1 computed as sum_n hs[:, n, :] @ W1r[n].
    # TODO(synk): a single K=180 matmul needs an in-kernel (T,12,15)->(T,180)
    # relayout with uncertain Mosaic shape-cast support; keep the NB small
    # matmuls (off the serial critical path, cheap at these sizes).
    hs = hs_ref[...]                                       # (T, NB, H)
    acc = jnp.broadcast_to(b1_ref[...], (T, hidden))
    for n in range(NB):                                    # static, NB = 12
        acc = acc + jnp.dot(hs[:, n, :], w1_ref[n], preferred_element_type=f32)
    h1 = bn_train(jnp.maximum(acc, 0.0), g1_ref, be1_ref)

    h2 = jnp.maximum(
        jnp.dot(h1, w2_ref[...], preferred_element_type=f32) + b2_ref[...], 0.0)
    h2 = bn_train(h2, g2_ref, be2_ref)

    h3 = jnp.maximum(
        jnp.dot(h2, w3_ref[...], preferred_element_type=f32) + b3_ref[...], 0.0)
    h3 = bn_train(h3, g3_ref, be3_ref)

    o_ref[...] = jnp.maximum(
        jnp.dot(h3, w4_ref[...], preferred_element_type=f32) + b4_ref[...], 0.0)


# ----------------------------------------------------------------------------
# Wrapper: embedding gather / concat / gate padding in plain JAX, then one
# fused pallas_call.
# ----------------------------------------------------------------------------
def lstm_linear_forward(x, params):
    """x: (B, 1 + input_size) float32; column 0 = integer energy class."""
    B = x.shape[0]
    H = RNN_SIZE
    P = GATE_PAD

    energy_label = x[:, 0].astype(jnp.int32)
    q_strength = x[:, 1:].astype(jnp.float32)
    emb = jnp.take(params["embed"], energy_label, axis=0)        # (B, E)
    feat = jnp.concatenate([emb, q_strength], axis=1)            # (B, NB)
    NB = feat.shape[1]
    # nn.LSTM default batch_first=False: seq_len = B, lstm_batch = NB, input = 1.
    x_seq = feat.reshape(B, NB, 1)

    # Fused, 128-lane-aligned gate layout in order [i, f, o, g].
    (wii, wif, wig, wio, whi, whf, whg, who, bi, bf, bg, bo) = params["lstm"]

    def pad_gate(w):                                             # (r, H) -> (r, P)
        return jnp.pad(w, ((0, 0), (0, P - w.shape[1])))

    wih_all = jnp.concatenate([pad_gate(w) for w in (wii, wif, wio, wig)],
                              axis=1)                            # (1, 4P) f32
    whh_all = jnp.concatenate([pad_gate(w) for w in (whi, whf, who, whg)],
                              axis=1).astype(jnp.bfloat16)       # (H, 4P) bf16
    b_all = jnp.concatenate([pad_gate(b) for b in (bi, bf, bo, bg)],
                            axis=1)                              # (1, 4P) f32

    (w1, b1, g1, be1, w2, b2, g2, be2, w3, b3, g3, be3, w4, b4) = params["mlp"]
    hidden = w1.shape[1]
    w1r = w1.reshape(NB, H, hidden)       # rows n*H:(n+1)*H of W1 -> W1r[n]

    operands = (x_seq, wih_all, whh_all, b_all,
                w1r, b1, g1, be1, w2, b2, g2, be2, w3, b3, g3, be3, w4, b4)

    flops = (2 * B * NB * H * 4 * P
             + 2 * B * (NB * H * hidden + hidden * 2 * hidden
                        + 2 * hidden * hidden + hidden * 4))
    transcendentals = B * NB * (3 * P + 2 * H)
    bytes_accessed = sum(int(a.size) * a.dtype.itemsize for a in operands) + B * 4 * 4

    vmem = pl.BlockSpec(memory_space=pltpu.MemorySpace.VMEM)
    return pl.pallas_call(
        _fused_kernel,
        out_shape=jax.ShapeDtypeStruct((B, 4), jnp.float32),
        in_specs=[vmem] * len(operands),
        out_specs=vmem,
        scratch_shapes=[pltpu.VMEM((B, NB, 4 * P), jnp.float32),   # hoisted x*W_ih + b
                        pltpu.VMEM((B, NB, H), jnp.float32)],      # per-step h states
        compiler_params=pltpu.CompilerParams(vmem_limit_bytes=32 * 1024 * 1024),
        cost_estimate=pl.CostEstimate(flops=flops,
                                      transcendentals=transcendentals,
                                      bytes_accessed=bytes_accessed),
    )(*operands)


# ----------------------------------------------------------------------------
# Pure-JAX f32 reference (unfused per-gate parameters; cross-validates the
# fused/padded/reordered gate layout and the MLP head).
# ----------------------------------------------------------------------------
def reference_forward(x, params):
    B = x.shape[0]
    label = x[:, 0].astype(jnp.int32)
    q = x[:, 1:].astype(jnp.float32)
    emb = params["embed"][label]
    feat = jnp.concatenate([emb, q], axis=1)
    seq = feat.reshape(B, -1, 1)
    (wii, wif, wig, wio, whi, whf, whg, who, bi, bf, bg, bo) = params["lstm"]
    H = RNN_SIZE
    NB = seq.shape[1]

    def step(carry, x_t):
        h, c = carry
        i = jax.nn.sigmoid(x_t * wii + h @ whi + bi)
        f = jax.nn.sigmoid(x_t * wif + h @ whf + bf)
        g = jnp.tanh(x_t * wig + h @ whg + bg)
        o = jax.nn.sigmoid(x_t * wio + h @ who + bo)
        c = f * c + i * g
        h = o * jnp.tanh(c)
        return (h, c), h

    init = (jnp.zeros((NB, H), jnp.float32), jnp.zeros((NB, H), jnp.float32))
    _, hs = lax.scan(step, init, seq)
    flat = hs.reshape(B, -1)

    (w1, b1, g1, be1, w2, b2, g2, be2, w3, b3, g3, be3, w4, b4) = params["mlp"]

    def bn(h, gamma, beta):
        m = jnp.mean(h, axis=0, keepdims=True)
        v = jnp.mean((h - m) ** 2, axis=0, keepdims=True)
        return (h - m) / jnp.sqrt(v + BN_EPS) * gamma + beta

    h = jax.nn.relu(flat @ w1 + b1); h = bn(h, g1, be1)
    h = jax.nn.relu(h @ w2 + b2);    h = bn(h, g2, be2)
    h = jax.nn.relu(h @ w3 + b3);    h = bn(h, g3, be3)
    return jax.nn.relu(h @ w4 + b4)


# ----------------------------------------------------------------------------
# Deterministic parameter init (shapes from the module __init__).
# ----------------------------------------------------------------------------
def init_params(key, hidden=128, input_size=6, embed_size=6, energy_classes=3):
    H = RNN_SIZE
    d_in = (embed_size + input_size) * H          # 180
    ks = list(jax.random.split(key, 32))
    nxt = iter(ks)

    def rnd(shape, scale):
        return jax.random.normal(next(nxt), shape, jnp.float32) * scale

    s = 1.0 / (H ** 0.5)
    lstm = tuple(
        [rnd((1, H), s) for _ in range(4)]        # W_ih (input dim = 1), gates i,f,g,o
        + [rnd((H, H), s) for _ in range(4)]      # W_hh, gates i,f,g,o
        + [rnd((1, H), s) for _ in range(4)]      # combined bias (b_ih + b_hh)
    )

    def linear(din, dout):
        sc = 1.0 / (din ** 0.5)
        return rnd((din, dout), sc), rnd((1, dout), 0.01)

    w1, b1 = linear(d_in, hidden)
    w2, b2 = linear(hidden, 2 * hidden)
    w3, b3 = linear(2 * hidden, hidden)
    w4, b4 = linear(hidden, 4)
    ones = lambda n: jnp.ones((1, n), jnp.float32)
    zeros = lambda n: jnp.zeros((1, n), jnp.float32)
    mlp = (w1, b1, ones(hidden), zeros(hidden),
           w2, b2, ones(2 * hidden), zeros(2 * hidden),
           w3, b3, ones(hidden), zeros(hidden),
           w4, b4)

    embed = jax.random.normal(next(nxt), (energy_classes, embed_size), jnp.float32)
    return {"lstm": lstm, "mlp": mlp, "embed": embed}


if __name__ == "__main__":
    key = jax.random.PRNGKey(0)
    k_p, k_lbl, k_q = jax.random.split(key, 3)

    B, INPUT_SIZE, EMBED_SIZE, ENERGY_CLASSES, HIDDEN = 8, 6, 6, 3, 128
    params = init_params(k_p, hidden=HIDDEN, input_size=INPUT_SIZE,
                         embed_size=EMBED_SIZE, energy_classes=ENERGY_CLASSES)

    labels = jax.random.randint(k_lbl, (B,), 0, ENERGY_CLASSES).astype(jnp.float32)
    q = jax.random.normal(k_q, (B, INPUT_SIZE), jnp.float32)
    x = jnp.concatenate([labels[:, None], q], axis=1)        # (B, 7)

    fwd = jax.jit(lstm_linear_forward)
    out = jax.block_until_ready(fwd(x, params))

    ref = jax.block_until_ready(jax.jit(reference_forward)(x, params))
    assert out.shape == (B, 4), out.shape
    # Tolerance sized for the bf16 MXU inputs used in the recurrence matmul
    # (a review-requested optimization); the reference runs fully in f32.
    assert jnp.allclose(out, ref, rtol=2e-2, atol=2e-2), (
        f"max abs diff {float(jnp.max(jnp.abs(out - ref)))}")

    print("KERNEL_OK")
</pallas_src>

<mosaic_0001>
module attributes {stable_mosaic.version = 11 : i64} {
  func.func @_fused_kernel(%arg0: memref<8x12x1xf32, #tpu.memory_space<vmem>>, %arg1: memref<1x512xf32, #tpu.memory_space<vmem>>, %arg2: memref<15x512xbf16, #tpu.memory_space<vmem>>, %arg3: memref<1x512xf32, #tpu.memory_space<vmem>>, %arg4: memref<12x15x128xf32, #tpu.memory_space<vmem>>, %arg5: memref<1x128xf32, #tpu.memory_space<vmem>>, %arg6: memref<1x128xf32, #tpu.memory_space<vmem>>, %arg7: memref<1x128xf32, #tpu.memory_space<vmem>>, %arg8: memref<128x256xf32, #tpu.memory_space<vmem>>, %arg9: memref<1x256xf32, #tpu.memory_space<vmem>>, %arg10: memref<1x256xf32, #tpu.memory_space<vmem>>, %arg11: memref<1x256xf32, #tpu.memory_space<vmem>>, %arg12: memref<256x128xf32, #tpu.memory_space<vmem>>, %arg13: memref<1x128xf32, #tpu.memory_space<vmem>>, %arg14: memref<1x128xf32, #tpu.memory_space<vmem>>, %arg15: memref<1x128xf32, #tpu.memory_space<vmem>>, %arg16: memref<128x4xf32, #tpu.memory_space<vmem>>, %arg17: memref<1x4xf32, #tpu.memory_space<vmem>>, %arg18: memref<8x4xf32, #tpu.memory_space<vmem>>, %arg19: memref<8x12x512xf32, #tpu.memory_space<vmem>>, %arg20: memref<8x12x15xf32, #tpu.memory_space<vmem>>) attributes {dimension_semantics = [], scalar_prefetch = 0 : i64, scratch_operands = 2 : i64, tpu.core_type = #tpu.core_type<tc>} {
    %c0 = arith.constant 0 : index
    %c0_0 = arith.constant 0 : index
    %c0_1 = arith.constant 0 : index
    %0 = vector.load %arg0[%c0, %c0_0, %c0_1] : memref<8x12x1xf32, #tpu.memory_space<vmem>>, vector<8x12x1xf32>
    %c0_2 = arith.constant 0 : index
    %c0_3 = arith.constant 0 : index
    %1 = vector.load %arg1[%c0_2, %c0_3] : memref<1x512xf32, #tpu.memory_space<vmem>>, vector<1x512xf32>
    %2 = vector.shape_cast %1 : vector<1x512xf32> to vector<1x1x512xf32>
    %3 = vector.broadcast %0 : vector<8x12x1xf32> to vector<8x12x512xf32>
    %4 = vector.broadcast %2 : vector<1x1x512xf32> to vector<8x12x512xf32>
    %5 = arith.mulf %3, %4 : vector<8x12x512xf32>
    %c0_4 = arith.constant 0 : index
    %c0_5 = arith.constant 0 : index
    %6 = vector.load %arg3[%c0_4, %c0_5] : memref<1x512xf32, #tpu.memory_space<vmem>>, vector<1x512xf32>
    %7 = vector.shape_cast %6 : vector<1x512xf32> to vector<1x1x512xf32>
    %8 = vector.broadcast %7 : vector<1x1x512xf32> to vector<8x12x512xf32>
    %9 = arith.addf %5, %8 : vector<8x12x512xf32>
    %c0_6 = arith.constant 0 : index
    %c0_7 = arith.constant 0 : index
    %c0_8 = arith.constant 0 : index
    %10 = vector.load %arg19[%c0_6, %c0_7, %c0_8] : memref<8x12x512xf32, #tpu.memory_space<vmem>>, vector<8x12x512xf32>
    tpu.vector_store %arg19[%c0_6, %c0_7, %c0_8], %9 {strides = array<i32>} : memref<8x12x512xf32, #tpu.memory_space<vmem>>, vector<8x12x512xf32>,
    %c0_9 = arith.constant 0 : index
    %c0_10 = arith.constant 0 : index
    %11 = vector.load %arg2[%c0_9, %c0_10] : memref<15x512xbf16, #tpu.memory_space<vmem>>, vector<15x512xbf16>
    %cst = arith.constant 0.000000e+00 : f32
    %12 = vector.broadcast %cst : f32 to vector<12x15xf32>
    %cst_11 = arith.constant 0.000000e+00 : f32
    %13 = vector.broadcast %cst_11 : f32 to vector<12x15xf32>
    %c0_i32 = arith.constant 0 : i32
    %14 = arith.index_cast %c0_i32 : i32 to index
    %c0_12 = arith.constant 0 : index
    %c0_13 = arith.constant 0 : index
    %15 = vector.load %arg19[%14, %c0_12, %c0_13] : memref<8x12x512xf32, #tpu.memory_space<vmem>>, vector<1x12x512xf32>
    %16 = vector.shape_cast %15 : vector<1x12x512xf32> to vector<12x512xf32>
    %17 = arith.truncf %12 : vector<12x15xf32> to vector<12x15xbf16>
    %cst_14 = arith.constant dense<0.000000e+00> : vector<12x512xf32>
    %18 = tpu.matmul %17, %11, %cst_14 {dimension_numbers = #tpu.dot_dimension_numbers<[1], [0], [0], [1], [0, 0, 1, 1], [], []>} : vector<12x15xbf16>, vector<15x512xbf16>, vector<12x512xf32> -> vector<12x512xf32>
    %19 = arith.addf %16, %18 : vector<12x512xf32>
    %20 = vector.extract_strided_slice %19 {offsets = [0, 0], sizes = [12, 384], strides = [1, 1]} : vector<12x512xf32> to vector<12x384xf32>
    %21 = arith.negf %20 : vector<12x384xf32>
    %22 = math.exp %21 : vector<12x384xf32>
    %cst_15 = arith.constant 1.000000e+00 : f32
    %23 = vector.broadcast %cst_15 : f32 to vector<12x384xf32>
    %24 = arith.addf %23, %22 : vector<12x384xf32>
    %25 = arith.divf %23, %24 : vector<12x384xf32>
    %26 = vector.extract_strided_slice %25 {offsets = [0, 0], sizes = [12, 15], strides = [1, 1]} : vector<12x384xf32> to vector<12x15xf32>
    %27 = vector.extract_strided_slice %25 {offsets = [0, 128], sizes = [12, 15], strides = [1, 1]} : vector<12x384xf32> to vector<12x15xf32>
    %28 = vector.extract_strided_slice %25 {offsets = [0, 256], sizes = [12, 15], strides = [1, 1]} : vector<12x384xf32> to vector<12x15xf32>
    %29 = vector.extract_strided_slice %19 {offsets = [0, 384], sizes = [12, 15], strides = [1, 1]} : vector<12x512xf32> to vector<12x15xf32>
    %30 = math.tanh %29 : vector<12x15xf32>
    %31 = arith.mulf %27, %13 : vector<12x15xf32>
    %32 = arith.mulf %26, %30 : vector<12x15xf32>
    %33 = arith.addf %31, %32 : vector<12x15xf32>
    %34 = math.tanh %33 : vector<12x15xf32>
    %35 = arith.mulf %28, %34 : vector<12x15xf32>
    %36 = arith.index_cast %c0_i32 : i32 to index
    %c0_16 = arith.constant 0 : index
    %c0_17 = arith.constant 0 : index
    %37 = vector.load %arg20[%36, %c0_16, %c0_17] : memref<8x12x15xf32, #tpu.memory_space<vmem>>, vector<1x12x15xf32>
    %38 = vector.shape_cast %37 : vector<1x12x15xf32> to vector<12x15xf32>
    %39 = vector.shape_cast %35 : vector<12x15xf32> to vector<1x12x15xf32>
    tpu.vector_store %arg20[%36, %c0_16, %c0_17], %39 {strides = array<i32>} : memref<8x12x15xf32, #tpu.memory_space<vmem>>, vector<1x12x15xf32>,
    %c1_i32 = arith.constant 1 : i32
    %40 = arith.index_cast %c1_i32 : i32 to index
    %c0_18 = arith.constant 0 : index
    %c0_19 = arith.constant 0 : index
    %41 = vector.load %arg19[%40, %c0_18, %c0_19] : memref<8x12x512xf32, #tpu.memory_space<vmem>>, vector<1x12x512xf32>
    %42 = vector.shape_cast %41 : vector<1x12x512xf32> to vector<12x512xf32>
    %43 = arith.truncf %35 : vector<12x15xf32> to vector<12x15xbf16>
    %cst_20 = arith.constant dense<0.000000e+00> : vector<12x512xf32>
    %44 = tpu.matmul %43, %11, %cst_20 {dimension_numbers = #tpu.dot_dimension_numbers<[1], [0], [0], [1], [0, 0, 1, 1], [], []>} : vector<12x15xbf16>, vector<15x512xbf16>, vector<12x512xf32> -> vector<12x512xf32>
    %45 = arith.addf %42, %44 : vector<12x512xf32>
    %46 = vector.extract_strided_slice %45 {offsets = [0, 0], sizes = [12, 384], strides = [1, 1]} : vector<12x512xf32> to vector<12x384xf32>
    %47 = arith.negf %46 : vector<12x384xf32>
    %48 = math.exp %47 : vector<12x384xf32>
    %cst_21 = arith.constant 1.000000e+00 : f32
    %49 = vector.broadcast %cst_21 : f32 to vector<12x384xf32>
    %50 = arith.addf %49, %48 : vector<12x384xf32>
    %51 = arith.divf %49, %50 : vector<12x384xf32>
    %52 = vector.extract_strided_slice %51 {offsets = [0, 0], sizes = [12, 15], strides = [1, 1]} : vector<12x384xf32> to vector<12x15xf32>
    %53 = vector.extract_strided_slice %51 {offsets = [0, 128], sizes = [12, 15], strides = [1, 1]} : vector<12x384xf32> to vector<12x15xf32>
    %54 = vector.extract_strided_slice %51 {offsets = [0, 256], sizes = [12, 15], strides = [1, 1]} : vector<12x384xf32> to vector<12x15xf32>
    %55 = vector.extract_strided_slice %45 {offsets = [0, 384], sizes = [12, 15], strides = [1, 1]} : vector<12x512xf32> to vector<12x15xf32>
    %56 = math.tanh %55 : vector<12x15xf32>
    %57 = arith.mulf %53, %33 : vector<12x15xf32>
    %58 = arith.mulf %52, %56 : vector<12x15xf32>
    %59 = arith.addf %57, %58 : vector<12x15xf32>
    %60 = math.tanh %59 : vector<12x15xf32>
    %61 = arith.mulf %54, %60 : vector<12x15xf32>
    %62 = arith.index_cast %c1_i32 : i32 to index
    %c0_22 = arith.constant 0 : index
    %c0_23 = arith.constant 0 : index
    %63 = vector.load %arg20[%62, %c0_22, %c0_23] : memref<8x12x15xf32, #tpu.memory_space<vmem>>, vector<1x12x15xf32>
    %64 = vector.shape_cast %63 : vector<1x12x15xf32> to vector<12x15xf32>
    %65 = vector.shape_cast %61 : vector<12x15xf32> to vector<1x12x15xf32>
    tpu.vector_store %arg20[%62, %c0_22, %c0_23], %65 {strides = array<i32>} : memref<8x12x15xf32, #tpu.memory_space<vmem>>, vector<1x12x15xf32>,
    %c2_i32 = arith.constant 2 : i32
    %66 = arith.index_cast %c2_i32 : i32 to index
    %c0_24 = arith.constant 0 : index
    %c0_25 = arith.constant 0 : index
    %67 = vector.load %arg19[%66, %c0_24, %c0_25] : memref<8x12x512xf32, #tpu.memory_space<vmem>>, vector<1x12x512xf32>
    %68 = vector.shape_cast %67 : vector<1x12x512xf32> to vector<12x512xf32>
    %69 = arith.truncf %61 : vector<12x15xf32> to vector<12x15xbf16>
    %cst_26 = arith.constant dense<0.000000e+00> : vector<12x512xf32>
    %70 = tpu.matmul %69, %11, %cst_26 {dimension_numbers = #tpu.dot_dimension_numbers<[1], [0], [0], [1], [0, 0, 1, 1], [], []>} : vector<12x15xbf16>, vector<15x512xbf16>, vector<12x512xf32> -> vector<12x512xf32>
    %71 = arith.addf %68, %70 : vector<12x512xf32>
    %72 = vector.extract_strided_slice %71 {offsets = [0, 0], sizes = [12, 384], strides = [1, 1]} : vector<12x512xf32> to vector<12x384xf32>
    %73 = arith.negf %72 : vector<12x384xf32>
    %74 = math.exp %73 : vector<12x384xf32>
    %cst_27 = arith.constant 1.000000e+00 : f32
    %75 = vector.broadcast %cst_27 : f32 to vector<12x384xf32>
    %76 = arith.addf %75, %74 : vector<12x384xf32>
    %77 = arith.divf %75, %76 : vector<12x384xf32>
    %78 = vector.extract_strided_slice %77 {offsets = [0, 0], sizes = [12, 15], strides = [1, 1]} : vector<12x384xf32> to vector<12x15xf32>
    %79 = vector.extract_strided_slice %77 {offsets = [0, 128], sizes = [12, 15], strides = [1, 1]} : vector<12x384xf32> to vector<12x15xf32>
    %80 = vector.extract_strided_slice %77 {offsets = [0, 256], sizes = [12, 15], strides = [1, 1]} : vector<12x384xf32> to vector<12x15xf32>
    %81 = vector.extract_strided_slice %71 {offsets = [0, 384], sizes = [12, 15], strides = [1, 1]} : vector<12x512xf32> to vector<12x15xf32>
    %82 = math.tanh %81 : vector<12x15xf32>
    %83 = arith.mulf %79, %59 : vector<12x15xf32>
    %84 = arith.mulf %78, %82 : vector<12x15xf32>
    %85 = arith.addf %83, %84 : vector<12x15xf32>
    %86 = math.tanh %85 : vector<12x15xf32>
    %87 = arith.mulf %80, %86 : vector<12x15xf32>
    %88 = arith.index_cast %c2_i32 : i32 to index
    %c0_28 = arith.constant 0 : index
    %c0_29 = arith.constant 0 : index
    %89 = vector.load %arg20[%88, %c0_28, %c0_29] : memref<8x12x15xf32, #tpu.memory_space<vmem>>, vector<1x12x15xf32>
    %90 = vector.shape_cast %89 : vector<1x12x15xf32> to vector<12x15xf32>
    %91 = vector.shape_cast %87 : vector<12x15xf32> to vector<1x12x15xf32>
    tpu.vector_store %arg20[%88, %c0_28, %c0_29], %91 {strides = array<i32>} : memref<8x12x15xf32, #tpu.memory_space<vmem>>, vector<1x12x15xf32>,
    %c3_i32 = arith.constant 3 : i32
    %92 = arith.index_cast %c3_i32 : i32 to index
    %c0_30 = arith.constant 0 : index
    %c0_31 = arith.constant 0 : index
    %93 = vector.load %arg19[%92, %c0_30, %c0_31] : memref<8x12x512xf32, #tpu.memory_space<vmem>>, vector<1x12x512xf32>
    %94 = vector.shape_cast %93 : vector<1x12x512xf32> to vector<12x512xf32>
    %95 = arith.truncf %87 : vector<12x15xf32> to vector<12x15xbf16>
    %cst_32 = arith.constant dense<0.000000e+00> : vector<12x512xf32>
    %96 = tpu.matmul %95, %11, %cst_32 {dimension_numbers = #tpu.dot_dimension_numbers<[1], [0], [0], [1], [0, 0, 1, 1], [], []>} : vector<12x15xbf16>, vector<15x512xbf16>, vector<12x512xf32> -> vector<12x512xf32>
    %97 = arith.addf %94, %96 : vector<12x512xf32>
    %98 = vector.extract_strided_slice %97 {offsets = [0, 0], sizes = [12, 384], strides = [1, 1]} : vector<12x512xf32> to vector<12x384xf32>
    %99 = arith.negf %98 : vector<12x384xf32>
    %100 = math.exp %99 : vector<12x384xf32>
    %cst_33 = arith.constant 1.000000e+00 : f32
    %101 = vector.broadcast %cst_33 : f32 to vector<12x384xf32>
    %102 = arith.addf %101, %100 : vector<12x384xf32>
    %103 = arith.divf %101, %102 : vector<12x384xf32>
    %104 = vector.extract_strided_slice %103 {offsets = [0, 0], sizes = [12, 15], strides = [1, 1]} : vector<12x384xf32> to vector<12x15xf32>
    %105 = vector.extract_strided_slice %103 {offsets = [0, 128], sizes = [12, 15], strides = [1, 1]} : vector<12x384xf32> to vector<12x15xf32>
    %106 = vector.extract_strided_slice %103 {offsets = [0, 256], sizes = [12, 15], strides = [1, 1]} : vector<12x384xf32> to vector<12x15xf32>
    %107 = vector.extract_strided_slice %97 {offsets = [0, 384], sizes = [12, 15], strides = [1, 1]} : vector<12x512xf32> to vector<12x15xf32>
    %108 = math.tanh %107 : vector<12x15xf32>
    %109 = arith.mulf %105, %85 : vector<12x15xf32>
    %110 = arith.mulf %104, %108 : vector<12x15xf32>
    %111 = arith.addf %109, %110 : vector<12x15xf32>
    %112 = math.tanh %111 : vector<12x15xf32>
    %113 = arith.mulf %106, %112 : vector<12x15xf32>
    %114 = arith.index_cast %c3_i32 : i32 to index
    %c0_34 = arith.constant 0 : index
    %c0_35 = arith.constant 0 : index
    %115 = vector.load %arg20[%114, %c0_34, %c0_35] : memref<8x12x15xf32, #tpu.memory_space<vmem>>, vector<1x12x15xf32>
    %116 = vector.shape_cast %115 : vector<1x12x15xf32> to vector<12x15xf32>
    %117 = vector.shape_cast %113 : vector<12x15xf32> to vector<1x12x15xf32>
    tpu.vector_store %arg20[%114, %c0_34, %c0_35], %117 {strides = array<i32>} : memref<8x12x15xf32, #tpu.memory_space<vmem>>, vector<1x12x15xf32>,
    %c4_i32 = arith.constant 4 : i32
    %118 = arith.index_cast %c4_i32 : i32 to index
    %c0_36 = arith.constant 0 : index
    %c0_37 = arith.constant 0 : index
    %119 = vector.load %arg19[%118, %c0_36, %c0_37] : memref<8x12x512xf32, #tpu.memory_space<vmem>>, vector<1x12x512xf32>
    %120 = vector.shape_cast %119 : vector<1x12x512xf32> to vector<12x512xf32>
    %121 = arith.truncf %113 : vector<12x15xf32> to vector<12x15xbf16>
    %cst_38 = arith.constant dense<0.000000e+00> : vector<12x512xf32>
    %122 = tpu.matmul %121, %11, %cst_38 {dimension_numbers = #tpu.dot_dimension_numbers<[1], [0], [0], [1], [0, 0, 1, 1], [], []>} : vector<12x15xbf16>, vector<15x512xbf16>, vector<12x512xf32> -> vector<12x512xf32>
    %123 = arith.addf %120, %122 : vector<12x512xf32>
    %124 = vector.extract_strided_slice %123 {offsets = [0, 0], sizes = [12, 384], strides = [1, 1]} : vector<12x512xf32> to vector<12x384xf32>
    %125 = arith.negf %124 : vector<12x384xf32>
    %126 = math.exp %125 : vector<12x384xf32>
    %cst_39 = arith.constant 1.000000e+00 : f32
    %127 = vector.broadcast %cst_39 : f32 to vector<12x384xf32>
    %128 = arith.addf %127, %126 : vector<12x384xf32>
    %129 = arith.divf %127, %128 : vector<12x384xf32>
    %130 = vector.extract_strided_slice %129 {offsets = [0, 0], sizes = [12, 15], strides = [1, 1]} : vector<12x384xf32> to vector<12x15xf32>
    %131 = vector.extract_strided_slice %129 {offsets = [0, 128], sizes = [12, 15], strides = [1, 1]} : vector<12x384xf32> to vector<12x15xf32>
    %132 = vector.extract_strided_slice %129 {offsets = [0, 256], sizes = [12, 15], strides = [1, 1]} : vector<12x384xf32> to vector<12x15xf32>
    %133 = vector.extract_strided_slice %123 {offsets = [0, 384], sizes = [12, 15], strides = [1, 1]} : vector<12x512xf32> to vector<12x15xf32>
    %134 = math.tanh %133 : vector<12x15xf32>
    %135 = arith.mulf %131, %111 : vector<12x15xf32>
    %136 = arith.mulf %130, %134 : vector<12x15xf32>
    %137 = arith.addf %135, %136 : vector<12x15xf32>
    %138 = math.tanh %137 : vector<12x15xf32>
    %139 = arith.mulf %132, %138 : vector<12x15xf32>
    %140 = arith.index_cast %c4_i32 : i32 to index
    %c0_40 = arith.constant 0 : index
    %c0_41 = arith.constant 0 : index
    %141 = vector.load %arg20[%140, %c0_40, %c0_41] : memref<8x12x15xf32, #tpu.memory_space<vmem>>, vector<1x12x15xf32>
    %142 = vector.shape_cast %141 : vector<1x12x15xf32> to vector<12x15xf32>
    %143 = vector.shape_cast %139 : vector<12x15xf32> to vector<1x12x15xf32>
    tpu.vector_store %arg20[%140, %c0_40, %c0_41], %143 {strides = array<i32>} : memref<8x12x15xf32, #tpu.memory_space<vmem>>, vector<1x12x15xf32>,
    %c5_i32 = arith.constant 5 : i32
    %144 = arith.index_cast %c5_i32 : i32 to index
    %c0_42 = arith.constant 0 : index
    %c0_43 = arith.constant 0 : index
    %145 = vector.load %arg19[%144, %c0_42, %c0_43] : memref<8x12x512xf32, #tpu.memory_space<vmem>>, vector<1x12x512xf32>
    %146 = vector.shape_cast %145 : vector<1x12x512xf32> to vector<12x512xf32>
    %147 = arith.truncf %139 : vector<12x15xf32> to vector<12x15xbf16>
    %cst_44 = arith.constant dense<0.000000e+00> : vector<12x512xf32>
    %148 = tpu.matmul %147, %11, %cst_44 {dimension_numbers = #tpu.dot_dimension_numbers<[1], [0], [0], [1], [0, 0, 1, 1], [], []>} : vector<12x15xbf16>, vector<15x512xbf16>, vector<12x512xf32> -> vector<12x512xf32>
    %149 = arith.addf %146, %148 : vector<12x512xf32>
    %150 = vector.extract_strided_slice %149 {offsets = [0, 0], sizes = [12, 384], strides = [1, 1]} : vector<12x512xf32> to vector<12x384xf32>
    %151 = arith.negf %150 : vector<12x384xf32>
    %152 = math.exp %151 : vector<12x384xf32>
    %cst_45 = arith.constant 1.000000e+00 : f32
    %153 = vector.broadcast %cst_45 : f32 to vector<12x384xf32>
    %154 = arith.addf %153, %152 : vector<12x384xf32>
    %155 = arith.divf %153, %154 : vector<12x384xf32>
    %156 = vector.extract_strided_slice %155 {offsets = [0, 0], sizes = [12, 15], strides = [1, 1]} : vector<12x384xf32> to vector<12x15xf32>
    %157 = vector.extract_strided_slice %155 {offsets = [0, 128], sizes = [12, 15], strides = [1, 1]} : vector<12x384xf32> to vector<12x15xf32>
    %158 = vector.extract_strided_slice %155 {offsets = [0, 256], sizes = [12, 15], strides = [1, 1]} : vector<12x384xf32> to vector<12x15xf32>
    %159 = vector.extract_strided_slice %149 {offsets = [0, 384], sizes = [12, 15], strides = [1, 1]} : vector<12x512xf32> to vector<12x15xf32>
    %160 = math.tanh %159 : vector<12x15xf32>
    %161 = arith.mulf %157, %137 : vector<12x15xf32>
    %162 = arith.mulf %156, %160 : vector<12x15xf32>
    %163 = arith.addf %161, %162 : vector<12x15xf32>
    %164 = math.tanh %163 : vector<12x15xf32>
    %165 = arith.mulf %158, %164 : vector<12x15xf32>
    %166 = arith.index_cast %c5_i32 : i32 to index
    %c0_46 = arith.constant 0 : index
    %c0_47 = arith.constant 0 : index
    %167 = vector.load %arg20[%166, %c0_46, %c0_47] : memref<8x12x15xf32, #tpu.memory_space<vmem>>, vector<1x12x15xf32>
    %168 = vector.shape_cast %167 : vector<1x12x15xf32> to vector<12x15xf32>
    %169 = vector.shape_cast %165 : vector<12x15xf32> to vector<1x12x15xf32>
    tpu.vector_store %arg20[%166, %c0_46, %c0_47], %169 {strides = array<i32>} : memref<8x12x15xf32, #tpu.memory_space<vmem>>, vector<1x12x15xf32>,
    %c6_i32 = arith.constant 6 : i32
    %170 = arith.index_cast %c6_i32 : i32 to index
    %c0_48 = arith.constant 0 : index
    %c0_49 = arith.constant 0 : index
    %171 = vector.load %arg19[%170, %c0_48, %c0_49] : memref<8x12x512xf32, #tpu.memory_space<vmem>>, vector<1x12x512xf32>
    %172 = vector.shape_cast %171 : vector<1x12x512xf32> to vector<12x512xf32>
    %173 = arith.truncf %165 : vector<12x15xf32> to vector<12x15xbf16>
    %cst_50 = arith.constant dense<0.000000e+00> : vector<12x512xf32>
    %174 = tpu.matmul %173, %11, %cst_50 {dimension_numbers = #tpu.dot_dimension_numbers<[1], [0], [0], [1], [0, 0, 1, 1], [], []>} : vector<12x15xbf16>, vector<15x512xbf16>, vector<12x512xf32> -> vector<12x512xf32>
    %175 = arith.addf %172, %174 : vector<12x512xf32>
    %176 = vector.extract_strided_slice %175 {offsets = [0, 0], sizes = [12, 384], strides = [1, 1]} : vector<12x512xf32> to vector<12x384xf32>
    %177 = arith.negf %176 : vector<12x384xf32>
    %178 = math.exp %177 : vector<12x384xf32>
    %cst_51 = arith.constant 1.000000e+00 : f32
    %179 = vector.broadcast %cst_51 : f32 to vector<12x384xf32>
    %180 = arith.addf %179, %178 : vector<12x384xf32>
    %181 = arith.divf %179, %180 : vector<12x384xf32>
    %182 = vector.extract_strided_slice %181 {offsets = [0, 0], sizes = [12, 15], strides = [1, 1]} : vector<12x384xf32> to vector<12x15xf32>
    %183 = vector.extract_strided_slice %181 {offsets = [0, 128], sizes = [12, 15], strides = [1, 1]} : vector<12x384xf32> to vector<12x15xf32>
    %184 = vector.extract_strided_slice %181 {offsets = [0, 256], sizes = [12, 15], strides = [1, 1]} : vector<12x384xf32> to vector<12x15xf32>
    %185 = vector.extract_strided_slice %175 {offsets = [0, 384], sizes = [12, 15], strides = [1, 1]} : vector<12x512xf32> to vector<12x15xf32>
    %186 = math.tanh %185 : vector<12x15xf32>
    %187 = arith.mulf %183, %163 : vector<12x15xf32>
    %188 = arith.mulf %182, %186 : vector<12x15xf32>
    %189 = arith.addf %187, %188 : vector<12x15xf32>
    %190 = math.tanh %189 : vector<12x15xf32>
    %191 = arith.mulf %184, %190 : vector<12x15xf32>
    %192 = arith.index_cast %c6_i32 : i32 to index
    %c0_52 = arith.constant 0 : index
    %c0_53 = arith.constant 0 : index
    %193 = vector.load %arg20[%192, %c0_52, %c0_53] : memref<8x12x15xf32, #tpu.memory_space<vmem>>, vector<1x12x15xf32>
    %194 = vector.shape_cast %193 : vector<1x12x15xf32> to vector<12x15xf32>
    %195 = vector.shape_cast %191 : vector<12x15xf32> to vector<1x12x15xf32>
    tpu.vector_store %arg20[%192, %c0_52, %c0_53], %195 {strides = array<i32>} : memref<8x12x15xf32, #tpu.memory_space<vmem>>, vector<1x12x15xf32>,
    %c7_i32 = arith.constant 7 : i32
    %196 = arith.index_cast %c7_i32 : i32 to index
    %c0_54 = arith.constant 0 : index
    %c0_55 = arith.constant 0 : index
    %197 = vector.load %arg19[%196, %c0_54, %c0_55] : memref<8x12x512xf32, #tpu.memory_space<vmem>>, vector<1x12x512xf32>
    %198 = vector.shape_cast %197 : vector<1x12x512xf32> to vector<12x512xf32>
    %199 = arith.truncf %191 : vector<12x15xf32> to vector<12x15xbf16>
    %cst_56 = arith.constant dense<0.000000e+00> : vector<12x512xf32>
    %200 = tpu.matmul %199, %11, %cst_56 {dimension_numbers = #tpu.dot_dimension_numbers<[1], [0], [0], [1], [0, 0, 1, 1], [], []>} : vector<12x15xbf16>, vector<15x512xbf16>, vector<12x512xf32> -> vector<12x512xf32>
    %201 = arith.addf %198, %200 : vector<12x512xf32>
    %202 = vector.extract_strided_slice %201 {offsets = [0, 0], sizes = [12, 384], strides = [1, 1]} : vector<12x512xf32> to vector<12x384xf32>
    %203 = arith.negf %202 : vector<12x384xf32>
    %204 = math.exp %203 : vector<12x384xf32>
    %cst_57 = arith.constant 1.000000e+00 : f32
    %205 = vector.broadcast %cst_57 : f32 to vector<12x384xf32>
    %206 = arith.addf %205, %204 : vector<12x384xf32>
    %207 = arith.divf %205, %206 : vector<12x384xf32>
    %208 = vector.extract_strided_slice %207 {offsets = [0, 0], sizes = [12, 15], strides = [1, 1]} : vector<12x384xf32> to vector<12x15xf32>
    %209 = vector.extract_strided_slice %207 {offsets = [0, 128], sizes = [12, 15], strides = [1, 1]} : vector<12x384xf32> to vector<12x15xf32>
    %210 = vector.extract_strided_slice %207 {offsets = [0, 256], sizes = [12, 15], strides = [1, 1]} : vector<12x384xf32> to vector<12x15xf32>
    %211 = vector.extract_strided_slice %201 {offsets = [0, 384], sizes = [12, 15], strides = [1, 1]} : vector<12x512xf32> to vector<12x15xf32>
    %212 = math.tanh %211 : vector<12x15xf32>
    %213 = arith.mulf %209, %189 : vector<12x15xf32>
    %214 = arith.mulf %208, %212 : vector<12x15xf32>
    %215 = arith.addf %213, %214 : vector<12x15xf32>
    %216 = math.tanh %215 : vector<12x15xf32>
    %217 = arith.mulf %210, %216 : vector<12x15xf32>
    %218 = arith.index_cast %c7_i32 : i32 to index
    %c0_58 = arith.constant 0 : index
    %c0_59 = arith.constant 0 : index
    %219 = vector.load %arg20[%218, %c0_58, %c0_59] : memref<8x12x15xf32, #tpu.memory_space<vmem>>, vector<1x12x15xf32>
    %220 = vector.shape_cast %219 : vector<1x12x15xf32> to vector<12x15xf32>
    %221 = vector.shape_cast %217 : vector<12x15xf32> to vector<1x12x15xf32>
    tpu.vector_store %arg20[%218, %c0_58, %c0_59], %221 {strides = array<i32>} : memref<8x12x15xf32, #tpu.memory_space<vmem>>, vector<1x12x15xf32>,
    %c8_i32 = arith.constant 8 : i32
    %c0_60 = arith.constant 0 : index
    %c0_61 = arith.constant 0 : index
    %c0_62 = arith.constant 0 : index
    %222 = vector.load %arg20[%c0_60, %c0_61, %c0_62] : memref<8x12x15xf32, #tpu.memory_space<vmem>>, vector<8x12x15xf32>
    %c0_63 = arith.constant 0 : index
    %c0_64 = arith.constant 0 : index
    %223 = vector.load %arg5[%c0_63, %c0_64] : memref<1x128xf32, #tpu.memory_space<vmem>>, vector<1x128xf32>
    %224 = vector.shape_cast %223 : vector<1x128xf32> to vector<1x128xf32>
    %225 = vector.broadcast %224 : vector<1x128xf32> to vector<8x128xf32>
    %226 = vector.extract_strided_slice %222 {offsets = [0, 0, 0], sizes = [8, 1, 15], strides = [1, 1, 1]} : vector<8x12x15xf32> to vector<8x1x15xf32>
    %227 = vector.shape_cast %226 : vector<8x1x15xf32> to vector<8x15xf32>
    %c0_65 = arith.constant 0 : index
    %c0_66 = arith.constant 0 : index
    %c0_67 = arith.constant 0 : index
    %228 = vector.load %arg4[%c0_65, %c0_66, %c0_67] : memref<12x15x128xf32, #tpu.memory_space<vmem>>, vector<1x15x128xf32>
    %229 = vector.shape_cast %228 : vector<1x15x128xf32> to vector<15x128xf32>
    %cst_68 = arith.constant dense<0.000000e+00> : vector<8x128xf32>
    %230 = tpu.matmul %227, %229, %cst_68 {dimension_numbers = #tpu.dot_dimension_numbers<[1], [0], [0], [1], [0, 0, 1, 1], [], []>} : vector<8x15xf32>, vector<15x128xf32>, vector<8x128xf32> -> vector<8x128xf32>
    %231 = arith.addf %225, %230 : vector<8x128xf32>
    %232 = vector.extract_strided_slice %222 {offsets = [0, 1, 0], sizes = [8, 1, 15], strides = [1, 1, 1]} : vector<8x12x15xf32> to vector<8x1x15xf32>
    %233 = vector.shape_cast %232 : vector<8x1x15xf32> to vector<8x15xf32>
    %c1 = arith.constant 1 : index
    %c0_69 = arith.constant 0 : index
    %c0_70 = arith.constant 0 : index
    %234 = vector.load %arg4[%c1, %c0_69, %c0_70] : memref<12x15x128xf32, #tpu.memory_space<vmem>>, vector<1x15x128xf32>
    %235 = vector.shape_cast %234 : vector<1x15x128xf32> to vector<15x128xf32>
    %cst_71 = arith.constant dense<0.000000e+00> : vector<8x128xf32>
    %236 = tpu.matmul %233, %235, %cst_71 {dimension_numbers = #tpu.dot_dimension_numbers<[1], [0], [0], [1], [0, 0, 1, 1], [], []>} : vector<8x15xf32>, vector<15x128xf32>, vector<8x128xf32> -> vector<8x128xf32>
    %237 = arith.addf %231, %236 : vector<8x128xf32>
    %238 = vector.extract_strided_slice %222 {offsets = [0, 2, 0], sizes = [8, 1, 15], strides = [1, 1, 1]} : vector<8x12x15xf32> to vector<8x1x15xf32>
    %239 = vector.shape_cast %238 : vector<8x1x15xf32> to vector<8x15xf32>
    %c2 = arith.constant 2 : index
    %c0_72 = arith.constant 0 : index
    %c0_73 = arith.constant 0 : index
    %240 = vector.load %arg4[%c2, %c0_72, %c0_73] : memref<12x15x128xf32, #tpu.memory_space<vmem>>, vector<1x15x128xf32>
    %241 = vector.shape_cast %240 : vector<1x15x128xf32> to vector<15x128xf32>
    %cst_74 = arith.constant dense<0.000000e+00> : vector<8x128xf32>
    %242 = tpu.matmul %239, %241, %cst_74 {dimension_numbers = #tpu.dot_dimension_numbers<[1], [0], [0], [1], [0, 0, 1, 1], [], []>} : vector<8x15xf32>, vector<15x128xf32>, vector<8x128xf32> -> vector<8x128xf32>
    %243 = arith.addf %237, %242 : vector<8x128xf32>
    %244 = vector.extract_strided_slice %222 {offsets = [0, 3, 0], sizes = [8, 1, 15], strides = [1, 1, 1]} : vector<8x12x15xf32> to vector<8x1x15xf32>
    %245 = vector.shape_cast %244 : vector<8x1x15xf32> to vector<8x15xf32>
    %c3 = arith.constant 3 : index
    %c0_75 = arith.constant 0 : index
    %c0_76 = arith.constant 0 : index
    %246 = vector.load %arg4[%c3, %c0_75, %c0_76] : memref<12x15x128xf32, #tpu.memory_space<vmem>>, vector<1x15x128xf32>
    %247 = vector.shape_cast %246 : vector<1x15x128xf32> to vector<15x128xf32>
    %cst_77 = arith.constant dense<0.000000e+00> : vector<8x128xf32>
    %248 = tpu.matmul %245, %247, %cst_77 {dimension_numbers = #tpu.dot_dimension_numbers<[1], [0], [0], [1], [0, 0, 1, 1], [], []>} : vector<8x15xf32>, vector<15x128xf32>, vector<8x128xf32> -> vector<8x128xf32>
    %249 = arith.addf %243, %248 : vector<8x128xf32>
    %250 = vector.extract_strided_slice %222 {offsets = [0, 4, 0], sizes = [8, 1, 15], strides = [1, 1, 1]} : vector<8x12x15xf32> to vector<8x1x15xf32>
    %251 = vector.shape_cast %250 : vector<8x1x15xf32> to vector<8x15xf32>
    %c4 = arith.constant 4 : index
    %c0_78 = arith.constant 0 : index
    %c0_79 = arith.constant 0 : index
    %252 = vector.load %arg4[%c4, %c0_78, %c0_79] : memref<12x15x128xf32, #tpu.memory_space<vmem>>, vector<1x15x128xf32>
    %253 = vector.shape_cast %252 : vector<1x15x128xf32> to vector<15x128xf32>
    %cst_80 = arith.constant dense<0.000000e+00> : vector<8x128xf32>
    %254 = tpu.matmul %251, %253, %cst_80 {dimension_numbers = #tpu.dot_dimension_numbers<[1], [0], [0], [1], [0, 0, 1, 1], [], []>} : vector<8x15xf32>, vector<15x128xf32>, vector<8x128xf32> -> vector<8x128xf32>
    %255 = arith.addf %249, %254 : vector<8x128xf32>
    %256 = vector.extract_strided_slice %222 {offsets = [0, 5, 0], sizes = [8, 1, 15], strides = [1, 1, 1]} : vector<8x12x15xf32> to vector<8x1x15xf32>
    %257 = vector.shape_cast %256 : vector<8x1x15xf32> to vector<8x15xf32>
    %c5 = arith.constant 5 : index
    %c0_81 = arith.constant 0 : index
    %c0_82 = arith.constant 0 : index
    %258 = vector.load %arg4[%c5, %c0_81, %c0_82] : memref<12x15x128xf32, #tpu.memory_space<vmem>>, vector<1x15x128xf32>
    %259 = vector.shape_cast %258 : vector<1x15x128xf32> to vector<15x128xf32>
    %cst_83 = arith.constant dense<0.000000e+00> : vector<8x128xf32>
    %260 = tpu.matmul %257, %259, %cst_83 {dimension_numbers = #tpu.dot_dimension_numbers<[1], [0], [0], [1], [0, 0, 1, 1], [], []>} : vector<8x15xf32>, vector<15x128xf32>, vector<8x128xf32> -> vector<8x128xf32>
    %261 = arith.addf %255, %260 : vector<8x128xf32>
    %262 = vector.extract_strided_slice %222 {offsets = [0, 6, 0], sizes = [8, 1, 15], strides = [1, 1, 1]} : vector<8x12x15xf32> to vector<8x1x15xf32>
    %263 = vector.shape_cast %262 : vector<8x1x15xf32> to vector<8x15xf32>
    %c6 = arith.constant 6 : index
    %c0_84 = arith.constant 0 : index
    %c0_85 = arith.constant 0 : index
    %264 = vector.load %arg4[%c6, %c0_84, %c0_85] : memref<12x15x128xf32, #tpu.memory_space<vmem>>, vector<1x15x128xf32>
    %265 = vector.shape_cast %264 : vector<1x15x128xf32> to vector<15x128xf32>
    %cst_86 = arith.constant dense<0.000000e+00> : vector<8x128xf32>
    %266 = tpu.matmul %263, %265, %cst_86 {dimension_numbers = #tpu.dot_dimension_numbers<[1], [0], [0], [1], [0, 0, 1, 1], [], []>} : vector<8x15xf32>, vector<15x128xf32>, vector<8x128xf32> -> vector<8x128xf32>
    %267 = arith.addf %261, %266 : vector<8x128xf32>
    %268 = vector.extract_strided_slice %222 {offsets = [0, 7, 0], sizes = [8, 1, 15], strides = [1, 1, 1]} : vector<8x12x15xf32> to vector<8x1x15xf32>
    %269 = vector.shape_cast %268 : vector<8x1x15xf32> to vector<8x15xf32>
    %c7 = arith.constant 7 : index
    %c0_87 = arith.constant 0 : index
    %c0_88 = arith.constant 0 : index
    %270 = vector.load %arg4[%c7, %c0_87, %c0_88] : memref<12x15x128xf32, #tpu.memory_space<vmem>>, vector<1x15x128xf32>
    %271 = vector.shape_cast %270 : vector<1x15x128xf32> to vector<15x128xf32>
    %cst_89 = arith.constant dense<0.000000e+00> : vector<8x128xf32>
    %272 = tpu.matmul %269, %271, %cst_89 {dimension_numbers = #tpu.dot_dimension_numbers<[1], [0], [0], [1], [0, 0, 1, 1], [], []>} : vector<8x15xf32>, vector<15x128xf32>, vector<8x128xf32> -> vector<8x128xf32>
    %273 = arith.addf %267, %272 : vector<8x128xf32>
    %274 = vector.extract_strided_slice %222 {offsets = [0, 8, 0], sizes = [8, 1, 15], strides = [1, 1, 1]} : vector<8x12x15xf32> to vector<8x1x15xf32>
    %275 = vector.shape_cast %274 : vector<8x1x15xf32> to vector<8x15xf32>
    %c8 = arith.constant 8 : index
    %c0_90 = arith.constant 0 : index
    %c0_91 = arith.constant 0 : index
    %276 = vector.load %arg4[%c8, %c0_90, %c0_91] : memref<12x15x128xf32, #tpu.memory_space<vmem>>, vector<1x15x128xf32>
    %277 = vector.shape_cast %276 : vector<1x15x128xf32> to vector<15x128xf32>
    %cst_92 = arith.constant dense<0.000000e+00> : vector<8x128xf32>
    %278 = tpu.matmul %275, %277, %cst_92 {dimension_numbers = #tpu.dot_dimension_numbers<[1], [0], [0], [1], [0, 0, 1, 1], [], []>} : vector<8x15xf32>, vector<15x128xf32>, vector<8x128xf32> -> vector<8x128xf32>
    %279 = arith.addf %273, %278 : vector<8x128xf32>
    %280 = vector.extract_strided_slice %222 {offsets = [0, 9, 0], sizes = [8, 1, 15], strides = [1, 1, 1]} : vector<8x12x15xf32> to vector<8x1x15xf32>
    %281 = vector.shape_cast %280 : vector<8x1x15xf32> to vector<8x15xf32>
    %c9 = arith.constant 9 : index
    %c0_93 = arith.constant 0 : index
    %c0_94 = arith.constant 0 : index
    %282 = vector.load %arg4[%c9, %c0_93, %c0_94] : memref<12x15x128xf32, #tpu.memory_space<vmem>>, vector<1x15x128xf32>
    %283 = vector.shape_cast %282 : vector<1x15x128xf32> to vector<15x128xf32>
    %cst_95 = arith.constant dense<0.000000e+00> : vector<8x128xf32>
    %284 = tpu.matmul %281, %283, %cst_95 {dimension_numbers = #tpu.dot_dimension_numbers<[1], [0], [0], [1], [0, 0, 1, 1], [], []>} : vector<8x15xf32>, vector<15x128xf32>, vector<8x128xf32> -> vector<8x128xf32>
    %285 = arith.addf %279, %284 : vector<8x128xf32>
    %286 = vector.extract_strided_slice %222 {offsets = [0, 10, 0], sizes = [8, 1, 15], strides = [1, 1, 1]} : vector<8x12x15xf32> to vector<8x1x15xf32>
    %287 = vector.shape_cast %286 : vector<8x1x15xf32> to vector<8x15xf32>
    %c10 = arith.constant 10 : index
    %c0_96 = arith.constant 0 : index
    %c0_97 = arith.constant 0 : index
    %288 = vector.load %arg4[%c10, %c0_96, %c0_97] : memref<12x15x128xf32, #tpu.memory_space<vmem>>, vector<1x15x128xf32>
    %289 = vector.shape_cast %288 : vector<1x15x128xf32> to vector<15x128xf32>
    %cst_98 = arith.constant dense<0.000000e+00> : vector<8x128xf32>
    %290 = tpu.matmul %287, %289, %cst_98 {dimension_numbers = #tpu.dot_dimension_numbers<[1], [0], [0], [1], [0, 0, 1, 1], [], []>} : vector<8x15xf32>, vector<15x128xf32>, vector<8x128xf32> -> vector<8x128xf32>
    %291 = arith.addf %285, %290 : vector<8x128xf32>
    %292 = vector.extract_strided_slice %222 {offsets = [0, 11, 0], sizes = [8, 1, 15], strides = [1, 1, 1]} : vector<8x12x15xf32> to vector<8x1x15xf32>
    %293 = vector.shape_cast %292 : vector<8x1x15xf32> to vector<8x15xf32>
    %c11 = arith.constant 11 : index
    %c0_99 = arith.constant 0 : index
    %c0_100 = arith.constant 0 : index
    %294 = vector.load %arg4[%c11, %c0_99, %c0_100] : memref<12x15x128xf32, #tpu.memory_space<vmem>>, vector<1x15x128xf32>
    %295 = vector.shape_cast %294 : vector<1x15x128xf32> to vector<15x128xf32>
    %cst_101 = arith.constant dense<0.000000e+00> : vector<8x128xf32>
    %296 = tpu.matmul %293, %295, %cst_101 {dimension_numbers = #tpu.dot_dimension_numbers<[1], [0], [0], [1], [0, 0, 1, 1], [], []>} : vector<8x15xf32>, vector<15x128xf32>, vector<8x128xf32> -> vector<8x128xf32>
    %297 = arith.addf %291, %296 : vector<8x128xf32>
    %cst_102 = arith.constant 0.000000e+00 : f32
    %298 = vector.broadcast %cst_102 : f32 to vector<8x128xf32>
    %299 = arith.maximumf %297, %298 : vector<8x128xf32>
    %cst_103 = arith.constant dense<0.000000e+00> : vector<128xf32>
    %300 = vector.multi_reduction <add>, %299, %cst_103 [0] : vector<8x128xf32> to vector<128xf32>
    %301 = vector.shape_cast %300 : vector<128xf32> to vector<1x128xf32>
    %cst_104 = arith.constant 8.000000e+00 : f32
    %302 = vector.broadcast %cst_104 : f32 to vector<1x128xf32>
    %303 = arith.divf %301, %302 : vector<1x128xf32>
    %304 = vector.broadcast %303 : vector<1x128xf32> to vector<8x128xf32>
    %305 = arith.subf %299, %304 : vector<8x128xf32>
    %306 = arith.mulf %305, %305 : vector<8x128xf32>
    %cst_105 = arith.constant dense<0.000000e+00> : vector<128xf32>
    %307 = vector.multi_reduction <add>, %306, %cst_105 [0] : vector<8x128xf32> to vector<128xf32>
    %308 = vector.shape_cast %307 : vector<128xf32> to vector<1x128xf32>
    %cst_106 = arith.constant 8.000000e+00 : f32
    %309 = vector.broadcast %cst_106 : f32 to vector<1x128xf32>
    %310 = arith.divf %308, %309 : vector<1x128xf32>
    %cst_107 = arith.constant 9.99999974E-6 : f32
    %311 = vector.broadcast %cst_107 : f32 to vector<1x128xf32>
    %312 = arith.addf %310, %311 : vector<1x128xf32>
    %313 = math.rsqrt %312 : vector<1x128xf32>
    %314 = vector.broadcast %313 : vector<1x128xf32> to vector<8x128xf32>
    %315 = arith.mulf %305, %314 : vector<8x128xf32>
    %c0_108 = arith.constant 0 : index
    %c0_109 = arith.constant 0 : index
    %316 = vector.load %arg6[%c0_108, %c0_109] : memref<1x128xf32, #tpu.memory_space<vmem>>, vector<1x128xf32>
    %317 = vector.broadcast %316 : vector<1x128xf32> to vector<8x128xf32>
    %318 = arith.mulf %315, %317 : vector<8x128xf32>
    %c0_110 = arith.constant 0 : index
    %c0_111 = arith.constant 0 : index
    %319 = vector.load %arg7[%c0_110, %c0_111] : memref<1x128xf32, #tpu.memory_space<vmem>>, vector<1x128xf32>
    %320 = vector.broadcast %319 : vector<1x128xf32> to vector<8x128xf32>
    %321 = arith.addf %318, %320 : vector<8x128xf32>
    %c0_112 = arith.constant 0 : index
    %c0_113 = arith.constant 0 : index
    %322 = vector.load %arg8[%c0_112, %c0_113] : memref<128x256xf32, #tpu.memory_space<vmem>>, vector<128x256xf32>
    %cst_114 = arith.constant dense<0.000000e+00> : vector<8x256xf32>
    %323 = tpu.matmul %321, %322, %cst_114 {dimension_numbers = #tpu.dot_dimension_numbers<[1], [0], [0], [1], [0, 0, 1, 1], [], []>} : vector<8x128xf32>, vector<128x256xf32>, vector<8x256xf32> -> vector<8x256xf32>
    %c0_115 = arith.constant 0 : index
    %c0_116 = arith.constant 0 : index
    %324 = vector.load %arg9[%c0_115, %c0_116] : memref<1x256xf32, #tpu.memory_space<vmem>>, vector<1x256xf32>
    %325 = vector.broadcast %324 : vector<1x256xf32> to vector<8x256xf32>
    %326 = arith.addf %323, %325 : vector<8x256xf32>
    %cst_117 = arith.constant 0.000000e+00 : f32
    %327 = vector.broadcast %cst_117 : f32 to vector<8x256xf32>
    %328 = arith.maximumf %326, %327 : vector<8x256xf32>
    %cst_118 = arith.constant dense<0.000000e+00> : vector<256xf32>
    %329 = vector.multi_reduction <add>, %328, %cst_118 [0] : vector<8x256xf32> to vector<256xf32>
    %330 = vector.shape_cast %329 : vector<256xf32> to vector<1x256xf32>
    %cst_119 = arith.constant 8.000000e+00 : f32
    %331 = vector.broadcast %cst_119 : f32 to vector<1x256xf32>
    %332 = arith.divf %330, %331 : vector<1x256xf32>
    %333 = vector.broadcast %332 : vector<1x256xf32> to vector<8x256xf32>
    %334 = arith.subf %328, %333 : vector<8x256xf32>
    %335 = arith.mulf %334, %334 : vector<8x256xf32>
    %cst_120 = arith.constant dense<0.000000e+00> : vector<256xf32>
    %336 = vector.multi_reduction <add>, %335, %cst_120 [0] : vector<8x256xf32> to vector<256xf32>
    %337 = vector.shape_cast %336 : vector<256xf32> to vector<1x256xf32>
    %cst_121 = arith.constant 8.000000e+00 : f32
    %338 = vector.broadcast %cst_121 : f32 to vector<1x256xf32>
    %339 = arith.divf %337, %338 : vector<1x256xf32>
    %cst_122 = arith.constant 9.99999974E-6 : f32
    %340 = vector.broadcast %cst_122 : f32 to vector<1x256xf32>
    %341 = arith.addf %339, %340 : vector<1x256xf32>
    %342 = math.rsqrt %341 : vector<1x256xf32>
    %343 = vector.broadcast %342 : vector<1x256xf32> to vector<8x256xf32>
    %344 = arith.mulf %334, %343 : vector<8x256xf32>
    %c0_123 = arith.constant 0 : index
    %c0_124 = arith.constant 0 : index
    %345 = vector.load %arg10[%c0_123, %c0_124] : memref<1x256xf32, #tpu.memory_space<vmem>>, vector<1x256xf32>
    %346 = vector.broadcast %345 : vector<1x256xf32> to vector<8x256xf32>
    %347 = arith.mulf %344, %346 : vector<8x256xf32>
    %c0_125 = arith.constant 0 : index
    %c0_126 = arith.constant 0 : index
    %348 = vector.load %arg11[%c0_125, %c0_126] : memref<1x256xf32, #tpu.memory_space<vmem>>, vector<1x256xf32>
    %349 = vector.broadcast %348 : vector<1x256xf32> to vector<8x256xf32>
    %350 = arith.addf %347, %349 : vector<8x256xf32>
    %c0_127 = arith.constant 0 : index
    %c0_128 = arith.constant 0 : index
    %351 = vector.load %arg12[%c0_127, %c0_128] : memref<256x128xf32, #tpu.memory_space<vmem>>, vector<256x128xf32>
    %cst_129 = arith.constant dense<0.000000e+00> : vector<8x128xf32>
    %352 = tpu.matmul %350, %351, %cst_129 {dimension_numbers = #tpu.dot_dimension_numbers<[1], [0], [0], [1], [0, 0, 1, 1], [], []>} : vector<8x256xf32>, vector<256x128xf32>, vector<8x128xf32> -> vector<8x128xf32>
    %c0_130 = arith.constant 0 : index
    %c0_131 = arith.constant 0 : index
    %353 = vector.load %arg13[%c0_130, %c0_131] : memref<1x128xf32, #tpu.memory_space<vmem>>, vector<1x128xf32>
    %354 = vector.broadcast %353 : vector<1x128xf32> to vector<8x128xf32>
    %355 = arith.addf %352, %354 : vector<8x128xf32>
    %cst_132 = arith.constant 0.000000e+00 : f32
    %356 = vector.broadcast %cst_132 : f32 to vector<8x128xf32>
    %357 = arith.maximumf %355, %356 : vector<8x128xf32>
    %cst_133 = arith.constant dense<0.000000e+00> : vector<128xf32>
    %358 = vector.multi_reduction <add>, %357, %cst_133 [0] : vector<8x128xf32> to vector<128xf32>
    %359 = vector.shape_cast %358 : vector<128xf32> to vector<1x128xf32>
    %cst_134 = arith.constant 8.000000e+00 : f32
    %360 = vector.broadcast %cst_134 : f32 to vector<1x128xf32>
    %361 = arith.divf %359, %360 : vector<1x128xf32>
    %362 = vector.broadcast %361 : vector<1x128xf32> to vector<8x128xf32>
    %363 = arith.subf %357, %362 : vector<8x128xf32>
    %364 = arith.mulf %363, %363 : vector<8x128xf32>
    %cst_135 = arith.constant dense<0.000000e+00> : vector<128xf32>
    %365 = vector.multi_reduction <add>, %364, %cst_135 [0] : vector<8x128xf32> to vector<128xf32>
    %366 = vector.shape_cast %365 : vector<128xf32> to vector<1x128xf32>
    %cst_136 = arith.constant 8.000000e+00 : f32
    %367 = vector.broadcast %cst_136 : f32 to vector<1x128xf32>
    %368 = arith.divf %366, %367 : vector<1x128xf32>
    %cst_137 = arith.constant 9.99999974E-6 : f32
    %369 = vector.broadcast %cst_137 : f32 to vector<1x128xf32>
    %370 = arith.addf %368, %369 : vector<1x128xf32>
    %371 = math.rsqrt %370 : vector<1x128xf32>
    %372 = vector.broadcast %371 : vector<1x128xf32> to vector<8x128xf32>
    %373 = arith.mulf %363, %372 : vector<8x128xf32>
    %c0_138 = arith.constant 0 : index
    %c0_139 = arith.constant 0 : index
    %374 = vector.load %arg14[%c0_138, %c0_139] : memref<1x128xf32, #tpu.memory_space<vmem>>, vector<1x128xf32>
    %375 = vector.broadcast %374 : vector<1x128xf32> to vector<8x128xf32>
    %376 = arith.mulf %373, %375 : vector<8x128xf32>
    %c0_140 = arith.constant 0 : index
    %c0_141 = arith.constant 0 : index
    %377 = vector.load %arg15[%c0_140, %c0_141] : memref<1x128xf32, #tpu.memory_space<vmem>>, vector<1x128xf32>
    %378 = vector.broadcast %377 : vector<1x128xf32> to vector<8x128xf32>
    %379 = arith.addf %376, %378 : vector<8x128xf32>
    %c0_142 = arith.constant 0 : index
    %c0_143 = arith.constant 0 : index
    %380 = vector.load %arg16[%c0_142, %c0_143] : memref<128x4xf32, #tpu.memory_space<vmem>>, vector<128x4xf32>
    %cst_144 = arith.constant dense<0.000000e+00> : vector<8x4xf32>
    %381 = tpu.matmul %379, %380, %cst_144 {dimension_numbers = #tpu.dot_dimension_numbers<[1], [0], [0], [1], [0, 0, 1, 1], [], []>} : vector<8x128xf32>, vector<128x4xf32>, vector<8x4xf32> -> vector<8x4xf32>
    %c0_145 = arith.constant 0 : index
    %c0_146 = arith.constant 0 : index
    %382 = vector.load %arg17[%c0_145, %c0_146] : memref<1x4xf32, #tpu.memory_space<vmem>>, vector<1x4xf32>
    %383 = vector.broadcast %382 : vector<1x4xf32> to vector<8x4xf32>
    %384 = arith.addf %381, %383 : vector<8x4xf32>
    %cst_147 = arith.constant 0.000000e+00 : f32
    %385 = vector.broadcast %cst_147 : f32 to vector<8x4xf32>
    %386 = arith.maximumf %384, %385 : vector<8x4xf32>
    %c0_148 = arith.constant 0 : index
    %c0_149 = arith.constant 0 : index
    %387 = vector.load %arg18[%c0_148, %c0_149] : memref<8x4xf32, #tpu.memory_space<vmem>>, vector<8x4xf32>
    tpu.vector_store %arg18[%c0_148, %c0_149], %386 {strides = array<i32>} : memref<8x4xf32, #tpu.memory_space<vmem>>, vector<8x4xf32>,
    return
  }
}

</mosaic_0001>

<bundles_post_ra>
// kernel: lstm_linear_forward.1
= control target key start
LH: loop header
LB: loop body
LE: loop exit
PB: predicated region body
PF: predicated region fallthrough
CT: control target
= control target key end

     0   :  { %vm424_vm0 = vcmask 1046528   ;;  %vm425_vm1 = vcmask 1047552   ;;  %v3921_v1 = vmov 65535   ;;  %v3922_v3 = vmov 0   ;;  %s5110_s2 = inlined_call_operand.vmem [shape: bf16[15,512], index: 2, kind: input, shape index: {}]   ;;  %s5111_s0 = inlined_call_operand.vmem [shape: f32[8,12,1], index: 0, kind: input, shape index: {}]   ;;  %s5112_s1 = inlined_call_operand.vmem [shape: f32[1,512], index: 1, kind: input, shape index: {}]   ;;  %s5113_s3 = inlined_call_operand.vmem [shape: f32[1,512], index: 3, kind: input, shape index: {}]   ;;  %s5114_s4 = inlined_call_operand.vmem [shape: f32[12,15,128], index: 4, kind: input, shape index: {}]   ;;  %s5115_s8 = inlined_call_operand.vmem [shape: f32[128,256], index: 8, kind: input, shape index: {}]   ;;  %s5116_s5 = inlined_call_operand.vmem [shape: f32[1,128], index: 5, kind: input, shape index: {}]   ;;  %s5117_s6 = inlined_call_operand.vmem [shape: f32[1,128], index: 6, kind: input, shape index: {}]   ;;  %s5118_s7 = inlined_call_operand.vmem [shape: f32[1,128], index: 7, kind: input, shape index: {}]   ;;  %s5119_s12 = inlined_call_operand.vmem [shape: f32[256,128], index: 12, kind: input, shape index: {}]   ;;  %s5120_s9 = inlined_call_operand.vmem [shape: f32[1,256], index: 9, kind: input, shape index: {}]   ;;  %s5121_s10 = inlined_call_operand.vmem [shape: f32[1,256], index: 10, kind: input, shape index: {}]   ;;  %s5122_s11 = inlined_call_operand.vmem [shape: f32[1,256], index: 11, kind: input, shape index: {}]   ;;  %s5123_s16 = inlined_call_operand.vmem [shape: f32[128,4], index: 16, kind: input, shape index: {}]   ;;  %s5124_s13 = inlined_call_operand.vmem [shape: f32[1,128], index: 13, kind: input, shape index: {}]   ;;  %s5125_s14 = inlined_call_operand.vmem [shape: f32[1,128], index: 14, kind: input, shape index: {}]   ;;  %s5126_s15 = inlined_call_operand.vmem [shape: f32[1,128], index: 15, kind: input, shape index: {}]   ;;  %s5127_s17 = inlined_call_operand.vmem [shape: f32[1,4], index: 17, kind: input, shape index: {}]   ;;  %s5128_s18 = inlined_call_operand.vmem [shape: f32[8,4], index: 18, kind: output, shape index: {}]  }
   0x1   :  { %5131 = sst [smem:[#allocation4_spill]] %s5110_s2  ;;  %v426_v2 = vsel %vm424_vm0, 4294967295, %v3921_v1  ;;  %472 = vmatprep.mubr.bf16.mxu1 %v3922_v3  ;;  %3647 = vset.pattern.permute.xlu0 %v3922_v3  ;;  %v158_v20 = vlaneseq  ;;  %v242_v27 = vld [vmem:[%s5113_s3] sm:$0xf]  ;;  %vm420_vm2 = vcmask 121856   ;;  %vm583_vm3 = vcmask 117760  }
   0x2   :  { %5132 = sst [smem:[#allocation5_spill]] %s5111_s0  ;;  %v427_v4 = vsel %vm425_vm1, %v426_v2, 0  ;;  %3648 = vset.pattern.permute.xlu1 %v3922_v3  ;;  %788 = vmatprep.mubr.bf16.mxu0 %v3922_v3  ;;  %vm3924_vm4 = vmmov 0   ;;  %vm1725_vm5 = vcmask 1041409   ;;  %vm1728_vm6 = vcmask 1042434  }
   0x3   :  { %5133 = sst [smem:[#allocation6_spill]] %s5112_s1  ;;  %v159_v21 = vshrl.u32 %v158_v20, 7  ;;  %vm1731_vm7 = vcmask 1043459   ;;  %vm1734_vm8 = vcmask 1044484   ;;  %vm1737_vm9 = vcmask 1045509  }
   0x4   :  { %s5134_s29 = sld [smem:[#allocation4_spill]]  ;;  %vm1740_vm10 = vcmask 1046534   ;;  %vm1743_vm11 = vcmask 1047559   ;;  %vm3311_vm12 = vcmask 31744  }
   0x5   :  { %s5135_s23 = sld [smem:[#allocation5_spill]]  ;;  %v4083_v22 = vsub.s32 0, %v159_v21  ;;  %v4085_v23 = vsub.s32 1, %v159_v21  ;;  %v168_v24 = vsub.s32 2, %v159_v21  ;;  %v172_v25 = vsub.s32 3, %v159_v21 }
   0x6   :  { %s5136_s26 = sld [smem:[#allocation6_spill]] }
   0x7   :  { %v4104_v32 = vrot.slane %v242_v27, %v4083_v22  ;;  %v4107_v33 = vrot.slane %v242_v27, %v4085_v23  ;;  %v4109_v34 = vrot.slane %v242_v27, %v168_v24  ;;  %v4111_v35 = vrot.slane %v242_v27, %v172_v25 }
   0xa   :  { %v3649_v0 = vld [vmem:[%s5134_s29 + $0x4] ss:$16 sps:$4 sm:$0xff]   ;;  %v3651_v5 = vld [vmem:[%s5134_s29] ss:$16 sps:$4 sm:$0xff]   ;;  %v3652_v7 = vld [vmem:[%s5134_s29 + $0xc] ss:$16 sps:$4 sm:$0xff]  }
   0xb   :  { %v4031_v6 = vand.u32 %v3649_v0, %v427_v4  ;;  %v3654_v8 = vld [vmem:[%s5134_s29 + $0x8] ss:$16 sps:$4 sm:$0xff]   ;;  %v60_v9 = vld [vmem:[%s5135_s23] sm:$0xff]  ;;  %v4042_v10 = vand.u32 %v3651_v5, %v427_v4  ;;  %v4045_v11 = vand.u32 %v3652_v7, %v427_v4  ;;  %v66_v15 = vld [vmem:[%s5135_s23 + $0x30] sm:$0xff] }
   0xc   :  { %79 = vperm.xlu0 %3647, %v60_v9   ;;  %v61_v12 = vld [vmem:[%s5135_s23 + $0x8] sm:$0xf]  ;;  %v4052_v13 = vand.u32 %v3654_v8, %v427_v4  ;;  %v64_v14 = vld [vmem:[%s5135_s23 + $0x20] sm:$0xff]  ;;  %v70_v17 = vld [vmem:[%s5135_s23 + $0x50] sm:$0xff] }
   0xd   :  { %454 = vmatprep.subr.bf16.mxu1 %v4031_v6  ;;  %770 = vmatprep.subr.bf16.mxu0 %v4031_v6  ;;  %v68_v16 = vld [vmem:[%s5135_s23 + $0x40] sm:$0xff]  ;;  %v74_v19 = vld [vmem:[%s5135_s23 + $0x70] sm:$0xff] }
   0xe   :  { %455 = vmatpush1.bf16.msra.mxu1 %v4042_v10  ;;  %771 = vmatpush1.bf16.msra.mxu0 %v4042_v10  ;;  %v72_v18 = vld [vmem:[%s5135_s23 + $0x60] sm:$0xff] }
   0xf   :  { %497 = vmatprep.subr.bf16.mxu1 %v4045_v11  ;;  %928 = vmatprep.subr.bf16.mxu0 %v4031_v6  ;;  %v76_v26 = vld [vmem:[%s5136_s26] sm:$0xf] }
  0x10   :  { %84 = vperm.xlu0 %3647, %v61_v12   ;;  %v4094_v28 = vrot.slane %v76_v26, %v4083_v22  ;;  %v4097_v29 = vrot.slane %v76_v26, %v4085_v23  ;;  %v4099_v30 = vrot.slane %v76_v26, %v168_v24  ;;  %v4101_v31 = vrot.slane %v76_v26, %v172_v25  ;;  %v63_v25 = vld [vmem:[%s5135_s23 + $0x18] sm:$0xf] }
  0x11   :  { %473 = vmatmul.mubr.bf16.vlgmr.msra.gmra.mxu1 %v3922_v3 }
  0x12   :  { %498 = vmatpush1.bf16.msra.mxu1 %v4052_v13  ;;  %515 = vmatprep.mubr.bf16.mxu1 %v3922_v3 }
  0x13   :  { %612 = vmatprep.subr.bf16.mxu1 %v4031_v6 }
  0x14   :  { %99 = vperm.xlu0 %3647, %v64_v14  }
  0x18   :  { %109 = vperm.xlu0 %3647, %v66_v15  }
  0x19   :  { %516 = vmatmul.mubr.bf16.vlgmr.msra.gmra.mxu1 %v3922_v3 }
  0x1a   :  { %613 = vmatpush1.bf16.msra.mxu1 %v4042_v10  ;;  %630 = vmatprep.mubr.bf16.mxu1 %v3922_v3 }
  0x1b   :  { %655 = vmatprep.subr.bf16.mxu1 %v4045_v11 }
  0x1c   :  { %119 = vperm.xlu0 %3647, %v68_v16  }
  0x20   :  { %129 = vperm.xlu0 %3647, %v70_v17  }
  0x24   :  { %139 = vperm.xlu0 %3647, %v72_v18   ;;  %v62_v18 = vld [vmem:[%s5135_s23 + $0x10] sm:$0xff] }
  0x25   :  { %89 = vperm.xlu1 %3648, %v62_v18   ;;  %v73_v18 = vld [vmem:[%s5135_s23 + $0x68] sm:$0xf] }
  0x28   :  { %149 = vperm.xlu0 %3647, %v74_v19  }
  0x29   :  { %94 = vperm.xlu1 %3648, %v63_v25  }
  0x87   :  { %v80_v36 = vpop.permute.xlu0 %79 }
  0x88   :  { %v178_v37 = vmul.f32 %v4094_v28, %v80_v36  ;;  %v179_v38 = vmul.f32 %v4097_v29, %v80_v36  ;;  %v180_v39 = vmul.f32 %v4099_v30, %v80_v36  ;;  %v181_v40 = vmul.f32 %v4101_v31, %v80_v36 }
  0x8a   :  { %v4118_v41 = vadd.f32 %v4104_v32, %v178_v37  ;;  %v4121_v42 = vadd.f32 %v4107_v33, %v179_v38  ;;  %v4124_v43 = vadd.f32 %v4109_v34, %v180_v39  ;;  %v4127_v44 = vadd.f32 %v4111_v35, %v181_v40 }
  0x8b   :  { %v85_v45 = vpop.permute.xlu0 %84 }
  0x8c   :  { %v182_v46 = vmul.f32 %v4094_v28, %v85_v45  ;;  %v183_v47 = vmul.f32 %v4097_v29, %v85_v45  ;;  %v184_v48 = vmul.f32 %v4099_v30, %v85_v45  ;;  %v185_v49 = vmul.f32 %v4101_v31, %v85_v45 }
  0x8e   :  { %v268_v50 = vadd.f32 %v4104_v32, %v182_v46  ;;  %v269_v51 = vadd.f32 %v4107_v33, %v183_v47  ;;  %v270_v52 = vadd.f32 %v4109_v34, %v184_v48  ;;  %v271_v53 = vadd.f32 %v4111_v35, %v185_v49  ;;  %v65_v47 = vld [vmem:[%s5135_s23 + $0x28] sm:$0xf] }
  0x8f   :  { %v100_v54 = vpop.permute.xlu0 %99  ;;  %104 = vperm.xlu1 %3648, %v65_v47  }
  0x90   :  { %332 = vst [vmem:[#allocation2 + $0x50] sm:$0xf] %v268_v50  ;;  %333 = vst [vmem:[#allocation2 + $0x168] sm:$0xf] %v269_v51  ;;  %v194_v55 = vmul.f32 %v4094_v28, %v100_v54  ;;  %v195_v56 = vmul.f32 %v4097_v29, %v100_v54  ;;  %v196_v57 = vmul.f32 %v4099_v30, %v100_v54 }
  0x91   :  { %334 = vst [vmem:[#allocation2 + $0x130] sm:$0xf] %v270_v52  ;;  %335 = vst [vmem:[#allocation2 + $0x48] sm:$0xf] %v271_v53  ;;  %v197_v58 = vmul.f32 %v4101_v31, %v100_v54 }
  0x92   :  { %v4142_v59 = vadd.f32 %v4104_v32, %v194_v55  ;;  %v4145_v60 = vadd.f32 %v4107_v33, %v195_v56  ;;  %v4148_v61 = vadd.f32 %v4109_v34, %v196_v57  ;;  %v67_v57 = vld [vmem:[%s5135_s23 + $0x38] sm:$0xf] }
  0x93   :  { %v4151_v62 = vadd.f32 %v4111_v35, %v197_v58  ;;  %v110_v63 = vpop.permute.xlu0 %109  ;;  %114 = vperm.xlu1 %3648, %v67_v57  }
  0x94   :  { %v202_v0 = vmul.f32 %v4094_v28, %v110_v63  ;;  %v203_v1 = vmul.f32 %v4097_v29, %v110_v63  ;;  %v204_v2 = vmul.f32 %v4099_v30, %v110_v63  ;;  %v205_v4 = vmul.f32 %v4101_v31, %v110_v63 }
  0x96   :  { %v4158_v5 = vadd.f32 %v4104_v32, %v202_v0  ;;  %v4161_v7 = vadd.f32 %v4107_v33, %v203_v1  ;;  %v4164_v8 = vadd.f32 %v4109_v34, %v204_v2  ;;  %v4167_v9 = vadd.f32 %v4111_v35, %v205_v4 }
  0x97   :  { %v120_v12 = vpop.permute.xlu0 %119 }
  0x98   :  { %v210_v14 = vmul.f32 %v4094_v28, %v120_v12  ;;  %v211_v15 = vmul.f32 %v4097_v29, %v120_v12  ;;  %v212_v16 = vmul.f32 %v4099_v30, %v120_v12  ;;  %v213_v17 = vmul.f32 %v4101_v31, %v120_v12 }
  0x9a   :  { %v4177_v19 = vadd.f32 %v4104_v32, %v210_v14  ;;  %v4180_v20 = vadd.f32 %v4107_v33, %v211_v15  ;;  %v4183_v21 = vadd.f32 %v4109_v34, %v212_v16  ;;  %v299_v24 = vadd.f32 %v4111_v35, %v213_v17  ;;  %v69_v16 = vld [vmem:[%s5135_s23 + $0x48] sm:$0xf]  ;;  %v71_v17 = vld [vmem:[%s5135_s23 + $0x58] sm:$0xf] }
  0x9b   :  { %v130_v26 = vpop.permute.xlu0 %129  ;;  %124 = vperm.xlu1 %3648, %v69_v16  }
  0x9c   :  { %363 = vst [vmem:[#allocation2 + $0xc8] sm:$0xff] %v299_v24  ;;  %v218_v27 = vmul.f32 %v4094_v28, %v130_v26  ;;  %v219_v36 = vmul.f32 %v4097_v29, %v130_v26  ;;  %v220_v37 = vmul.f32 %v4099_v30, %v130_v26  ;;  %v221_v38 = vmul.f32 %v4101_v31, %v130_v26  ;;  %v75_v24 = vld [vmem:[%s5135_s23 + $0x78] sm:$0xf] }
  0x9e   :  { %v304_v39 = vadd.f32 %v4104_v32, %v218_v27  ;;  %v305_v40 = vadd.f32 %v4107_v33, %v219_v36  ;;  %v306_v45 = vadd.f32 %v4109_v34, %v220_v37  ;;  %v307_v46 = vadd.f32 %v4111_v35, %v221_v38  ;;  %v400_v38 = vld [vmem:[#allocation2 + $0x50] sm:$0xf] }
  0x9f   :  { %v140_v48 = vpop.permute.xlu0 %139  ;;  %134 = vperm.xlu1 %3648, %v71_v17  }
  0xa0   :  { %368 = vst [vmem:[#allocation2 + $0x1a0] sm:$0xff] %v304_v39  ;;  %369 = vst [vmem:[#allocation2 + $0x1f0] sm:$0xff] %v305_v40  ;;  %v226_v49 = vmul.f32 %v4094_v28, %v140_v48  ;;  %v227_v50 = vmul.f32 %v4097_v29, %v140_v48  ;;  %v228_v51 = vmul.f32 %v4099_v30, %v140_v48 }
  0xa1   :  { %370 = vst [vmem:[#allocation2 + $0xe8] sm:$0xff] %v306_v45  ;;  %371 = vst [vmem:[#allocation2 + $0x78] sm:$0xff] %v307_v46  ;;  %v229_v52 = vmul.f32 %v4101_v31, %v140_v48  ;;  %v401_v46 = vld [vmem:[#allocation2 + $0x168] sm:$0xf] }
  0xa2   :  { %v312_v53 = vadd.f32 %v4104_v32, %v226_v49  ;;  %v313_v54 = vadd.f32 %v4107_v33, %v227_v50  ;;  %v314_v55 = vadd.f32 %v4109_v34, %v228_v51 }
  0xa3   :  { %v315_v56 = vadd.f32 %v4111_v35, %v229_v52  ;;  %v150_v58 = vpop.permute.xlu0 %149  ;;  %144 = vperm.xlu1 %3648, %v73_v18  }
  0xa4   :  { %376 = vst [vmem:[#allocation2 + $0xb8] sm:$0xff] %v312_v53  ;;  %377 = vst [vmem:[#allocation2 + $0x88] sm:$0xff] %v313_v54  ;;  %v234_v63 = vmul.f32 %v4094_v28, %v150_v58  ;;  %v235_v0 = vmul.f32 %v4097_v29, %v150_v58  ;;  %v236_v1 = vmul.f32 %v4099_v30, %v150_v58  ;;  %v402_v54 = vld [vmem:[#allocation2 + $0x130] sm:$0xf] }
  0xa5   :  { %378 = vst [vmem:[#allocation2 + $0xa8] sm:$0xff] %v314_v55  ;;  %379 = vst [vmem:[#allocation2 + $0x1c8] sm:$0xff] %v315_v56  ;;  %v237_v2 = vmul.f32 %v4101_v31, %v150_v58 }
  0xa6   :  { %v320_v4 = vadd.f32 %v4104_v32, %v234_v63  ;;  %v321_v12 = vadd.f32 %v4107_v33, %v235_v0  ;;  %v322_v14 = vadd.f32 %v4109_v34, %v236_v1 }
  0xa7   :  { %v323_v15 = vadd.f32 %v4111_v35, %v237_v2  ;;  %154 = vperm.xlu1 %3648, %v75_v24  }
  0xa8   :  { %384 = vst [vmem:[#allocation2 + $0x198] sm:$0xff] %v320_v4  ;;  %385 = vst [vmem:[#allocation2 + $0x38] sm:$0xff] %v321_v12  ;;  %v403_v4 = vld [vmem:[#allocation2 + $0x48] sm:$0xf] }
  0xa9   :  { %386 = vst [vmem:[#allocation2 + $0xc0] sm:$0xff] %v322_v14  ;;  %387 = vst [vmem:[#allocation2 + $0x1c0] sm:$0xff] %v323_v15 }
  0xd1   :  { %v474_v25 = vpop.f32.mrf.mxu1 }
  0xd2   :  { %v526_v26 = vadd.f32 %v474_v25, %v4118_v41 }
  0xd3   :  { %v476_v27 = vpop.f32.mrf.mxu1 }
  0xd4   :  { %v3321_v36 = vmul.f32 -1.442695, %v526_v26  ;;  %v527_v37 = vadd.f32 %v476_v27, %v4121_v42 }
  0xd5   :  { %v478_v39 = vpop.f32.mrf.mxu1 }
  0xd6   :  { %3655 = vpow2.f32 %v3321_v36  ;;  %v3322_v40 = vmul.f32 -1.442695, %v527_v37  ;;  %v530_v45 = vadd.f32 %v478_v39, %v400_v38 }
  0xd7   :  { %v480_v47 = vpop.f32.mrf.mxu1 }
  0xd8   :  { %3657 = vpow2.f32 %v3322_v40  ;;  %v3324_v48 = vmul.f32 -1.442695, %v530_v45  ;;  %v531_v49 = vadd.f32 %v480_v47, %v401_v46 }
  0xd9   :  { %v517_v50 = vpop.f32.mrf.mxu1 }
  0xda   :  { %3659 = vpow2.f32 %v3324_v48  ;;  %v3325_v51 = vmul.f32 -1.442695, %v531_v49  ;;  %v528_v41 = vadd.f32 %v517_v50, %v4124_v43 }
  0xdb   :  { %v519_v52 = vpop.f32.mrf.mxu1 }
  0xdc   :  { %3661 = vpow2.f32 %v3325_v51  ;;  %v3323_v42 = vmul.f32 -1.442695, %v528_v41  ;;  %v529_v57 = vadd.f32 %v519_v52, %v4127_v44 }
  0xdd   :  { %v521_v53 = vpop.f32.mrf.mxu1 }
  0xde   :  { %v532_v55 = vadd.f32 %v521_v53, %v402_v54  ;;  %3663 = vpow2.f32 %v3323_v42  ;;  %v90_v42 = vpop.permute.xlu1 %89 }
  0xdf   :  { %v523_v63 = vpop.f32.mrf.mxu1 }
  0xe0   :  { %v3326_v1 = vmul.f32 -1.442695, %v532_v55  ;;  %v533_v14 = vadd.f32 %v523_v63, %v403_v4  ;;  %v186_v55 = vmul.f32 %v4094_v28, %v90_v42 }
  0xe2   :  { %v4252_v63 = vadd.f32 %v4104_v32, %v186_v55  ;;  %v95_v4 = vpop.permute.xlu1 %94 }
  0xe3   :  { %v3656_v56 = vpop.eup %3655 }
  0xe4   :  { %v552_v58 = vadd.f32 1.0, %v3656_v56  ;;  %v187_v56 = vmul.f32 %v4097_v29, %v90_v42 }
  0xe5   :  { %v3658_v0 = vpop.eup %3657 }
  0xe6   :  { %3665 = vrcp.f32 %v552_v58  ;;  %v553_v2 = vadd.f32 1.0, %v3658_v0  ;;  %v189_v58 = vmul.f32 %v4101_v31, %v90_v42  ;;  %v4255_v0 = vadd.f32 %v4107_v33, %v187_v56 }
  0xe7   :  { %v3660_v12 = vpop.eup %3659  ;;  %3667 = vtanh.f32 %v529_v57  ;;  %v188_v57 = vmul.f32 %v4099_v30, %v90_v42 }
  0xe8   :  { %3669 = vrcp.f32 %v553_v2  ;;  %v555_v43 = vadd.f32 1.0, %v3660_v12  ;;  %v4261_v2 = vadd.f32 %v4111_v35, %v189_v58  ;;  %v190_v12 = vmul.f32 %v4094_v28, %v95_v4 }
  0xe9   :  { %v3662_v15 = vpop.eup %3661  ;;  %3671 = vpow2.f32 %v3326_v1  ;;  %v4258_v1 = vadd.f32 %v4109_v34, %v188_v57 }
  0xea   :  { %3673 = vrcp.f32 %v555_v43  ;;  %v556_v16 = vadd.f32 1.0, %v3662_v15  ;;  %v192_v43 = vmul.f32 %v4099_v30, %v95_v4  ;;  %v193_v15 = vmul.f32 %v4101_v31, %v95_v4 }
  0xeb   :  { %3675 = vtanh.f32 %v533_v14  ;;  %v3664_v44 = vpop.eup %3663  ;;  %v191_v14 = vmul.f32 %v4097_v29, %v95_v4 }
  0xec   :  { %3677 = vrcp.f32 %v556_v16  ;;  %v554_v25 = vadd.f32 1.0, %v3664_v44  ;;  %v276_v16 = vadd.f32 %v4104_v32, %v190_v12 }
  0xed   :  { %v277_v44 = vadd.f32 %v4107_v33, %v191_v14 }
  0xee   :  { %3679 = vrcp.f32 %v554_v25  ;;  %340 = vst [vmem:[#allocation2 + $0x120] sm:$0xf] %v276_v16 }
  0xef   :  { %341 = vst [vmem:[#allocation2 + $0x150] sm:$0xf] %v277_v44 }
  0xf3   :  { %v3666_v17 = vpop.eup %3665 }
  0xf4   :  { %v3668_v18 = vpop.eup %3667 }
  0xf5   :  { %v3670_v24 = vpop.eup %3669  ;;  %v574_v36 = vmul.f32 %v3668_v18, %v3666_v17  ;;  %v278_v17 = vadd.f32 %v4109_v34, %v192_v43  ;;  %v279_v18 = vadd.f32 %v4111_v35, %v193_v15 }
  0xf6   :  { %v3672_v26 = vpop.eup %3671  ;;  %v572_v27 = vmul.f32 0.0, %v3670_v24 }
  0xf7   :  { %v3674_v37 = vpop.eup %3673  ;;  %v557_v45 = vadd.f32 1.0, %v3672_v26  ;;  %342 = vst [vmem:[#allocation2 + $0x108] sm:$0xf] %v278_v17  ;;  %343 = vst [vmem:[#allocation2 + $0x60] sm:$0xf] %v279_v18 }
  0xf8   :  { %v3676_v38 = vpop.eup %3675  ;;  %v4235_v39 = vadd.f32 %v574_v36, %v572_v27 }
  0xf9   :  { %v3678_v40 = vpop.eup %3677  ;;  %v575_v47 = vmul.f32 %v3676_v38, %v3674_v37 }
  0xfa   :  { %v573_v46 = vmul.f32 0.0, %v3678_v40  ;;  %3681 = vtanh.f32 %v4235_v39 }
  0xfb   :  { %3683 = vrcp.f32 %v557_v45  ;;  %v3680_v49 = vpop.eup %3679 }
  0xfc   :  { %v4238_v48 = vadd.f32 %v575_v47, %v573_v46 }
  0xfe   :  { %3685 = vtanh.f32 %v4238_v48 }
 0x107   :  { %v3682_v50 = vpop.eup %3681 }
 0x108   :  { %v580_v51 = vmul.f32 %v3682_v50, %v3680_v49  ;;  %v3684_v52 = vpop.eup %3683 }
 0x10a   :  { %582 = vst.msk [vmem:[#allocation3] sm:$0xff] %vm420_vm2, %v580_v51  ;;  %v105_v24 = vpop.permute.xlu1 %104 }
 0x10b   :  { %v3686_v41 = vpop.eup %3685  ;;  %v198_v25 = vmul.f32 %v4094_v28, %v105_v24  ;;  %v199_v26 = vmul.f32 %v4097_v29, %v105_v24  ;;  %v200_v27 = vmul.f32 %v4099_v30, %v105_v24  ;;  %v201_v36 = vmul.f32 %v4101_v31, %v105_v24 }
 0x10c   :  { %v581_v53 = vmul.f32 %v3686_v41, %v3684_v52 }
 0x10d   :  { %v284_v37 = vadd.f32 %v4104_v32, %v198_v25  ;;  %v285_v38 = vadd.f32 %v4107_v33, %v199_v26  ;;  %v286_v40 = vadd.f32 %v4109_v34, %v200_v27  ;;  %v287_v45 = vadd.f32 %v4111_v35, %v201_v36 }
 0x10e   :  { %584 = vst.msk [vmem:[#allocation3 + $0x8] sm:$0xf] %vm583_vm3, %v581_v53  ;;  %v594_v54 = vpack.c.bf16 %v581_v53, %v580_v51  ;;  %v115_v46 = vpop.permute.xlu1 %114 }
 0x10f   :  { %348 = vst [vmem:[#allocation2 + $0x80] sm:$0xf] %v284_v37  ;;  %349 = vst [vmem:[#allocation2 + $0x1a8] sm:$0xf] %v285_v38  ;;  %v206_v47 = vmul.f32 %v4094_v28, %v115_v46  ;;  %v207_v49 = vmul.f32 %v4097_v29, %v115_v46  ;;  %v208_v50 = vmul.f32 %v4099_v30, %v115_v46 }
 0x110   :  { %3327 = vmatmul.mubr.msk.bf16.vlgmr.msra.gmra.mxu1 %vm420_vm2, %v594_v54  ;;  %350 = vst [vmem:[#allocation2 + $0x1b8] sm:$0xf] %v286_v40  ;;  %351 = vst [vmem:[#allocation2 + $0x28] sm:$0xf] %v287_v45  ;;  %v209_v51 = vmul.f32 %v4101_v31, %v115_v46 }
 0x111   :  { %656 = vmatpush1.bf16.msra.mxu1 %v4052_v13  ;;  %673 = vmatprep.mubr.bf16.mxu1 %v3922_v3  ;;  %v292_v52 = vadd.f32 %v4104_v32, %v206_v47  ;;  %v293_v41 = vadd.f32 %v4107_v33, %v207_v49  ;;  %v294_v53 = vadd.f32 %v4109_v34, %v208_v50 }
 0x112   :  { %813 = vmatprep.subr.bf16.mxu1 %v4045_v11 }
 0x113   :  { %356 = vst [vmem:[#allocation2 + $0x1e0] sm:$0xf] %v292_v52  ;;  %357 = vst [vmem:[#allocation2] sm:$0xf] %v293_v41 }
 0x114   :  { %358 = vst [vmem:[#allocation2 + $0xf0] sm:$0xf] %v294_v53 }
 0x116   :  { %v125_v42 = vpop.permute.xlu1 %124 }
 0x117   :  { %v214_v55 = vmul.f32 %v4094_v28, %v125_v42  ;;  %v215_v56 = vmul.f32 %v4097_v29, %v125_v42  ;;  %v216_v57 = vmul.f32 %v4099_v30, %v125_v42  ;;  %v217_v58 = vmul.f32 %v4101_v31, %v125_v42 }
 0x118   :  { %3328 = vmatmul.mubr.msk.bf16.vlgmr.msra.gmra.mxu1 %vm420_vm2, %v594_v54  ;;  %v295_v54 = vadd.f32 %v4111_v35, %v209_v51 }
 0x119   :  { %814 = vmatpush1.bf16.msra.mxu1 %v4052_v13  ;;  %831 = vmatprep.mubr.bf16.mxu1 %v3922_v3  ;;  %v300_v4 = vadd.f32 %v4104_v32, %v214_v55  ;;  %v301_v12 = vadd.f32 %v4107_v33, %v215_v56  ;;  %v302_v14 = vadd.f32 %v4109_v34, %v216_v57 }
 0x11a   :  { %971 = vmatprep.subr.bf16.mxu1 %v4045_v11  ;;  %359 = vst [vmem:[#allocation2 + $0x8] sm:$0xf] %v295_v54  ;;  %v303_v43 = vadd.f32 %v4111_v35, %v217_v58  ;;  %v135_v15 = vpop.permute.xlu1 %134 }
 0x11b   :  { %364 = vst [vmem:[#allocation2 + $0x40] sm:$0xf] %v300_v4  ;;  %365 = vst [vmem:[#allocation2 + $0x1f8] sm:$0xf] %v301_v12  ;;  %v222_v16 = vmul.f32 %v4094_v28, %v135_v15  ;;  %v223_v44 = vmul.f32 %v4097_v29, %v135_v15  ;;  %v224_v17 = vmul.f32 %v4099_v30, %v135_v15 }
 0x11c   :  { %366 = vst [vmem:[#allocation2 + $0x20] sm:$0xf] %v302_v14  ;;  %367 = vst [vmem:[#allocation2 + $0x128] sm:$0xf] %v303_v43  ;;  %v225_v18 = vmul.f32 %v4101_v31, %v135_v15  ;;  %v591_v14 = vld [vmem:[#allocation2 + $0x150] sm:$0xf] }
 0x11d   :  { %v308_v24 = vadd.f32 %v4104_v32, %v222_v16  ;;  %v309_v25 = vadd.f32 %v4107_v33, %v223_v44  ;;  %v310_v26 = vadd.f32 %v4109_v34, %v224_v17 }
 0x11e   :  { %v311_v27 = vadd.f32 %v4111_v35, %v225_v18  ;;  %v145_v36 = vpop.permute.xlu1 %144  ;;  %v592_v18 = vld [vmem:[#allocation2 + $0x108] sm:$0xf] }
 0x11f   :  { %372 = vst [vmem:[#allocation2 + $0x70] sm:$0xf] %v308_v24  ;;  %373 = vst [vmem:[#allocation2 + $0x90] sm:$0xf] %v309_v25  ;;  %v230_v37 = vmul.f32 %v4094_v28, %v145_v36  ;;  %v231_v38 = vmul.f32 %v4097_v29, %v145_v36  ;;  %v232_v40 = vmul.f32 %v4099_v30, %v145_v36 }
 0x120   :  { %374 = vst [vmem:[#allocation2 + $0x1d8] sm:$0xf] %v310_v26  ;;  %375 = vst [vmem:[#allocation2 + $0xd0] sm:$0xf] %v311_v27  ;;  %v233_v45 = vmul.f32 %v4101_v31, %v145_v36 }
 0x121   :  { %v316_v46 = vadd.f32 %v4104_v32, %v230_v37  ;;  %v317_v47 = vadd.f32 %v4107_v33, %v231_v38  ;;  %v318_v49 = vadd.f32 %v4109_v34, %v232_v40 }
 0x122   :  { %v319_v50 = vadd.f32 %v4111_v35, %v233_v45  ;;  %v155_v51 = vpop.permute.xlu1 %154  ;;  %v593_v45 = vld [vmem:[#allocation2 + $0x60] sm:$0xf] }
 0x123   :  { %380 = vst [vmem:[#allocation2 + $0x170] sm:$0xf] %v316_v46  ;;  %381 = vst [vmem:[#allocation2 + $0x178] sm:$0xf] %v317_v47  ;;  %v238_v52 = vmul.f32 %v4094_v28, %v155_v51  ;;  %v239_v41 = vmul.f32 %v4097_v29, %v155_v51  ;;  %v240_v53 = vmul.f32 %v4099_v30, %v155_v51 }
 0x124   :  { %382 = vst [vmem:[#allocation2 + $0x68] sm:$0xf] %v318_v49  ;;  %383 = vst [vmem:[#allocation2 + $0x190] sm:$0xf] %v319_v50  ;;  %v241_v54 = vmul.f32 %v4101_v31, %v155_v51  ;;  %v590_v31 = vld [vmem:[#allocation2 + $0x120] sm:$0xf] }
 0x125   :  { %v324_v42 = vadd.f32 %v4104_v32, %v238_v52  ;;  %v325_v55 = vadd.f32 %v4107_v33, %v239_v41  ;;  %v326_v56 = vadd.f32 %v4109_v34, %v240_v53 }
 0x126   :  { %v327_v57 = vadd.f32 %v4111_v35, %v241_v54 }
 0x127   :  { %388 = vst [vmem:[#allocation2 + $0x158] sm:$0xf] %v324_v42  ;;  %389 = vst [vmem:[#allocation2 + $0x10] sm:$0xf] %v325_v55 }
 0x128   :  { %390 = vst [vmem:[#allocation2 + $0x58] sm:$0xf] %v326_v56  ;;  %391 = vst [vmem:[#allocation2 + $0xa0] sm:$0xf] %v327_v57 }
 0x1d0   :  { %v632_v58 = vpop.f32.mrf.mxu1 }
 0x1d1   :  { %v684_v28 = vadd.f32 %v632_v58, %v4252_v63 }
 0x1d2   :  { %v634_v29 = vpop.f32.mrf.mxu1 }
 0x1d3   :  { %v3329_v4 = vmul.f32 -1.442695, %v684_v28  ;;  %v685_v30 = vadd.f32 %v634_v29, %v4255_v0 }
 0x1d4   :  { %v636_v12 = vpop.f32.mrf.mxu1 }
 0x1d5   :  { %3687 = vpow2.f32 %v3329_v4  ;;  %v3330_v32 = vmul.f32 -1.442695, %v685_v30  ;;  %v688_v33 = vadd.f32 %v636_v12, %v590_v31 }
 0x1d6   :  { %v638_v34 = vpop.f32.mrf.mxu1 }
 0x1d7   :  { %3689 = vpow2.f32 %v3330_v32  ;;  %v3332_v35 = vmul.f32 -1.442695, %v688_v33  ;;  %v689_v43 = vadd.f32 %v638_v34, %v591_v14 }
 0x1d8   :  { %v675_v15 = vpop.f32.mrf.mxu1 }
 0x1d9   :  { %3691 = vpow2.f32 %v3332_v35  ;;  %v3333_v16 = vmul.f32 -1.442695, %v689_v43  ;;  %v686_v63 = vadd.f32 %v675_v15, %v4258_v1 }
 0x1da   :  { %v677_v44 = vpop.f32.mrf.mxu1 }
 0x1db   :  { %3693 = vpow2.f32 %v3333_v16  ;;  %v3331_v0 = vmul.f32 -1.442695, %v686_v63  ;;  %v687_v26 = vadd.f32 %v677_v44, %v4261_v2  ;;  %v748_v63 = vld [vmem:[#allocation2 + $0x80] sm:$0xf] }
 0x1dc   :  { %v679_v17 = vpop.f32.mrf.mxu1 }
 0x1dd   :  { %v690_v24 = vadd.f32 %v679_v17, %v592_v18  ;;  %3695 = vpow2.f32 %v3331_v0 }
 0x1de   :  { %v681_v36 = vpop.f32.mrf.mxu1 }
 0x1df   :  { %v3334_v38 = vmul.f32 -1.442695, %v690_v24  ;;  %v691_v47 = vadd.f32 %v681_v36, %v593_v45  ;;  %v750_v45 = vld [vmem:[#allocation2 + $0x1b8] sm:$0xf] }
 0x1e2   :  { %v3688_v25 = vpop.eup %3687 }
 0x1e3   :  { %v710_v27 = vadd.f32 1.0, %v3688_v25  ;;  %v749_v25 = vld [vmem:[#allocation2 + $0x1a8] sm:$0xf] }
 0x1e4   :  { %v3690_v37 = vpop.eup %3689 }
 0x1e5   :  { %3697 = vrcp.f32 %v710_v27  ;;  %v711_v40 = vadd.f32 1.0, %v3690_v37 }
 0x1e6   :  { %v3692_v46 = vpop.eup %3691  ;;  %3699 = vtanh.f32 %v687_v26 }
 0x1e7   :  { %3701 = vrcp.f32 %v711_v40  ;;  %v713_v1 = vadd.f32 1.0, %v3692_v46 }
 0x1e8   :  { %v3694_v49 = vpop.eup %3693  ;;  %3703 = vpow2.f32 %v3334_v38 }
 0x1e9   :  { %3705 = vrcp.f32 %v713_v1  ;;  %v714_v50 = vadd.f32 1.0, %v3694_v49 }
 0x1ea   :  { %3707 = vtanh.f32 %v691_v47  ;;  %v3696_v2 = vpop.eup %3695 }
 0x1eb   :  { %3709 = vrcp.f32 %v714_v50  ;;  %v712_v53 = vadd.f32 1.0, %v3696_v2 }
 0x1ed   :  { %3711 = vrcp.f32 %v712_v53 }
 0x1f2   :  { %v3698_v51 = vpop.eup %3697 }
 0x1f3   :  { %v3700_v52 = vpop.eup %3699 }
 0x1f4   :  { %v3702_v41 = vpop.eup %3701  ;;  %v732_v55 = vmul.f32 %v3700_v52, %v3698_v51 }
 0x1f5   :  { %v3704_v54 = vpop.eup %3703  ;;  %v730_v42 = vmul.f32 %v3702_v41, %v4235_v39  ;;  %v751_v41 = vld [vmem:[#allocation2 + $0x28] sm:$0xf] }
 0x1f6   :  { %v3706_v56 = vpop.eup %3705  ;;  %v715_v29 = vadd.f32 1.0, %v3704_v54 }
 0x1f7   :  { %v3708_v57 = vpop.eup %3707  ;;  %v4328_v58 = vadd.f32 %v732_v55, %v730_v42 }
 0x1f8   :  { %v3710_v28 = vpop.eup %3709  ;;  %v733_v30 = vmul.f32 %v3708_v57, %v3706_v56 }
 0x1f9   :  { %3713 = vtanh.f32 %v4328_v58  ;;  %v731_v4 = vmul.f32 %v3710_v28, %v4238_v48 }
 0x1fa   :  { %3715 = vrcp.f32 %v715_v29  ;;  %v3712_v12 = vpop.eup %3711 }
 0x1fb   :  { %v4332_v31 = vadd.f32 %v733_v30, %v731_v4 }
 0x1fd   :  { %3717 = vtanh.f32 %v4332_v31 }
 0x206   :  { %v3714_v39 = vpop.eup %3713 }
 0x207   :  { %v738_v32 = vmul.f32 %v3714_v39, %v3712_v12  ;;  %v3716_v33 = vpop.eup %3715 }
 0x209   :  { %741 = vst.msk [vmem:[#allocation3 + $0x10] sm:$0xff] %vm420_vm2, %v738_v32 }
 0x20a   :  { %v3718_v14 = vpop.eup %3717 }
 0x20b   :  { %v739_v34 = vmul.f32 %v3718_v14, %v3716_v33 }
 0x20d   :  { %742 = vst.msk [vmem:[#allocation3 + $0x18] sm:$0xf] %vm583_vm3, %v739_v34  ;;  %v752_v35 = vpack.c.bf16 %v739_v34, %v738_v32 }
 0x20f   :  { %3335 = vmatmul.mubr.msk.bf16.vlgmr.msra.gmra.mxu0 %vm420_vm2, %v752_v35  ;;  %3336 = vmatmul.mubr.msk.bf16.vlgmr.msra.gmra.mxu1 %vm420_vm2, %v752_v35 }
 0x210   :  { %929 = vmatpush1.bf16.msra.mxu0 %v4042_v10  ;;  %972 = vmatpush1.bf16.msra.mxu1 %v4052_v13 }
 0x211   :  { %946 = vmatprep.mubr.bf16.mxu0 %v3922_v3  ;;  %989 = vmatprep.mubr.bf16.mxu1 %v3922_v3 }
 0x212   :  { %1086 = vmatprep.subr.bf16.mxu0 %v4031_v6  ;;  %1129 = vmatprep.subr.bf16.mxu1 %v4045_v11 }
 0x2cf   :  { %v790_v48 = vpop.f32.mrf.mxu0  ;;  %v833_v18 = vpop.f32.mrf.mxu1 }
 0x2d0   :  { %v842_v43 = vadd.f32 %v790_v48, %v4142_v59  ;;  %v844_v59 = vadd.f32 %v833_v18, %v4148_v61 }
 0x2d1   :  { %v792_v15 = vpop.f32.mrf.mxu0  ;;  %v835_v37 = vpop.f32.mrf.mxu1 }
 0x2d2   :  { %v3337_v16 = vmul.f32 -1.442695, %v842_v43  ;;  %v843_v44 = vadd.f32 %v792_v15, %v4145_v60  ;;  %v3339_v60 = vmul.f32 -1.442695, %v844_v59  ;;  %v845_v1 = vadd.f32 %v835_v37, %v4151_v62 }
 0x2d3   :  { %v794_v17 = vpop.f32.mrf.mxu0  ;;  %v837_v40 = vpop.f32.mrf.mxu1 }
 0x2d4   :  { %3719 = vpow2.f32 %v3337_v16  ;;  %v3338_v0 = vmul.f32 -1.442695, %v843_v44  ;;  %v846_v24 = vadd.f32 %v794_v17, %v748_v63  ;;  %v848_v46 = vadd.f32 %v837_v40, %v750_v45  ;;  %v907_v40 = vld [vmem:[#allocation2] sm:$0xf] }
 0x2d5   :  { %v796_v26 = vpop.f32.mrf.mxu0  ;;  %v839_v50 = vpop.f32.mrf.mxu1 }
 0x2d6   :  { %3721 = vpow2.f32 %v3338_v0  ;;  %v3340_v27 = vmul.f32 -1.442695, %v846_v24  ;;  %v847_v36 = vadd.f32 %v796_v26, %v749_v25  ;;  %v3342_v51 = vmul.f32 -1.442695, %v848_v46 }
 0x2d7   :  { %v849_v54 = vadd.f32 %v839_v50, %v751_v41  ;;  %v908_v50 = vld [vmem:[#allocation2 + $0xf0] sm:$0xf] }
 0x2d8   :  { %3723 = vpow2.f32 %v3340_v27  ;;  %v3341_v38 = vmul.f32 -1.442695, %v847_v36  ;;  %v906_v27 = vld [vmem:[#allocation2 + $0x1e0] sm:$0xf] }
 0x2da   :  { %3725 = vpow2.f32 %v3341_v38 }
 0x2db   :  { %3727 = vpow2.f32 %v3339_v60 }
 0x2e1   :  { %v3720_v47 = vpop.eup %3719 }
 0x2e2   :  { %v868_v49 = vadd.f32 1.0, %v3720_v47 }
 0x2e3   :  { %v3722_v2 = vpop.eup %3721 }
 0x2e4   :  { %3729 = vrcp.f32 %v868_v49  ;;  %v869_v52 = vadd.f32 1.0, %v3722_v2 }
 0x2e5   :  { %v3724_v53 = vpop.eup %3723  ;;  %3731 = vtanh.f32 %v845_v1 }
 0x2e6   :  { %3733 = vrcp.f32 %v869_v52  ;;  %v871_v61 = vadd.f32 1.0, %v3724_v53 }
 0x2e7   :  { %v3726_v42 = vpop.eup %3725  ;;  %3735 = vpow2.f32 %v3342_v51 }
 0x2e8   :  { %3737 = vrcp.f32 %v871_v61  ;;  %v872_v55 = vadd.f32 1.0, %v3726_v42  ;;  %v3728_v62 = vpop.eup %3727 }
 0x2e9   :  { %3739 = vtanh.f32 %v849_v54  ;;  %v870_v29 = vadd.f32 1.0, %v3728_v62 }
 0x2ea   :  { %3741 = vrcp.f32 %v872_v55  ;;  %v909_v55 = vld [vmem:[#allocation2 + $0x8] sm:$0xf] }
 0x2eb   :  { %3743 = vrcp.f32 %v870_v29 }
 0x2f1   :  { %v3730_v56 = vpop.eup %3729 }
 0x2f2   :  { %v3732_v57 = vpop.eup %3731 }
 0x2f3   :  { %v3734_v28 = vpop.eup %3733  ;;  %v890_v12 = vmul.f32 %v3732_v57, %v3730_v56 }
 0x2f4   :  { %v3736_v4 = vpop.eup %3735  ;;  %v888_v30 = vmul.f32 %v3734_v28, %v4328_v58 }
 0x2f5   :  { %v3738_v39 = vpop.eup %3737  ;;  %v873_v34 = vadd.f32 1.0, %v3736_v4 }
 0x2f6   :  { %v3740_v32 = vpop.eup %3739  ;;  %v4350_v33 = vadd.f32 %v890_v12, %v888_v30 }
 0x2f7   :  { %v3742_v14 = vpop.eup %3741  ;;  %v891_v48 = vmul.f32 %v3740_v32, %v3738_v39 }
 0x2f8   :  { %3745 = vtanh.f32 %v4350_v33  ;;  %v889_v35 = vmul.f32 %v3742_v14, %v4332_v31  ;;  %v3744_v15 = vpop.eup %3743 }
 0x2f9   :  { %3747 = vrcp.f32 %v873_v34 }
 0x2fa   :  { %v4354_v43 = vadd.f32 %v891_v48, %v889_v35 }
 0x2fc   :  { %3749 = vtanh.f32 %v4354_v43 }
 0x305   :  { %v3746_v58 = vpop.eup %3745 }
 0x306   :  { %v896_v16 = vmul.f32 %v3746_v58, %v3744_v15  ;;  %v3748_v44 = vpop.eup %3747 }
 0x308   :  { %899 = vst.msk [vmem:[#allocation3 + $0x20] sm:$0xff] %vm420_vm2, %v896_v16 }
 0x309   :  { %v3750_v63 = vpop.eup %3749 }
 0x30a   :  { %v897_v17 = vmul.f32 %v3750_v63, %v3748_v44 }
 0x30c   :  { %900 = vst.msk [vmem:[#allocation3 + $0x28] sm:$0xf] %vm583_vm3, %v897_v17  ;;  %v910_v18 = vpack.c.bf16 %v897_v17, %v896_v16 }
 0x30e   :  { %3343 = vmatmul.mubr.msk.bf16.vlgmr.msra.gmra.mxu0 %vm420_vm2, %v910_v18  ;;  %3344 = vmatmul.mubr.msk.bf16.vlgmr.msra.gmra.mxu1 %vm420_vm2, %v910_v18 }
 0x30f   :  { %1087 = vmatpush1.bf16.msra.mxu0 %v4042_v10  ;;  %1130 = vmatpush1.bf16.msra.mxu1 %v4052_v13 }
 0x310   :  { %1104 = vmatprep.mubr.bf16.mxu0 %v3922_v3  ;;  %1147 = vmatprep.mubr.bf16.mxu1 %v3922_v3 }
 0x311   :  { %1244 = vmatprep.subr.bf16.mxu0 %v4031_v6  ;;  %1287 = vmatprep.subr.bf16.mxu1 %v4045_v11 }
 0x3ce   :  { %v948_v31 = vpop.f32.mrf.mxu0  ;;  %v991_v37 = vpop.f32.mrf.mxu1 }
 0x3cf   :  { %v1000_v0 = vadd.f32 %v948_v31, %v4158_v5  ;;  %v1002_v5 = vadd.f32 %v991_v37, %v4164_v8 }
 0x3d0   :  { %v950_v24 = vpop.f32.mrf.mxu0  ;;  %v993_v47 = vpop.f32.mrf.mxu1 }
 0x3d1   :  { %v3345_v25 = vmul.f32 -1.442695, %v1000_v0  ;;  %v1001_v26 = vadd.f32 %v950_v24, %v4161_v7  ;;  %v3347_v7 = vmul.f32 -1.442695, %v1002_v5  ;;  %v1003_v52 = vadd.f32 %v993_v47, %v4167_v9 }
 0x3d2   :  { %v952_v36 = vpop.f32.mrf.mxu0  ;;  %v995_v49 = vpop.f32.mrf.mxu1 }
 0x3d3   :  { %3751 = vpow2.f32 %v3345_v25  ;;  %v3346_v38 = vmul.f32 -1.442695, %v1001_v26  ;;  %v1004_v59 = vadd.f32 %v952_v36, %v906_v27  ;;  %v1006_v2 = vadd.f32 %v995_v49, %v908_v50 }
 0x3d4   :  { %v954_v45 = vpop.f32.mrf.mxu0  ;;  %v997_v53 = vpop.f32.mrf.mxu1 }
 0x3d5   :  { %3753 = vpow2.f32 %v3346_v38  ;;  %v3348_v60 = vmul.f32 -1.442695, %v1004_v59  ;;  %v1005_v46 = vadd.f32 %v954_v45, %v907_v40  ;;  %v3350_v61 = vmul.f32 -1.442695, %v1006_v2  ;;  %v1064_v38 = vld [vmem:[#allocation2 + $0x40] sm:$0xf] }
 0x3d6   :  { %v1007_v56 = vadd.f32 %v997_v53, %v909_v55  ;;  %v1066_v2 = vld [vmem:[#allocation2 + $0x20] sm:$0xf] }
 0x3d7   :  { %3755 = vpow2.f32 %v3348_v60  ;;  %v3349_v1 = vmul.f32 -1.442695, %v1005_v46  ;;  %v1065_v46 = vld [vmem:[#allocation2 + $0x1f8] sm:$0xf] }
 0x3d9   :  { %3757 = vpow2.f32 %v3349_v1 }
 0x3da   :  { %3759 = vpow2.f32 %v3347_v7 }
 0x3e0   :  { %v3752_v51 = vpop.eup %3751 }
 0x3e1   :  { %v1026_v41 = vadd.f32 1.0, %v3752_v51 }
 0x3e2   :  { %v3754_v54 = vpop.eup %3753 }
 0x3e3   :  { %3761 = vrcp.f32 %v1026_v41  ;;  %v1027_v42 = vadd.f32 1.0, %v3754_v54  ;;  %v3919_v41 = vld [vmem:[#allocation2 + $0xc8] sm:$0xff] }
 0x3e4   :  { %v3756_v62 = vpop.eup %3755  ;;  %3763 = vtanh.f32 %v1003_v52 }
 0x3e5   :  { %3765 = vrcp.f32 %v1027_v42  ;;  %v1029_v8 = vadd.f32 1.0, %v3756_v62 }
 0x3e6   :  { %v3758_v57 = vpop.eup %3757  ;;  %3767 = vpow2.f32 %v3350_v61 }
 0x3e7   :  { %3769 = vrcp.f32 %v1029_v8  ;;  %v1030_v28 = vadd.f32 1.0, %v3758_v57  ;;  %v3760_v9 = vpop.eup %3759 }
 0x3e8   :  { %3771 = vtanh.f32 %v1007_v56  ;;  %v1028_v12 = vadd.f32 1.0, %v3760_v9  ;;  %v1067_v56 = vld [vmem:[#allocation2 + $0x128] sm:$0xf] }
 0x3e9   :  { %3773 = vrcp.f32 %v1030_v28 }
 0x3ea   :  { %3775 = vrcp.f32 %v1028_v12 }
 0x3f0   :  { %v3762_v29 = vpop.eup %3761 }
 0x3f1   :  { %v3764_v4 = vpop.eup %3763 }
 0x3f2   :  { %v3766_v30 = vpop.eup %3765  ;;  %v1048_v14 = vmul.f32 %v3764_v4, %v3762_v29 }
 0x3f3   :  { %v3768_v39 = vpop.eup %3767  ;;  %v1046_v32 = vmul.f32 %v3766_v30, %v4350_v33 }
 0x3f4   :  { %v3770_v34 = vpop.eup %3769  ;;  %v1031_v58 = vadd.f32 1.0, %v3768_v39 }
 0x3f5   :  { %v3772_v35 = vpop.eup %3771  ;;  %v4372_v48 = vadd.f32 %v1048_v14, %v1046_v32 }
 0x3f6   :  { %v3774_v15 = vpop.eup %3773  ;;  %v1049_v44 = vmul.f32 %v3772_v35, %v3770_v34 }
 0x3f7   :  { %3777 = vtanh.f32 %v4372_v48  ;;  %v1047_v16 = vmul.f32 %v3774_v15, %v4354_v43  ;;  %v3776_v17 = vpop.eup %3775 }
 0x3f8   :  { %3779 = vrcp.f32 %v1031_v58 }
 0x3f9   :  { %v4376_v63 = vadd.f32 %v1049_v44, %v1047_v16 }
 0x3fb   :  { %3781 = vtanh.f32 %v4376_v63 }
 0x404   :  { %v3778_v33 = vpop.eup %3777 }
 0x405   :  { %v1054_v18 = vmul.f32 %v3778_v33, %v3776_v17  ;;  %v3780_v31 = vpop.eup %3779 }
 0x407   :  { %1057 = vst.msk [vmem:[#allocation3 + $0x30] sm:$0xff] %vm420_vm2, %v1054_v18 }
 0x408   :  { %v3782_v0 = vpop.eup %3781 }
 0x409   :  { %v1055_v24 = vmul.f32 %v3782_v0, %v3780_v31 }
 0x40b   :  { %1058 = vst.msk [vmem:[#allocation3 + $0x38] sm:$0xf] %vm583_vm3, %v1055_v24  ;;  %v1068_v25 = vpack.c.bf16 %v1055_v24, %v1054_v18 }
 0x40d   :  { %3351 = vmatmul.mubr.msk.bf16.vlgmr.msra.gmra.mxu0 %vm420_vm2, %v1068_v25  ;;  %3352 = vmatmul.mubr.msk.bf16.vlgmr.msra.gmra.mxu1 %vm420_vm2, %v1068_v25 }
 0x40e   :  { %1245 = vmatpush1.bf16.msra.mxu0 %v4042_v10  ;;  %1288 = vmatpush1.bf16.msra.mxu1 %v4052_v13 }
 0x40f   :  { %1262 = vmatprep.mubr.bf16.mxu0 %v3922_v3  ;;  %1305 = vmatprep.mubr.bf16.mxu1 %v3922_v3 }
 0x410   :  { %1402 = vmatprep.subr.bf16.mxu0 %v4031_v6  ;;  %1445 = vmatprep.subr.bf16.mxu1 %v4045_v11 }
 0x4cd   :  { %v1106_v43 = vpop.f32.mrf.mxu0  ;;  %v1149_v40 = vpop.f32.mrf.mxu1 }
 0x4ce   :  { %v1158_v26 = vadd.f32 %v1106_v43, %v4177_v19  ;;  %v1160_v19 = vadd.f32 %v1149_v40, %v4183_v21 }
 0x4cf   :  { %v1108_v27 = vpop.f32.mrf.mxu0  ;;  %v1151_v49 = vpop.f32.mrf.mxu1 }
 0x4d0   :  { %v3353_v36 = vmul.f32 -1.442695, %v1158_v26  ;;  %v1159_v37 = vadd.f32 %v1108_v27, %v4180_v20  ;;  %v3355_v20 = vmul.f32 -1.442695, %v1160_v19  ;;  %v1161_v53 = vadd.f32 %v3919_v41, %v1151_v49  ;;  %v3920_v27 = vld [vmem:[#allocation2 + $0x1a0] sm:$0xff] }
 0x4d1   :  { %v1110_v59 = vpop.f32.mrf.mxu0  ;;  %v1153_v7 = vpop.f32.mrf.mxu1 }
 0x4d2   :  { %3783 = vpow2.f32 %v3353_v36  ;;  %v3354_v45 = vmul.f32 -1.442695, %v1159_v37  ;;  %v1162_v60 = vadd.f32 %v1110_v59, %v1064_v38  ;;  %v1164_v51 = vadd.f32 %v1153_v7, %v1066_v2  ;;  %v1219_v37 = vld [vmem:[#allocation2 + $0x1f0] sm:$0xff]  ;;  %v1220_v7 = vld [vmem:[#allocation2 + $0xe8] sm:$0xff] }
 0x4d3   :  { %v1112_v47 = vpop.f32.mrf.mxu0  ;;  %v1155_v61 = vpop.f32.mrf.mxu1 }
 0x4d4   :  { %3785 = vpow2.f32 %v3354_v45  ;;  %v3356_v1 = vmul.f32 -1.442695, %v1162_v60  ;;  %v1163_v5 = vadd.f32 %v1112_v47, %v1065_v46  ;;  %v3358_v55 = vmul.f32 -1.442695, %v1164_v51  ;;  %v1222_v45 = vld [vmem:[#allocation2 + $0x70] sm:$0xf] }
 0x4d5   :  { %v1165_v57 = vadd.f32 %v1155_v61, %v1067_v56  ;;  %v1224_v51 = vld [vmem:[#allocation2 + $0x1d8] sm:$0xf] }
 0x4d6   :  { %3787 = vpow2.f32 %v3356_v1  ;;  %v3357_v50 = vmul.f32 -1.442695, %v1163_v5  ;;  %v1223_v5 = vld [vmem:[#allocation2 + $0x90] sm:$0xf] }
 0x4d8   :  { %3789 = vpow2.f32 %v3357_v50 }
 0x4d9   :  { %3791 = vpow2.f32 %v3355_v20 }
 0x4df   :  { %v3784_v52 = vpop.eup %3783 }
 0x4e0   :  { %v1184_v54 = vadd.f32 1.0, %v3784_v52 }
 0x4e1   :  { %v3786_v42 = vpop.eup %3785 }
 0x4e2   :  { %3793 = vrcp.f32 %v1184_v54  ;;  %v1185_v62 = vadd.f32 1.0, %v3786_v42 }
 0x4e3   :  { %v3788_v8 = vpop.eup %3787  ;;  %3795 = vtanh.f32 %v1161_v53  ;;  %v1221_v53 = vld [vmem:[#allocation2 + $0x78] sm:$0xff] }
 0x4e4   :  { %3797 = vrcp.f32 %v1185_v62  ;;  %v1187_v21 = vadd.f32 1.0, %v3788_v8 }
 0x4e5   :  { %v3790_v28 = vpop.eup %3789  ;;  %3799 = vpow2.f32 %v3358_v55 }
 0x4e6   :  { %3801 = vrcp.f32 %v1187_v21  ;;  %v1188_v9 = vadd.f32 1.0, %v3790_v28  ;;  %v3792_v29 = vpop.eup %3791 }
 0x4e7   :  { %3803 = vtanh.f32 %v1165_v57  ;;  %v1186_v39 = vadd.f32 1.0, %v3792_v29  ;;  %v1225_v57 = vld [vmem:[#allocation2 + $0xd0] sm:$0xf] }
 0x4e8   :  { %3805 = vrcp.f32 %v1188_v9 }
 0x4e9   :  { %3807 = vrcp.f32 %v1186_v39 }
 0x4ef   :  { %v3794_v4 = vpop.eup %3793 }
 0x4f0   :  { %v3796_v30 = vpop.eup %3795 }
 0x4f1   :  { %v3798_v12 = vpop.eup %3797  ;;  %v1206_v34 = vmul.f32 %v3796_v30, %v3794_v4 }
 0x4f2   :  { %v3800_v32 = vpop.eup %3799  ;;  %v1204_v14 = vmul.f32 %v3798_v12, %v4372_v48 }
 0x4f3   :  { %v3802_v35 = vpop.eup %3801  ;;  %v1189_v44 = vadd.f32 1.0, %v3800_v32 }
 0x4f4   :  { %v3804_v15 = vpop.eup %3803  ;;  %v4393_v58 = vadd.f32 %v1206_v34, %v1204_v14 }
 0x4f5   :  { %v3806_v16 = vpop.eup %3805  ;;  %v1207_v33 = vmul.f32 %v3804_v15, %v3802_v35 }
 0x4f6   :  { %3809 = vtanh.f32 %v4393_v58  ;;  %v1205_v17 = vmul.f32 %v3806_v16, %v4376_v63  ;;  %v3808_v31 = vpop.eup %3807 }
 0x4f7   :  { %3811 = vrcp.f32 %v1189_v44 }
 0x4f8   :  { %v4397_v18 = vadd.f32 %v1207_v33, %v1205_v17 }
 0x4fa   :  { %3813 = vtanh.f32 %v4397_v18 }
 0x503   :  { %v3810_v48 = vpop.eup %3809 }
 0x504   :  { %v1212_v0 = vmul.f32 %v3810_v48, %v3808_v31  ;;  %v3812_v24 = vpop.eup %3811 }
 0x506   :  { %1215 = vst.msk [vmem:[#allocation3 + $0x40] sm:$0xff] %vm420_vm2, %v1212_v0 }
 0x507   :  { %v3814_v25 = vpop.eup %3813 }
 0x508   :  { %v1213_v43 = vmul.f32 %v3814_v25, %v3812_v24 }
 0x50a   :  { %1216 = vst.msk [vmem:[#allocation3 + $0x48] sm:$0xf] %vm583_vm3, %v1213_v43  ;;  %v1226_v26 = vpack.c.bf16 %v1213_v43, %v1212_v0 }
 0x50c   :  { %3359 = vmatmul.mubr.msk.bf16.vlgmr.msra.gmra.mxu0 %vm420_vm2, %v1226_v26  ;;  %3360 = vmatmul.mubr.msk.bf16.vlgmr.msra.gmra.mxu1 %vm420_vm2, %v1226_v26 }
 0x50d   :  { %1403 = vmatpush1.bf16.msra.mxu0 %v4042_v10  ;;  %1446 = vmatpush1.bf16.msra.mxu1 %v4052_v13 }
 0x50e   :  { %1420 = vmatprep.mubr.bf16.mxu0 %v3922_v3  ;;  %1463 = vmatprep.mubr.bf16.mxu1 %v3922_v3 }
 0x50f   :  { %1560 = vmatprep.subr.bf16.mxu0 %v4031_v6  ;;  %1603 = vmatprep.subr.bf16.mxu1 %v4045_v11 }
 0x5cc   :  { %v1264_v63 = vpop.f32.mrf.mxu0  ;;  %v1307_v46 = vpop.f32.mrf.mxu1 }
 0x5cd   :  { %v1316_v36 = vadd.f32 %v3920_v27, %v1264_v63  ;;  %v1318_v2 = vadd.f32 %v1307_v46, %v1220_v7  ;;  %v1380_v46 = vld [vmem:[#allocation2 + $0x170] sm:$0xf] }
 0x5ce   :  { %v1266_v38 = vpop.f32.mrf.mxu0  ;;  %v1309_v19 = vpop.f32.mrf.mxu1 }
 0x5cf   :  { %v3361_v59 = vmul.f32 -1.442695, %v1316_v36  ;;  %v1317_v40 = vadd.f32 %v1266_v38, %v1219_v37  ;;  %v3363_v52 = vmul.f32 -1.442695, %v1318_v2  ;;  %v1319_v61 = vadd.f32 %v1309_v19, %v1221_v53 }
 0x5d0   :  { %v1268_v60 = vpop.f32.mrf.mxu0  ;;  %v1311_v20 = vpop.f32.mrf.mxu1 }
 0x5d1   :  { %3815 = vpow2.f32 %v3361_v59  ;;  %v3362_v47 = vmul.f32 -1.442695, %v1317_v40  ;;  %v1320_v1 = vadd.f32 %v1268_v60, %v1222_v45  ;;  %v1322_v41 = vadd.f32 %v1311_v20, %v1224_v51  ;;  %v1377_v59 = vld [vmem:[#allocation2 + $0x88] sm:$0xff] }
 0x5d2   :  { %v1270_v49 = vpop.f32.mrf.mxu0  ;;  %v1313_v55 = vpop.f32.mrf.mxu1  ;;  %v1382_v20 = vld [vmem:[#allocation2 + $0x68] sm:$0xf] }
 0x5d3   :  { %3817 = vpow2.f32 %v3362_v47  ;;  %v3364_v50 = vmul.f32 -1.442695, %v1320_v1  ;;  %v1321_v6 = vadd.f32 %v1270_v49, %v1223_v5  ;;  %v3366_v56 = vmul.f32 -1.442695, %v1322_v41  ;;  %v1379_v41 = vld [vmem:[#allocation2 + $0x1c8] sm:$0xff] }
 0x5d4   :  { %v1323_v28 = vadd.f32 %v1313_v55, %v1225_v57 }
 0x5d5   :  { %3819 = vpow2.f32 %v3364_v50  ;;  %v3365_v11 = vmul.f32 -1.442695, %v1321_v6 }
 0x5d7   :  { %3821 = vpow2.f32 %v3365_v11  ;;  %v1378_v11 = vld [vmem:[#allocation2 + $0xa8] sm:$0xff] }
 0x5d8   :  { %3823 = vpow2.f32 %v3363_v52 }
 0x5de   :  { %v3816_v54 = vpop.eup %3815 }
 0x5df   :  { %v1342_v42 = vadd.f32 1.0, %v3816_v54 }
 0x5e0   :  { %v3818_v62 = vpop.eup %3817 }
 0x5e1   :  { %3825 = vrcp.f32 %v1342_v42  ;;  %v1343_v8 = vadd.f32 1.0, %v3818_v62 }
 0x5e2   :  { %v3820_v21 = vpop.eup %3819  ;;  %3827 = vtanh.f32 %v1319_v61 }
 0x5e3   :  { %3829 = vrcp.f32 %v1343_v8  ;;  %v1345_v9 = vadd.f32 1.0, %v3820_v21  ;;  %v1383_v8 = vld [vmem:[#allocation2 + $0x190] sm:$0xf] }
 0x5e4   :  { %v3822_v29 = vpop.eup %3821  ;;  %3831 = vpow2.f32 %v3366_v56 }
 0x5e5   :  { %3833 = vrcp.f32 %v1345_v9  ;;  %v1346_v4 = vadd.f32 1.0, %v3822_v29  ;;  %v3824_v30 = vpop.eup %3823 }
 0x5e6   :  { %3835 = vtanh.f32 %v1323_v28  ;;  %v1344_v14 = vadd.f32 1.0, %v3824_v30 }
 0x5e7   :  { %3837 = vrcp.f32 %v1346_v4 }
 0x5e8   :  { %3839 = vrcp.f32 %v1344_v14 }
 0x5ee   :  { %v3826_v12 = vpop.eup %3825 }
 0x5ef   :  { %v3828_v39 = vpop.eup %3827 }
 0x5f0   :  { %v3830_v32 = vpop.eup %3829  ;;  %v1364_v15 = vmul.f32 %v3828_v39, %v3826_v12 }
 0x5f1   :  { %v3832_v34 = vpop.eup %3831  ;;  %v1362_v35 = vmul.f32 %v3830_v32, %v4393_v58 }
 0x5f2   :  { %v3834_v16 = vpop.eup %3833  ;;  %v1347_v31 = vadd.f32 1.0, %v3832_v34 }
 0x5f3   :  { %v3836_v44 = vpop.eup %3835  ;;  %v4411_v17 = vadd.f32 %v1364_v15, %v1362_v35 }
 0x5f4   :  { %v3838_v33 = vpop.eup %3837  ;;  %v1365_v0 = vmul.f32 %v3836_v44, %v3834_v16 }
 0x5f5   :  { %3841 = vtanh.f32 %v4411_v17  ;;  %v1363_v48 = vmul.f32 %v3838_v33, %v4397_v18  ;;  %v3840_v25 = vpop.eup %3839  ;;  %v1376_v18 = vld [vmem:[#allocation2 + $0xb8] sm:$0xff] }
 0x5f6   :  { %3843 = vrcp.f32 %v1347_v31 }
 0x5f7   :  { %v4415_v24 = vadd.f32 %v1365_v0, %v1363_v48 }
 0x5f9   :  { %3845 = vtanh.f32 %v4415_v24 }
 0x602   :  { %v3842_v58 = vpop.eup %3841 }
 0x603   :  { %v1370_v43 = vmul.f32 %v3842_v58, %v3840_v25  ;;  %v3844_v26 = vpop.eup %3843 }
 0x605   :  { %1373 = vst.msk [vmem:[#allocation3 + $0x50] sm:$0xff] %vm420_vm2, %v1370_v43 }
 0x606   :  { %v3846_v63 = vpop.eup %3845 }
 0x607   :  { %v1371_v27 = vmul.f32 %v3846_v63, %v3844_v26 }
 0x609   :  { %1374 = vst.msk [vmem:[#allocation3 + $0x58] sm:$0xf] %vm583_vm3, %v1371_v27  ;;  %v1384_v36 = vpack.c.bf16 %v1371_v27, %v1370_v43 }
 0x60b   :  { %3367 = vmatmul.mubr.msk.bf16.vlgmr.msra.gmra.mxu0 %vm420_vm2, %v1384_v36  ;;  %3368 = vmatmul.mubr.msk.bf16.vlgmr.msra.gmra.mxu1 %vm420_vm2, %v1384_v36 }
 0x60c   :  { %1561 = vmatpush1.bf16.msra.mxu0 %v4042_v10  ;;  %1604 = vmatpush1.bf16.msra.mxu1 %v4052_v13  ;;  %v1381_v10 = vld [vmem:[#allocation2 + $0x178] sm:$0xf] }
 0x60d   :  { %1578 = vmatprep.mubr.bf16.mxu0 %v3922_v3  ;;  %1621 = vmatprep.mubr.bf16.mxu1 %v3922_v3 }
 0x6cb   :  { %v1422_v37 = vpop.f32.mrf.mxu0  ;;  %v1465_v1 = vpop.f32.mrf.mxu1 }
 0x6cc   :  { %v1474_v38 = vadd.f32 %v1422_v37, %v1376_v18  ;;  %v1476_v7 = vadd.f32 %v1465_v1, %v1378_v11  ;;  %v1715_v18 = vld [vmem:[%s5114_s4 + $0x8] sm:$0x7f]  ;;  %v3387_v37 = vld [vmem:[%s5114_s4 + $0x18] sm:$0x7f] }
 0x6cd   :  { %v1424_v40 = vpop.f32.mrf.mxu0  ;;  %v1467_v19 = vpop.f32.mrf.mxu1 }
 0x6ce   :  { %v3369_v45 = vmul.f32 -1.442695, %v1474_v38  ;;  %v1475_v60 = vadd.f32 %v1424_v40, %v1377_v59  ;;  %v3371_v51 = vmul.f32 -1.442695, %v1476_v7  ;;  %v1477_v54 = vadd.f32 %v1467_v19, %v1379_v41  ;;  %v1714_v38 = vld [vmem:[%s5114_s4] sm:$0xff]  ;;  %v3386_v59 = vld [vmem:[%s5114_s4 + $0x10] sm:$0xff] }
 0x6cf   :  { %v1426_v47 = vpop.f32.mrf.mxu0  ;;  %v1469_v2 = vpop.f32.mrf.mxu1  ;;  %v1534_v40 = vld [vmem:[#allocation2 + $0x198] sm:$0xff]  ;;  %v1539_v19 = vld [vmem:[#allocation2 + $0x10] sm:$0xf] }
 0x6d0   :  { %3847 = vpow2.f32 %v3369_v45  ;;  %v3370_v5 = vmul.f32 -1.442695, %v1475_v60  ;;  %v1478_v49 = vadd.f32 %v1426_v47, %v1380_v46  ;;  %v1480_v52 = vadd.f32 %v1469_v2, %v1382_v20  ;;  %v1535_v46 = vld [vmem:[#allocation2 + $0x38] sm:$0xff] }
 0x6d1   :  { %v1428_v50 = vpop.f32.mrf.mxu0  ;;  %v1471_v42 = vpop.f32.mrf.mxu1 }
 0x6d2   :  { %3849 = vpow2.f32 %v3370_v5  ;;  %v3372_v13 = vmul.f32 -1.442695, %v1478_v49  ;;  %v1479_v6 = vadd.f32 %v1428_v50, %v1381_v10  ;;  %v3374_v62 = vmul.f32 -1.442695, %v1480_v52  ;;  %v1538_v49 = vld [vmem:[#allocation2 + $0x158] sm:$0xf] }
 0x6d3   :  { %v1481_v21 = vadd.f32 %v1471_v42, %v1383_v8  ;;  %v1537_v42 = vld [vmem:[#allocation2 + $0x1c0] sm:$0xff] }
 0x6d4   :  { %3851 = vpow2.f32 %v3372_v13  ;;  %v3373_v3 = vmul.f32 -1.442695, %v1479_v6 }
 0x6d6   :  { %3853 = vpow2.f32 %v3373_v3 }
 0x6d7   :  { %3855 = vpow2.f32 %v3371_v51  ;;  %v1536_v51 = vld [vmem:[#allocation2 + $0xc0] sm:$0xff] }
 0x6dd   :  { %v3848_v53 = vpop.eup %3847 }
 0x6de   :  { %v1500_v61 = vadd.f32 1.0, %v3848_v53  ;;  %v1540_v53 = vld [vmem:[#allocation2 + $0x58] sm:$0xf] }
 0x6df   :  { %v3850_v55 = vpop.eup %3849 }
 0x6e0   :  { %3857 = vrcp.f32 %v1500_v61  ;;  %v1501_v56 = vadd.f32 1.0, %v3850_v55 }
 0x6e1   :  { %v3852_v57 = vpop.eup %3851  ;;  %3859 = vtanh.f32 %v1477_v54 }
 0x6e2   :  { %3861 = vrcp.f32 %v1501_v56  ;;  %v1503_v28 = vadd.f32 1.0, %v3852_v57 }
 0x6e3   :  { %v3854_v9 = vpop.eup %3853  ;;  %3863 = vpow2.f32 %v3374_v62 }
 0x6e4   :  { %3865 = vrcp.f32 %v1503_v28  ;;  %v1504_v29 = vadd.f32 1.0, %v3854_v9  ;;  %v3856_v4 = vpop.eup %3855  ;;  %v1541_v9 = vld [vmem:[#allocation2 + $0xa0] sm:$0xf] }
 0x6e5   :  { %3867 = vtanh.f32 %v1481_v21  ;;  %v1502_v32 = vadd.f32 1.0, %v3856_v4 }
 0x6e6   :  { %3869 = vrcp.f32 %v1504_v29 }
 0x6e7   :  { %3871 = vrcp.f32 %v1502_v32 }
 0x6ed   :  { %v3858_v30 = vpop.eup %3857 }
 0x6ee   :  { %v3860_v12 = vpop.eup %3859 }
 0x6ef   :  { %v3862_v39 = vpop.eup %3861  ;;  %v1522_v35 = vmul.f32 %v3860_v12, %v3858_v30 }
 0x6f0   :  { %v3864_v14 = vpop.eup %3863  ;;  %v1520_v34 = vmul.f32 %v3862_v39, %v4411_v17 }
 0x6f1   :  { %v3866_v15 = vpop.eup %3865  ;;  %v1505_v31 = vadd.f32 1.0, %v3864_v14 }
 0x6f2   :  { %v3868_v16 = vpop.eup %3867  ;;  %v4427_v44 = vadd.f32 %v1522_v35, %v1520_v34 }
 0x6f3   :  { %v3870_v33 = vpop.eup %3869  ;;  %v1523_v0 = vmul.f32 %v3868_v16, %v3866_v15 }
 0x6f4   :  { %3873 = vtanh.f32 %v4427_v44  ;;  %v1521_v48 = vmul.f32 %v3870_v33, %v4415_v24  ;;  %v3872_v58 = vpop.eup %3871  ;;  %v3923_v24 = vmov 0.0  }
 0x6f5   :  { %3875 = vrcp.f32 %v1505_v31  ;;  %3524 = vmatprep.subr.mxu0 %v3923_v24  ;;  %3531 = vmatprep.subr.mxu1 %v3923_v24 }
 0x6f6   :  { %v4431_v25 = vadd.f32 %v1523_v0, %v1521_v48 }
 0x6f8   :  { %3877 = vtanh.f32 %v4431_v25 }
 0x701   :  { %v3874_v17 = vpop.eup %3873 }
 0x702   :  { %v1528_v43 = vmul.f32 %v3874_v17, %v3872_v58  ;;  %v3876_v26 = vpop.eup %3875 }
 0x704   :  { %1531 = vst.msk [vmem:[#allocation3 + $0x60] sm:$0xff] %vm420_vm2, %v1528_v43 }
 0x705   :  { %v3878_v63 = vpop.eup %3877 }
 0x706   :  { %v1529_v27 = vmul.f32 %v3878_v63, %v3876_v26 }
 0x708   :  { %1532 = vst.msk [vmem:[#allocation3 + $0x68] sm:$0xf] %vm583_vm3, %v1529_v27  ;;  %v1542_v36 = vpack.c.bf16 %v1529_v27, %v1528_v43 }
 0x70a   :  { %3375 = vmatmul.mubr.msk.bf16.vlgmr.msra.gmra.mxu0 %vm420_vm2, %v1542_v36  ;;  %3376 = vmatmul.mubr.msk.bf16.vlgmr.msra.gmra.mxu1 %vm420_vm2, %v1542_v36  ;;  %v1691_v36 = vld [vmem:[#allocation3] sm:$0xff] }
 0x70b   :  { %3525 = vmatpush3.msk.msra.mxu0 %vm424_vm0, %v1715_v18  ;;  %3532 = vmatpush3.msk.msra.mxu1 %vm424_vm0, %v3387_v37  ;;  %v1693_v18 = vld [vmem:[#allocation3 + $0x10] sm:$0xff]  ;;  %v1824_v37 = vrot.slane %v1691_v36, 1 }
 0x70c   :  { %3526 = vmatprep.subr.mxu0 %v3923_v24  ;;  %3533 = vmatprep.subr.mxu1 %v3923_v24 }
 0x70d   :  { %3527 = vmatpush3.msra.mxu0 %v1714_v38  ;;  %3534 = vmatpush3.msra.mxu1 %v3386_v59  ;;  %v1724_v38 = vrot.slane %v1693_v18, 7  ;;  %v2010_v59 = vrot.slane %v1691_v36, 3 }
 0x70e   :  { %3528 = vmatprep.mubr.msk.f32.mxu0 %vm3924_vm4, %v3923_v24  ;;  %3535 = vmatprep.mubr.msk.f32.mxu1 %vm3924_vm4, %v3923_v24 }
 0x70f   :  { %3538 = vmatprep.subr.mxu0 %v3923_v24  ;;  %3545 = vmatprep.subr.mxu1 %v3923_v24 }
 0x7ca   :  { %v1580_v45 = vpop.f32.mrf.mxu0  ;;  %v1623_v50 = vpop.f32.mrf.mxu1 }
 0x7cb   :  { %v1632_v60 = vadd.f32 %v1580_v45, %v1534_v40  ;;  %v1634_v52 = vadd.f32 %v1623_v50, %v1536_v51  ;;  %v4464_v40 = vld [vmem:[#allocation3 + $0x8] sm:$0xf]  ;;  %v1918_v45 = vrot.slane %v1693_v18, 1  ;;  %v1825_v51 = vsel %vm1725_vm5, %v1693_v18, %v1824_v37 }
 0x7cc   :  { %v1582_v47 = vpop.f32.mrf.mxu0  ;;  %v1625_v2 = vpop.f32.mrf.mxu1 }
 0x7cd   :  { %v3377_v1 = vmul.f32 -1.442695, %v1632_v60  ;;  %v1633_v5 = vadd.f32 %v1582_v47, %v1535_v46  ;;  %v3379_v54 = vmul.f32 -1.442695, %v1634_v52  ;;  %v1635_v62 = vadd.f32 %v1625_v2, %v1537_v42  ;;  %v4470_v2 = vld [vmem:[#allocation3 + $0x30] sm:$0xff] }
 0x7ce   :  { %v1584_v10 = vpop.f32.mrf.mxu0  ;;  %v1627_v41 = vpop.f32.mrf.mxu1  ;;  %v2011_v60 = vrot.slane %v1693_v18, 2  ;;  %v2104_v46 = vrot.slane %v1693_v18, 3  ;;  %v2197_v47 = vrot.slane %v1693_v18, 4  ;;  %v4474_v52 = vld [vmem:[#allocation3 + $0x18] sm:$0xf] }
 0x7cf   :  { %3879 = vpow2.f32 %v3377_v1  ;;  %v3378_v13 = vmul.f32 -1.442695, %v1633_v5  ;;  %v1636_v6 = vadd.f32 %v1584_v10, %v1538_v49  ;;  %v1638_v61 = vadd.f32 %v1627_v41, %v1540_v53  ;;  %v4477_v53 = vld [vmem:[#allocation3 + $0x40] sm:$0xff] }
 0x7d0   :  { %v1586_v3 = vpop.f32.mrf.mxu0  ;;  %v1629_v8 = vpop.f32.mrf.mxu1  ;;  %v2103_v5 = vrot.slane %v1691_v36, 4  ;;  %v2289_v49 = vrot.slane %v1691_v36, 6  ;;  %v2290_v10 = vrot.slane %v1693_v18, 5  ;;  %v2762_v41 = vrot.slane %v4464_v40, 3 }
 0x7d1   :  { %3881 = vpow2.f32 %v3378_v13  ;;  %v3380_v11 = vmul.f32 -1.442695, %v1636_v6  ;;  %v1637_v7 = vadd.f32 %v1586_v3, %v1539_v19  ;;  %v3382_v21 = vmul.f32 -1.442695, %v1638_v61  ;;  %v4466_v13 = vld [vmem:[#allocation3 + $0x20] sm:$0xff] }
 0x7d2   :  { %v1639_v4 = vadd.f32 %v1629_v8, %v1541_v9  ;;  %v2382_v6 = vrot.slane %v1691_v36, 7  ;;  %v2383_v19 = vrot.slane %v1693_v18, 6  ;;  %v2576_v3 = vrot.slane %v4464_v40, 1 }
 0x7d3   :  { %3883 = vpow2.f32 %v3380_v11  ;;  %v3381_v20 = vmul.f32 -1.442695, %v1637_v7  ;;  %v2669_v11 = vrot.slane %v4464_v40, 2  ;;  %v2012_v61 = vsel %vm1725_vm5, %v2011_v60, %v2010_v59 }
 0x7d4   :  { %v4482_v42 = vsel %vm1725_vm5, %v2104_v46, %v2103_v5  ;;  %v1727_v8 = vrot.slane %v4466_v13, 6  ;;  %v1730_v9 = vrot.slane %v4470_v2, 5  ;;  %v3395_v5 = vld [vmem:[%s5114_s4 + $0x38] sm:$0x7f] }
 0x7d5   :  { %3885 = vpow2.f32 %v3381_v20  ;;  %v1726_v20 = vsel %vm1725_vm5, %v1724_v38, %v1691_v36  ;;  %v1923_v38 = vrot.slane %v4477_v53, 6 }
 0x7d6   :  { %3887 = vpow2.f32 %v3379_v54 }
 0x7dc   :  { %v3880_v55 = vpop.eup %3879 }
 0x7dd   :  { %v1658_v56 = vadd.f32 1.0, %v3880_v55 }
 0x7de   :  { %v3882_v57 = vpop.eup %3881 }
 0x7df   :  { %3889 = vrcp.f32 %v1658_v56  ;;  %v1659_v28 = vadd.f32 1.0, %v3882_v57  ;;  %v4488_v56 = vld [vmem:[#allocation3 + $0x50] sm:$0xff]  ;;  %v1826_v57 = vrot.slane %v4466_v13, 7 }
 0x7e0   :  { %v3884_v29 = vpop.eup %3883  ;;  %3891 = vtanh.f32 %v1635_v62 }
 0x7e1   :  { %3893 = vrcp.f32 %v1659_v28  ;;  %v1661_v30 = vadd.f32 1.0, %v3884_v29  ;;  %v4497_v29 = vsel %vm1725_vm5, %v2383_v19, %v2382_v6  ;;  %v2018_v6 = vrot.slane %v4488_v56, 6  ;;  %v3390_v19 = vld [vmem:[%s5114_s4 + $0x20] sm:$0xff] }
 0x7e2   :  { %v3886_v12 = vpop.eup %3885  ;;  %3895 = vpow2.f32 %v3382_v21  ;;  %v4493_v21 = vsel %vm1725_vm5, %v2290_v10, %v2289_v49 }
 0x7e3   :  { %3897 = vrcp.f32 %v1661_v30  ;;  %v1662_v39 = vadd.f32 1.0, %v3886_v12  ;;  %v3888_v32 = vpop.eup %3887  ;;  %v4502_v30 = vsel %vm1725_vm5, %v4474_v52, %v2576_v3 }
 0x7e4   :  { %3899 = vtanh.f32 %v1639_v4  ;;  %v1660_v15 = vadd.f32 1.0, %v3888_v32  ;;  %v2483_v4 = vrot.slane %v4474_v52, 7  ;;  %v1733_v32 = vrot.slane %v4477_v53, 4 }
 0x7e5   :  { %3901 = vrcp.f32 %v1662_v39  ;;  %v4504_v39 = vld [vmem:[#allocation3 + $0x60] sm:$0xff] }
 0x7e6   :  { %3903 = vrcp.f32 %v1660_v15  ;;  %v1830_v15 = vrot.slane %v4477_v53, 5 }
 0x7ec   :  { %v3890_v14 = vpop.eup %3889 }
 0x7ed   :  { %v3892_v34 = vpop.eup %3891 }
 0x7ee   :  { %v3894_v35 = vpop.eup %3893  ;;  %v1680_v31 = vmul.f32 %v3892_v34, %v3890_v14  ;;  %v1828_v14 = vrot.slane %v4470_v2, 6  ;;  %v2670_v34 = vrot.slane %v4474_v52, 1 }
 0x7ef   :  { %v3896_v16 = vpop.eup %3895  ;;  %v1678_v33 = vmul.f32 %v3894_v35, %v4427_v44  ;;  %v1917_v44 = vrot.slane %v1691_v36, 2  ;;  %v1736_v35 = vrot.slane %v4488_v56, 3 }
 0x7f0   :  { %v3898_v48 = vpop.eup %3897  ;;  %v1663_v43 = vadd.f32 1.0, %v3896_v16 }
 0x7f1   :  { %v3900_v0 = vpop.eup %3899  ;;  %v1682_v58 = vadd.f32 %v1680_v31, %v1678_v33  ;;  %v1919_v54 = vsel %vm1725_vm5, %v1918_v45, %v1917_v44  ;;  %v2013_v33 = vrot.slane %v4466_v13, 1  ;;  %v1729_v31 = vsel %vm1728_vm6, %v1727_v8, %v1726_v20 }
 0x7f2   :  { %v3902_v17 = vpop.eup %3901  ;;  %v1681_v63 = vmul.f32 %v3900_v0, %v3898_v48  ;;  %v1920_v16 = vsel %vm1728_vm6, %v4466_v13, %v1919_v54  ;;  %v1827_v48 = vsel %vm1728_vm6, %v1826_v57, %v1825_v51  ;;  %v1832_v0 = vrot.slane %v4488_v56, 4  ;;  %v3394_v54 = vld [vmem:[%s5114_s4 + $0x30] sm:$0xff] }
 0x7f3   :  { %3905 = vtanh.f32 %v1682_v58  ;;  %v1679_v26 = vmul.f32 %v3902_v17, %v4431_v25  ;;  %v3904_v1 = vpop.eup %3903  ;;  %v2196_v25 = vrot.slane %v1691_v36, 5  ;;  %v1732_v58 = vsel %vm1731_vm7, %v1730_v9, %v1729_v31 }
 0x7f4   :  { %3907 = vrcp.f32 %v1663_v43  ;;  %v1739_v17 = vrot.slane %v4504_v39, 2  ;;  %v1834_v43 = vrot.slane %v4504_v39, 3  ;;  %v2016_v44 = vrot.slane %v4477_v53, 7 }
 0x7f5   :  { %v1683_v27 = vadd.f32 %v1681_v63, %v1679_v26  ;;  %v4485_v55 = vsel %vm1725_vm5, %v2197_v47, %v2196_v25  ;;  %v1735_v26 = vsel %vm1734_vm8, %v1733_v32, %v1732_v58  ;;  %v1829_v63 = vsel %vm1731_vm7, %v1828_v14, %v1827_v48 }
 0x7f6   :  { %v1738_v18 = vsel %vm1737_vm9, %v1736_v35, %v1735_v26  ;;  %v1831_v37 = vsel %vm1734_vm8, %v1830_v15, %v1829_v63  ;;  %v1925_v25 = vrot.slane %v4488_v56, 5  ;;  %v2014_v20 = vsel %vm1728_vm6, %v2013_v33, %v2012_v61  ;;  %v3399_v15 = vld [vmem:[%s5114_s4 + $0x48] sm:$0x7f]  ;;  %v3398_v26 = vld [vmem:[%s5114_s4 + $0x40] sm:$0xff] }
 0x7f7   :  { %3909 = vtanh.f32 %v1683_v27  ;;  %v1921_v27 = vrot.slane %v4470_v2, 7  ;;  %v1833_v45 = vsel %vm1737_vm9, %v1832_v0, %v1831_v37  ;;  %v1741_v46 = vsel %vm1740_vm10, %v1739_v17, %v1738_v18 }
 0x7f8   :  { %v1835_v47 = vsel %vm1740_vm10, %v1834_v43, %v1833_v45  ;;  %v2020_v51 = vrot.slane %v4504_v39, 5  ;;  %v2015_v8 = vsel %vm1731_vm7, %v4470_v2, %v2014_v20  ;;  %v2199_v32 = vrot.slane %v4466_v13, 3  ;;  %v3403_v43 = vld [vmem:[%s5114_s4 + $0x58] sm:$0x7f]  ;;  %v4643_v20 = vld [vmem:[#allocation3 + $0x28] sm:$0xf] }
 0x7f9   :  { %v1922_v3 = vsel %vm1731_vm7, %v1921_v27, %v1920_v16  ;;  %v2017_v9 = vsel %vm1734_vm8, %v2016_v44, %v2015_v8  ;;  %v2201_v16 = vrot.slane %v4470_v2, 2  ;;  %v2763_v33 = vrot.slane %v4474_v52, 2  ;;  %v4657_v8 = vld [vmem:[#allocation3 + $0x38] sm:$0xf] }
 0x7fa   :  { %v2019_v35 = vsel %vm1737_vm9, %v2018_v6, %v2017_v9  ;;  %v2111_v0 = vrot.slane %v4488_v56, 7  ;;  %v2203_v58 = vrot.slane %v4477_v53, 1  ;;  %v2113_v27 = vrot.slane %v4504_v39, 6  ;;  %v4673_v9 = vld [vmem:[#allocation3 + $0x48] sm:$0xf] }
 0x7fb   :  { %v2021_v48 = vsel %vm1740_vm10, %v2020_v51, %v2019_v35  ;;  %v4602_v18 = vsel %vm1725_vm5, %v2483_v4, %v4464_v40  ;;  %v2200_v44 = vsel %vm1728_vm6, %v2199_v32, %v4485_v55  ;;  %v3402_v4 = vld [vmem:[%s5114_s4 + $0x50] sm:$0xff]  ;;  %v2387_v6 = vrot.slane %v4470_v2, 4  ;;  %v3411_v51 = vld [vmem:[%s5114_s4 + $0x78] sm:$0x7f] }
 0x7fc   :  { %v2202_v45 = vsel %vm1731_vm7, %v2201_v16, %v2200_v44  ;;  %v4682_v32 = vld [vmem:[#allocation3 + $0x58] sm:$0xf]  ;;  %v4695_v16 = vld [vmem:[#allocation3 + $0x68] sm:$0xf] }
 0x7fd   :  { %v2493_v44 = vrot.slane %v4695_v16, 2 }
 0x800   :  { %v3906_v50 = vpop.eup %3905 }
 0x801   :  { %v1686_v7 = vmul.f32 %v3906_v50, %v3904_v1  ;;  %v3908_v62 = vpop.eup %3907  ;;  %v3391_v1 = vld [vmem:[%s5114_s4 + $0x28] sm:$0x7f]  ;;  %v1927_v50 = vrot.slane %v4504_v39, 4 }
 0x803   :  { %1689 = vst.msk [vmem:[#allocation3 + $0x70] sm:$0xff] %vm420_vm2, %v1686_v7 }
 0x804   :  { %v3910_v28 = vpop.eup %3909 }
 0x805   :  { %v1687_v12 = vmul.f32 %v3910_v28, %v3908_v62  ;;  %v1924_v62 = vsel %vm1734_vm8, %v1923_v38, %v1922_v3  ;;  %v2106_v28 = vrot.slane %v4466_v13, 2  ;;  %v2298_v3 = vrot.slane %v4488_v56, 1 }
 0x806   :  { %v1926_v61 = vsel %vm1737_vm9, %v1925_v25, %v1924_v62 }
 0x807   :  { %1690 = vst.msk [vmem:[#allocation3 + $0x78] sm:$0xf] %vm583_vm3, %v1687_v12  ;;  %v2108_v12 = vrot.slane %v4470_v2, 1  ;;  %v1928_v14 = vsel %vm1740_vm10, %v1927_v50, %v1926_v61  ;;  %v2107_v63 = vsel %vm1728_vm6, %v2106_v28, %v4482_v42  ;;  %v2206_v42 = vrot.slane %v4504_v39, 7 }
 0x808   :  { %v2296_v50 = vrot.slane %v4477_v53, 2 }
 0x809   :  { %v2109_v37 = vsel %vm1731_vm7, %v2108_v12, %v2107_v63 }
 0x80a   :  { %v4524_v36 = vld [vmem:[#allocation3 + $0x70] sm:$0xff] }
 0x80b   :  { %v1742_v59 = vrot.slane %v4524_v36, 1  ;;  %v1836_v60 = vrot.slane %v4524_v36, 2  ;;  %v1929_v7 = vrot.slane %v4524_v36, 3  ;;  %v2022_v57 = vrot.slane %v4524_v36, 4 }
 0x80c   :  { %v2115_v38 = vrot.slane %v4524_v36, 5  ;;  %v2301_v61 = vrot.slane %v4524_v36, 7 }
 0x80d   :  { %v1744_v49 = vsel %vm1743_vm11, %v1742_v59, %v1741_v46  ;;  %v1837_v10 = vsel %vm1743_vm11, %v1836_v60, %v1835_v47  ;;  %v1930_v31 = vsel %vm1743_vm11, %v1929_v7, %v1928_v14  ;;  %v2023_v17 = vsel %vm1743_vm11, %v2022_v57, %v2021_v48 }
 0x80e   :  { %3529 = vmatmul.mubr.msk.f32.vlgmr.msra.gmra.mxu0 %vm420_vm2, %v1744_v49  ;;  %3536 = vmatmul.mubr.msk.f32.vlgmr.msra.gmra.mxu1 %vm420_vm2, %v1837_v10  ;;  %v2110_v59 = vsel %vm1734_vm8, %v4477_v53, %v2109_v37  ;;  %v2208_v60 = vrot.slane %v4524_v36, 6  ;;  %v2292_v46 = vrot.slane %v4466_v13, 4  ;;  %v2204_v47 = vsel %vm1734_vm8, %v2203_v58, %v2202_v45  ;;  %v3407_v10 = vld [vmem:[%s5114_s4 + $0x68] sm:$0x7f]  ;;  %v3414_v37 = vld [vmem:[%s5114_s4 + $0x80] sm:$0xff] }
 0x80f   :  { %3539 = vmatpush3.msk.msra.mxu0 %vm424_vm0, %v3391_v1  ;;  %3546 = vmatpush3.msk.msra.mxu1 %vm424_vm0, %v3395_v5  ;;  %v2112_v55 = vsel %vm1737_vm9, %v2111_v0, %v2110_v59  ;;  %v2294_v1 = vrot.slane %v4470_v2, 3  ;;  %v2385_v5 = vrot.slane %v4466_v13, 5  ;;  %v2205_v49 = vsel %vm1737_vm9, %v4488_v56, %v2204_v47 }
 0x810   :  { %3540 = vmatprep.subr.mxu0 %v3923_v24  ;;  %3547 = vmatprep.subr.mxu1 %v3923_v24  ;;  %v2114_v25 = vsel %vm1740_vm10, %v2113_v27, %v2112_v55  ;;  %v2389_v7 = vrot.slane %v4477_v53, 3  ;;  %v2293_v62 = vsel %vm1728_vm6, %v2292_v46, %v4493_v21  ;;  %v2391_v53 = vrot.slane %v4488_v56, 2  ;;  %v3419_v27 = vld [vmem:[%s5114_s4 + $0x98] sm:$0x7f] }
 0x811   :  { %3541 = vmatpush3.msra.mxu0 %v3390_v19  ;;  %3542 = vmatprep.mubr.msk.f32.mxu0 %vm3924_vm4, %v3923_v24  ;;  %v2116_v13 = vsel %vm1743_vm11, %v2115_v38, %v2114_v25  ;;  %v2207_v19 = vsel %vm1740_vm10, %v2206_v42, %v2205_v49  ;;  %v4664_v57 = vsel %vm1725_vm5, %v2670_v34, %v2669_v11  ;;  %v2393_v21 = vrot.slane %v4504_v39, 1  ;;  %v3410_v11 = vld [vmem:[%s5114_s4 + $0x70] sm:$0xff] }
 0x812   :  { %3548 = vmatpush3.msra.mxu1 %v3394_v54  ;;  %3549 = vmatprep.mubr.msk.f32.mxu1 %vm3924_vm4, %v3923_v24  ;;  %v2209_v2 = vsel %vm1743_vm11, %v2208_v60, %v2207_v19  ;;  %v3406_v54 = vld [vmem:[%s5114_s4 + $0x60] sm:$0xff]  ;;  %v2295_v28 = vsel %vm1731_vm7, %v2294_v1, %v2293_v62  ;;  %v2386_v56 = vsel %vm1728_vm6, %v2385_v5, %v4497_v29  ;;  %v2485_v29 = vrot.slane %v4643_v20, 6 }
 0x813   :  { %3552 = vmatprep.subr.mxu0 %v3923_v24  ;;  %3543 = vmatmul.mubr.msk.f32.vlgmr.msra.gmra.mxu0 %vm420_vm2, %v1930_v31  ;;  %v2297_v34 = vsel %vm1734_vm8, %v2296_v50, %v2295_v28  ;;  %v2388_v12 = vsel %vm1731_vm7, %v2387_v6, %v2386_v56  ;;  %v4690_v14 = vsel %vm1725_vm5, %v2763_v33, %v2762_v41  ;;  %v2487_v31 = vrot.slane %v4657_v8, 5  ;;  %v3415_v41 = vld [vmem:[%s5114_s4 + $0x88] sm:$0x7f]  ;;  %v4708_v33 = vld [vmem:[#allocation3 + $0x78] sm:$0xf] }
 0x814   :  { %3550 = vmatmul.mubr.msk.f32.vlgmr.msra.gmra.mxu1 %vm420_vm2, %v2023_v17  ;;  %3553 = vmatpush3.msk.msra.mxu0 %vm424_vm0, %v3399_v15  ;;  %v2299_v35 = vsel %vm1737_vm9, %v2298_v3, %v2297_v34  ;;  %v2390_v15 = vsel %vm1734_vm8, %v2389_v7, %v2388_v12  ;;  %v2578_v48 = vrot.slane %v4643_v20, 7  ;;  %v2489_v0 = vrot.slane %v4673_v9, 4  ;;  %v3423_v50 = vld [vmem:[%s5114_s4 + $0xa8] sm:$0x7f] }
 0x815   :  { %3559 = vmatprep.subr.mxu1 %v3923_v24  ;;  %3554 = vmatprep.subr.mxu0 %v3923_v24  ;;  %v2300_v40 = vsel %vm1740_vm10, %v4504_v39, %v2299_v35  ;;  %v2392_v52 = vsel %vm1737_vm9, %v2391_v53, %v2390_v15  ;;  %v2580_v58 = vrot.slane %v4657_v8, 6  ;;  %v2486_v38 = vsel %vm1728_vm6, %v2485_v29, %v4602_v18  ;;  %v3418_v18 = vld [vmem:[%s5114_s4 + $0x90] sm:$0xff]  ;;  %v2920_v15 = vld [vmem:[%s5115_s8 + $0xf8] sm:$0xff] }
 0x816   :  { %3560 = vmatpush3.msk.msra.mxu1 %vm424_vm0, %v3403_v43  ;;  %3555 = vmatpush3.msra.mxu0 %v3398_v26  ;;  %v2302_v17 = vsel %vm1743_vm11, %v2301_v61, %v2300_v40  ;;  %v2394_v39 = vsel %vm1740_vm10, %v2393_v21, %v2392_v52  ;;  %v2491_v43 = vrot.slane %v4682_v32, 3  ;;  %v2582_v26 = vrot.slane %v4673_v9, 5  ;;  %v2916_v40 = vld [vmem:[%s5115_s8 + $0xd8] sm:$0xff]  ;;  %v2915_v52 = vld [vmem:[%s5115_s8 + $0xd0] sm:$0xff] }
 0x817   :  { %3561 = vmatprep.subr.mxu1 %v3923_v24  ;;  %3556 = vmatprep.mubr.msk.f32.mxu0 %vm3924_vm4, %v3923_v24  ;;  %v2395_v63 = vsel %vm1743_vm11, %v4524_v36, %v2394_v39  ;;  %v2584_v42 = vrot.slane %v4682_v32, 4  ;;  %v2488_v36 = vsel %vm1731_vm7, %v2487_v31, %v2486_v38  ;;  %v2579_v59 = vsel %vm1728_vm6, %v2578_v48, %v4502_v30  ;;  %v2918_v31 = vld [vmem:[%s5115_s8 + $0xe8] sm:$0xff]  ;;  %v2917_v48 = vld [vmem:[%s5115_s8 + $0xe0] sm:$0xff]  ;;  %v2903_v38 = vld [vmem:[%s5115_s8 + $0x70] sm:$0xff] }
 0x818   :  { %3562 = vmatpush3.msra.mxu1 %v3402_v4  ;;  %3563 = vmatprep.mubr.msk.f32.mxu1 %vm3924_vm4, %v3923_v24  ;;  %v2495_v4 = vrot.slane %v4708_v33, 1  ;;  %v2586_v45 = vrot.slane %v4695_v16, 3  ;;  %v2490_v60 = vsel %vm1734_vm8, %v2489_v0, %v2488_v36  ;;  %v2581_v46 = vsel %vm1731_vm7, %v2580_v58, %v2579_v59  ;;  %v2912_v0 = vld [vmem:[%s5115_s8 + $0xb8] sm:$0xff]  ;;  %v2911_v58 = vld [vmem:[%s5115_s8 + $0xb0] sm:$0xff]  ;;  %v2909_v39 = vld [vmem:[%s5115_s8 + $0xa0] sm:$0xff] }
 0x819   :  { %3566 = vmatprep.subr.mxu0 %v3923_v24  ;;  %3557 = vmatmul.mubr.msk.f32.vlgmr.msra.gmra.mxu0 %vm420_vm2, %v2116_v13  ;;  %v2588_v55 = vrot.slane %v4708_v33, 2  ;;  %v2765_v47 = vrot.slane %v4643_v20, 1  ;;  %v2492_v30 = vsel %vm1737_vm9, %v2491_v43, %v2490_v60  ;;  %v2583_v1 = vsel %vm1734_vm8, %v2582_v26, %v2581_v46  ;;  %v2908_v43 = vld [vmem:[%s5115_s8 + $0x98] sm:$0xff]  ;;  %v2907_v26 = vld [vmem:[%s5115_s8 + $0x90] sm:$0xff]  ;;  %v2898_v59 = vld [vmem:[%s5115_s8 + $0x48] sm:$0xff] }
 0x81a   :  { %3564 = vmatmul.mubr.msk.f32.vlgmr.msra.gmra.mxu1 %vm420_vm2, %v2209_v2  ;;  %3567 = vmatpush3.msk.msra.mxu0 %vm424_vm0, %v3407_v10  ;;  %v2672_v5 = vsel %vm1728_vm6, %v4643_v20, %v4664_v57  ;;  %v2673_v25 = vrot.slane %v4657_v8, 7  ;;  %v2494_v49 = vsel %vm1740_vm10, %v2493_v44, %v2492_v30  ;;  %v2585_v10 = vsel %vm1737_vm9, %v2584_v42, %v2583_v1  ;;  %v2902_v44 = vld [vmem:[%s5115_s8 + $0x68] sm:$0xff]  ;;  %v2901_v42 = vld [vmem:[%s5115_s8 + $0x60] sm:$0xff]  ;;  %v2900_v36 = vld [vmem:[%s5115_s8 + $0x58] sm:$0xff] }
 0x81b   :  { %3573 = vmatprep.subr.mxu1 %v3923_v24  ;;  %3568 = vmatprep.subr.mxu0 %v3923_v24  ;;  %v2675_v6 = vrot.slane %v4673_v9, 6  ;;  %v2768_v13 = vrot.slane %v4673_v9, 7  ;;  %v2496_v19 = vsel %vm1743_vm11, %v2495_v4, %v2494_v49  ;;  %v2587_v3 = vsel %vm1740_vm10, %v2586_v45, %v2585_v10  ;;  %v3426_v9 = vld [vmem:[%s5114_s4 + $0xb0] sm:$0xff]  ;;  %v2897_v45 = vld [vmem:[%s5115_s8 + $0x40] sm:$0xff]  ;;  %v2894_v46 = vld [vmem:[%s5115_s8 + $0x28] sm:$0xff] }
 0x81c   :  { %3574 = vmatpush3.msk.msra.mxu1 %vm424_vm0, %v3411_v51  ;;  %3569 = vmatpush3.msra.mxu0 %v3406_v54  ;;  %v2677_v7 = vrot.slane %v4682_v32, 5  ;;  %v2770_v20 = vrot.slane %v4682_v32, 6  ;;  %v2589_v2 = vsel %vm1743_vm11, %v2588_v55, %v2587_v3  ;;  %v3427_v51 = vld [vmem:[%s5114_s4 + $0xb8] sm:$0x7f]  ;;  %v3422_v54 = vld [vmem:[%s5114_s4 + $0xa0] sm:$0xff]  ;;  %v2679_v62 = vrot.slane %v4695_v16, 4 }
 0x81d   :  { %3575 = vmatprep.subr.mxu1 %v3923_v24  ;;  %3570 = vmatprep.mubr.msk.f32.mxu0 %vm3924_vm4, %v3923_v24  ;;  %v2766_v53 = vsel %vm1728_vm6, %v2765_v47, %v4690_v14  ;;  %v2772_v57 = vrot.slane %v4695_v16, 5  ;;  %v2674_v28 = vsel %vm1731_vm7, %v2673_v25, %v2672_v5  ;;  %v2681_v61 = vrot.slane %v4708_v33, 3  ;;  %v2919_v16 = vld [vmem:[%s5115_s8 + $0xf0] sm:$0xff]  ;;  %v2893_v55 = vld [vmem:[%s5115_s8 + $0x20] sm:$0xff]  ;;  %v2892_v47 = vld [vmem:[%s5115_s8 + $0x18] sm:$0xff] }
 0x81e   :  { %3576 = vmatpush3.msra.mxu1 %v3410_v11  ;;  %3577 = vmatprep.mubr.msk.f32.mxu1 %vm3924_vm4, %v3923_v24  ;;  %v2767_v56 = vsel %vm1731_vm7, %v4657_v8, %v2766_v53  ;;  %v2774_v21 = vrot.slane %v4708_v33, 4  ;;  %v2676_v11 = vsel %vm1734_vm8, %v2675_v6, %v2674_v28  ;;  %v2913_v33 = vld [vmem:[%s5115_s8 + $0xc0] sm:$0xff]  ;;  %v2899_v4 = vld [vmem:[%s5115_s8 + $0x50] sm:$0xff]  ;;  %v2890_v1 = vld [vmem:[%s5115_s8 + $0x8] sm:$0xff] }
 0x81f   :  { %3580 = vmatprep.subr.mxu0 %v3923_v24  ;;  %3571 = vmatmul.mubr.msk.f32.vlgmr.msra.gmra.mxu0 %vm420_vm2, %v2302_v17  ;;  %v2769_v34 = vsel %vm1734_vm8, %v2768_v13, %v2767_v56  ;;  %v2678_v12 = vsel %vm1737_vm9, %v2677_v7, %v2676_v11  ;;  %v2910_v17 = vld [vmem:[%s5115_s8 + $0xa8] sm:$0xff]  ;;  %v2895_v60 = vld [vmem:[%s5115_s8 + $0x30] sm:$0xff]  ;;  %v2889_v5 = vld [vmem:[%s5115_s8] sm:$0xff] }
 0x820   :  { %3578 = vmatmul.mubr.msk.f32.vlgmr.msra.gmra.mxu1 %vm420_vm2, %v2395_v63  ;;  %3581 = vmatpush3.msk.msra.mxu0 %vm424_vm0, %v3415_v41  ;;  %v2771_v8 = vsel %vm1737_vm9, %v2770_v20, %v2769_v34  ;;  %v2680_v32 = vsel %vm1740_vm10, %v2679_v62, %v2678_v12  ;;  %v2914_v41 = vld [vmem:[%s5115_s8 + $0xc8] sm:$0xff]  ;;  %v2891_v30 = vld [vmem:[%s5115_s8 + $0x10] sm:$0xff]  ;;  %v3383_v25 = vld [vmem:[%s5116_s5] ss:$0 sm:$0xff] }
 0x821   :  { %3587 = vmatprep.subr.mxu1 %v3923_v24  ;;  %3582 = vmatprep.subr.mxu0 %v3923_v24  ;;  %v2773_v29 = vsel %vm1740_vm10, %v2772_v57, %v2771_v8  ;;  %v2682_v14 = vsel %vm1743_vm11, %v2681_v61, %v2680_v32  ;;  %v2906_v63 = vld [vmem:[%s5115_s8 + $0x88] sm:$0xff] }
 0x822   :  { %3588 = vmatpush3.msk.msra.mxu1 %vm424_vm0, %v3419_v27  ;;  %3583 = vmatpush3.msra.mxu0 %v3414_v37  ;;  %v2775_v35 = vsel %vm1743_vm11, %v2774_v21, %v2773_v29  ;;  %v2905_v27 = vld [vmem:[%s5115_s8 + $0x80] sm:$0xff]  ;;  %v2904_v37 = vld [vmem:[%s5115_s8 + $0x78] sm:$0xff] }
 0x823   :  { %3589 = vmatprep.subr.mxu1 %v3923_v24  ;;  %3584 = vmatprep.mubr.msk.f32.mxu0 %vm3924_vm4, %v3923_v24 }
 0x824   :  { %3590 = vmatpush3.msra.mxu1 %v3418_v18  ;;  %3591 = vmatprep.mubr.msk.f32.mxu1 %vm3924_vm4, %v3923_v24  ;;  %v2896_v18 = vld [vmem:[%s5115_s8 + $0x38] sm:$0xff] }
 0x825   :  { %3594 = vmatprep.subr.mxu0 %v3923_v24  ;;  %3585 = vmatmul.mubr.msk.f32.vlgmr.msra.gmra.mxu0 %vm420_vm2, %v2496_v19 }
 0x826   :  { %3592 = vmatmul.mubr.msk.f32.vlgmr.msra.gmra.mxu1 %vm420_vm2, %v2589_v2  ;;  %3595 = vmatpush3.msk.msra.mxu0 %vm424_vm0, %v3423_v50 }
 0x827   :  { %3601 = vmatprep.subr.mxu1 %v3923_v24  ;;  %3596 = vmatprep.subr.mxu0 %v3923_v24 }
 0x828   :  { %3602 = vmatpush3.msk.msra.mxu1 %vm424_vm0, %v3427_v51  ;;  %3597 = vmatpush3.msra.mxu0 %v3422_v54 }
 0x829   :  { %3603 = vmatprep.subr.mxu1 %v3923_v24  ;;  %3598 = vmatprep.mubr.msk.f32.mxu0 %vm3924_vm4, %v3923_v24 }
 0x82a   :  { %3604 = vmatpush3.msra.mxu1 %v3426_v9  ;;  %3605 = vmatprep.mubr.msk.f32.mxu1 %vm3924_vm4, %v3923_v24 }
 0x82b   :  { %3599 = vmatmul.mubr.msk.f32.vlgmr.msra.gmra.mxu0 %vm420_vm2, %v2682_v14  ;;  %3606 = vmatmul.mubr.msk.f32.vlgmr.msra.gmra.mxu1 %vm420_vm2, %v2775_v35 }
 0x82c   :  { %2997 = vmatprep.mubr.f32.mxu0 %v3923_v24  ;;  %2933 = vmatprep.subr.mxu0 %v2920_v15 }
 0x82d   :  { %2934 = vmatpush1.msra.mxu0 %v2919_v16 }
 0x82e   :  { %2935 = vmatprep.subr.mxu0 %v2918_v31 }
 0x82f   :  { %2936 = vmatpush1.msra.mxu0 %v2917_v48 }
 0x830   :  { %2937 = vmatprep.subr.mxu0 %v2916_v40 }
 0x831   :  { %2938 = vmatpush1.msra.mxu0 %v2915_v52 }
 0x832   :  { %2939 = vmatprep.subr.mxu0 %v2914_v41 }
 0x833   :  { %2940 = vmatpush1.msra.mxu0 %v2913_v33 }
 0x834   :  { %2941 = vmatprep.subr.mxu0 %v2912_v0 }
 0x835   :  { %2942 = vmatpush1.msra.mxu0 %v2911_v58 }
 0x836   :  { %2943 = vmatprep.subr.mxu0 %v2910_v17 }
 0x837   :  { %2944 = vmatpush1.msra.mxu0 %v2909_v39 }
 0x838   :  { %2945 = vmatprep.subr.mxu0 %v2908_v43 }
 0x839   :  { %2946 = vmatpush1.msra.mxu0 %v2907_v26 }
 0x83a   :  { %2947 = vmatprep.subr.mxu0 %v2906_v63 }
 0x83b   :  { %2948 = vmatpush1.msra.mxu0 %v2905_v27 }
 0x83c   :  { %2949 = vmatprep.subr.mxu0 %v2904_v37 }
 0x83d   :  { %2950 = vmatpush1.msra.mxu0 %v2903_v38 }
 0x83e   :  { %2951 = vmatprep.subr.mxu0 %v2902_v44 }
 0x83f   :  { %2952 = vmatpush1.msra.mxu0 %v2901_v42 }
 0x840   :  { %2953 = vmatprep.subr.mxu0 %v2900_v36 }
 0x841   :  { %2954 = vmatpush1.msra.mxu0 %v2899_v4 }
 0x842   :  { %2955 = vmatprep.subr.mxu0 %v2898_v59 }
 0x843   :  { %2956 = vmatpush1.msra.mxu0 %v2897_v45 }
 0x844   :  { %2957 = vmatprep.subr.mxu0 %v2896_v18 }
 0x845   :  { %2958 = vmatpush1.msra.mxu0 %v2895_v60 }
 0x846   :  { %2959 = vmatprep.subr.mxu0 %v2894_v46 }
 0x847   :  { %2960 = vmatpush1.msra.mxu0 %v2893_v55  ;;  %v3430_v55 = vld [vmem:[%s5117_s6] ss:$0 sm:$0xff] }
 0x848   :  { %2961 = vmatprep.subr.mxu0 %v2892_v47 }
 0x849   :  { %2962 = vmatpush1.msra.mxu0 %v2891_v30  ;;  %v3431_v30 = vld [vmem:[%s5118_s7] ss:$0 sm:$0xff] }
 0x84a   :  { %2963 = vmatprep.subr.mxu0 %v2890_v1 }
 0x84b   :  { %2964 = vmatpush1.msra.mxu0 %v2889_v5 }
 0x84c   :  { %3608 = vmatprep.subr.mxu0 %v3923_v24 }
 0x8ce   :  { %v1816_v49 = vpop.f32.mrf.mxu0  ;;  %v1909_v10 = vpop.f32.mrf.mxu1 }
 0x8cf   :  { %v1820_v50 = vadd.f32 %v3383_v25, %v1816_v49  ;;  %v3103_v25 = vld [vmem:[%s5119_s12 + $0xf8] sm:$0xff] }
 0x8d0   :  { %v3530_v6 = vpop.f32.mrf.mxu0  ;;  %v3537_v13 = vpop.f32.mrf.mxu1  ;;  %3472 = vmatprep.subr.mxu1 %v3103_v25  ;;  %v3087_v49 = vld [vmem:[%s5119_s12 + $0x78] sm:$0xff] }
 0x8d1   :  { %v1913_v19 = vadd.f32 %v1909_v10, %v1820_v50  ;;  %3473 = vmatpush3.msra.mxu1 %v3087_v49  ;;  %v3102_v10 = vld [vmem:[%s5119_s12 + $0xf0] sm:$0xff]  ;;  %v3101_v6 = vld [vmem:[%s5119_s12 + $0xe8] sm:$0xff] }
 0x8d2   :  { %3474 = vmatprep.subr.mxu1 %v3102_v10  ;;  %v3086_v50 = vld [vmem:[%s5119_s12 + $0x70] sm:$0xff]  ;;  %v3085_v13 = vld [vmem:[%s5119_s12 + $0x68] sm:$0xff] }
 0x8d3   :  { %v2002_v3 = vpop.f32.mrf.mxu0  ;;  %3475 = vmatpush3.msra.mxu1 %v3086_v50 }
 0x8d4   :  { %v2006_v7 = vadd.f32 %v2002_v3, %v1913_v19  ;;  %v2095_v20 = vpop.f32.mrf.mxu1  ;;  %3476 = vmatprep.subr.mxu1 %v3101_v6  ;;  %v3100_v19 = vld [vmem:[%s5119_s12 + $0xe0] sm:$0xff] }
 0x8d5   :  { %v3544_v2 = vpop.f32.mrf.mxu0  ;;  %3477 = vmatpush3.msra.mxu1 %v3085_v13  ;;  %v3084_v3 = vld [vmem:[%s5119_s12 + $0x60] sm:$0xff] }
 0x8d6   :  { %v2099_v51 = vadd.f32 %v2095_v20, %v2006_v7  ;;  %v3551_v54 = vpop.f32.mrf.mxu1  ;;  %3478 = vmatprep.subr.mxu1 %v3100_v19  ;;  %v3099_v7 = vld [vmem:[%s5119_s12 + $0xd8] sm:$0xff]  ;;  %v3098_v2 = vld [vmem:[%s5119_s12 + $0xd0] sm:$0xff] }
 0x8d7   :  { %3479 = vmatpush3.msra.mxu1 %v3084_v3  ;;  %v3083_v20 = vld [vmem:[%s5119_s12 + $0x58] sm:$0xff]  ;;  %v3097_v54 = vld [vmem:[%s5119_s12 + $0xc8] sm:$0xff] }
 0x8d8   :  { %3480 = vmatprep.subr.mxu1 %v3099_v7 }
 0x8d9   :  { %v2188_v62 = vpop.f32.mrf.mxu0  ;;  %3481 = vmatpush3.msra.mxu1 %v3083_v20 }
 0x8da   :  { %v2192_v53 = vadd.f32 %v2188_v62, %v2099_v51  ;;  %v2281_v57 = vpop.f32.mrf.mxu1  ;;  %3482 = vmatprep.subr.mxu1 %v3098_v2  ;;  %v3082_v51 = vld [vmem:[%s5119_s12 + $0x50] sm:$0xff]  ;;  %v3081_v62 = vld [vmem:[%s5119_s12 + $0x48] sm:$0xff] }
 0x8db   :  { %v3558_v28 = vpop.f32.mrf.mxu0  ;;  %3483 = vmatpush3.msra.mxu1 %v3082_v51 }
 0x8dc   :  { %v2285_v61 = vadd.f32 %v2281_v57, %v2192_v53  ;;  %v3565_v56 = vpop.f32.mrf.mxu1  ;;  %3484 = vmatprep.subr.mxu1 %v3097_v54  ;;  %v3096_v53 = vld [vmem:[%s5119_s12 + $0xc0] sm:$0xff]  ;;  %v3095_v28 = vld [vmem:[%s5119_s12 + $0xb8] sm:$0xff] }
 0x8dd   :  { %3485 = vmatpush3.msra.mxu1 %v3081_v62  ;;  %v3080_v57 = vld [vmem:[%s5119_s12 + $0x40] sm:$0xff]  ;;  %v3094_v56 = vld [vmem:[%s5119_s12 + $0xb0] sm:$0xff] }
 0x8de   :  { %3486 = vmatprep.subr.mxu1 %v3096_v53  ;;  %v3044_v53 = vld [vmem:[%s5121_s10] sm:$0x3] }
 0x8df   :  { %v2374_v21 = vpop.f32.mrf.mxu0  ;;  %3487 = vmatpush3.msra.mxu1 %v3080_v57 }
 0x8e0   :  { %v2378_v9 = vadd.f32 %v2374_v21, %v2285_v61  ;;  %v2467_v11 = vpop.f32.mrf.mxu1  ;;  %3488 = vmatprep.subr.mxu1 %v3095_v28  ;;  %v3079_v61 = vld [vmem:[%s5119_s12 + $0x38] sm:$0xff]  ;;  %v3078_v21 = vld [vmem:[%s5119_s12 + $0x30] sm:$0xff]  ;;  %v3049_v28 = vrot.slane %v3044_v53, %v4083_v22 }
 0x8e1   :  { %v3572_v34 = vpop.f32.mrf.mxu0  ;;  %3489 = vmatpush3.msra.mxu1 %v3079_v61 }
 0x8e2   :  { %v2471_v12 = vadd.f32 %v2467_v11, %v2378_v9  ;;  %v3579_v8 = vpop.f32.mrf.mxu1  ;;  %3490 = vmatprep.subr.mxu1 %v3094_v56  ;;  %v3093_v9 = vld [vmem:[%s5119_s12 + $0xa8] sm:$0xff]  ;;  %v3092_v34 = vld [vmem:[%s5119_s12 + $0xa0] sm:$0xff]  ;;  %v3053_v56 = vrot.slane %v3044_v53, %v4085_v23 }
 0x8e3   :  { %3491 = vmatpush3.msra.mxu1 %v3078_v21  ;;  %v3077_v11 = vld [vmem:[%s5119_s12 + $0x28] sm:$0xff]  ;;  %v3091_v8 = vld [vmem:[%s5119_s12 + $0x98] sm:$0xff]  ;;  %v3058_v21 = vld [vmem:[%s5122_s11] sm:$0x3] }
 0x8e4   :  { %3492 = vmatprep.subr.mxu1 %v3093_v9 }
 0x8e5   :  { %v2568_v32 = vpop.f32.mrf.mxu0  ;;  %3493 = vmatpush3.msra.mxu1 %v3077_v11 }
 0x8e6   :  { %v2572_v29 = vadd.f32 %v2568_v32, %v2471_v12  ;;  %v2661_v14 = vpop.f32.mrf.mxu1  ;;  %3494 = vmatprep.subr.mxu1 %v3092_v34  ;;  %v3076_v12 = vld [vmem:[%s5119_s12 + $0x20] sm:$0xff]  ;;  %v3075_v32 = vld [vmem:[%s5119_s12 + $0x18] sm:$0xff]  ;;  %v3067_v34 = vrot.slane %v3058_v21, %v4085_v23 }
 0x8e7   :  { %v3586_v35 = vpop.f32.mrf.mxu0  ;;  %3495 = vmatpush3.msra.mxu1 %v3076_v12  ;;  %v3063_v12 = vrot.slane %v3058_v21, %v4083_v22 }
 0x8e8   :  { %v2665_v15 = vadd.f32 %v2661_v14, %v2572_v29  ;;  %v3593_v16 = vpop.f32.mrf.mxu1  ;;  %3496 = vmatprep.subr.mxu1 %v3091_v8  ;;  %v3090_v29 = vld [vmem:[%s5119_s12 + $0x90] sm:$0xff]  ;;  %v3089_v35 = vld [vmem:[%s5119_s12 + $0x88] sm:$0xff] }
 0x8e9   :  { %3497 = vmatpush3.msra.mxu1 %v3075_v32  ;;  %v3074_v14 = vld [vmem:[%s5119_s12 + $0x10] sm:$0xff]  ;;  %v3088_v16 = vld [vmem:[%s5119_s12 + $0x80] sm:$0xff] }
 0x8ea   :  { %3498 = vmatprep.subr.mxu1 %v3090_v29 }
 0x8eb   :  { %v2754_v31 = vpop.f32.mrf.mxu0  ;;  %v2847_v48 = vpop.f32.mrf.mxu1  ;;  %3499 = vmatpush3.msra.mxu1 %v3074_v14 }
 0x8ec   :  { %v2758_v40 = vadd.f32 %v2754_v31, %v2665_v15  ;;  %v3073_v15 = vld [vmem:[%s5119_s12 + $0x8] sm:$0xff]  ;;  %3500 = vmatprep.subr.mxu1 %v3089_v35  ;;  %v3072_v31 = vld [vmem:[%s5119_s12] sm:$0xff]  ;;  %v3232_v35 = vld [vmem:[%s5123_s16 + $0x78] sm:$0xff] }
 0x8ed   :  { %v3600_v52 = vpop.f32.mrf.mxu0  ;;  %v3607_v41 = vpop.f32.mrf.mxu1  ;;  %3501 = vmatpush3.msra.mxu1 %v3073_v15  ;;  %v3231_v15 = vld [vmem:[%s5123_s16 + $0x70] sm:$0xff] }
 0x8ee   :  { %v2851_v33 = vadd.f32 %v2847_v48, %v2758_v40  ;;  %3502 = vmatprep.subr.mxu1 %v3088_v16  ;;  %v2921_v48 = vld [vmem:[%s5120_s9] sm:$0x3]  ;;  %v3228_v16 = vld [vmem:[%s5123_s16 + $0x58] sm:$0xff] }
 0x8ef   :  { %3503 = vmatpush3.msra.mxu1 %v3072_v31  ;;  %v2926_v40 = vrot.slane %v2921_v48, %v4083_v22  ;;  %v2930_v52 = vrot.slane %v2921_v48, %v4085_v23  ;;  %v3230_v22 = vld [vmem:[%s5123_s16 + $0x68] sm:$0xff]  ;;  %v3229_v23 = vld [vmem:[%s5123_s16 + $0x60] sm:$0xff]  ;;  %v3227_v31 = vld [vmem:[%s5123_s16 + $0x50] sm:$0xff] }
 0x8f0   :  { %v2852_v0 = vmax.f32 %v2851_v33, 0.0  ;;  %v3226_v48 = vld [vmem:[%s5123_s16 + $0x48] sm:$0xff] }
 0x8f2   :  { %v2853_v58 = vrot.slane %v2852_v0, 4 }
 0x8f4   :  { %v2854_v17 = vadd.f32 %v2853_v58, %v2852_v0 }
 0x8f6   :  { %v2855_v39 = vrot.slane %v2854_v17, 2 }
 0x8f8   :  { %v2856_v43 = vadd.f32 %v2855_v39, %v2854_v17 }
 0x8fa   :  { %v2857_v26 = vrot.slane %v2856_v43, 1 }
 0x8fc   :  { %v2858_v63 = vadd.f32 %v2857_v26, %v2856_v43 }
 0x8fe   :  { %v2860_v27 = vmul.f32 0.125, %v2858_v63 }
 0x900   :  { %v2861_v37 = vsub.f32 %v2852_v0, %v2860_v27 }
 0x902   :  { %v2862_v38 = vmul.f32 %v2861_v37, %v2861_v37 }
 0x904   :  { %v2863_v44 = vrot.slane %v2862_v38, 4 }
 0x906   :  { %v2864_v42 = vadd.f32 %v2863_v44, %v2862_v38 }
 0x908   :  { %v2865_v36 = vrot.slane %v2864_v42, 2 }
 0x90a   :  { %v2866_v4 = vadd.f32 %v2865_v36, %v2864_v42 }
 0x90c   :  { %v2867_v59 = vrot.slane %v2866_v4, 1 }
 0x90e   :  { %v2868_v45 = vadd.f32 %v2867_v59, %v2866_v4 }
 0x910   :  { %v2869_v18 = vmul.f32 0.125, %v2868_v45 }
 0x912   :  { %v2870_v60 = vadd.f32 1e-05, %v2869_v18 }
 0x914   :  { %3911 = vrsqrt.f32 %v2870_v60 }
 0x921   :  { %v3912_v46 = vpop.eup %3911 }
 0x922   :  { %v2872_v47 = vmul.f32 %v3912_v46, %v2861_v37 }
 0x924   :  { %v2880_v1 = vmul.f32 %v3430_v55, %v2872_v47 }
 0x926   :  { %v2888_v5 = vadd.f32 %v3431_v30, %v2880_v1 }
 0x928   :  { %2998 = vmatmul.mubr.f32.vlgmr.msra.gmra.mxu0 %v2888_v5 }
 0x929   :  { %3640 = vmatprep.mubr.msk.f32.mxu0 %vm3924_vm4, %v3923_v24  ;;  %3609 = vmatpush3.msra.mxu0 %v3232_v35 }
 0x92a   :  { %3610 = vmatprep.subr.mxu0 %v3923_v24 }
 0x92b   :  { %3611 = vmatpush3.msra.mxu0 %v3231_v15 }
 0x92c   :  { %3612 = vmatprep.subr.mxu0 %v3923_v24 }
 0x92d   :  { %3613 = vmatpush3.msra.mxu0 %v3230_v22 }
 0x92e   :  { %3614 = vmatprep.subr.mxu0 %v3923_v24 }
 0x92f   :  { %3615 = vmatpush3.msra.mxu0 %v3229_v23 }
 0x930   :  { %3616 = vmatprep.subr.mxu0 %v3923_v24 }
 0x931   :  { %3617 = vmatpush3.msra.mxu0 %v3228_v16 }
 0x932   :  { %3618 = vmatprep.subr.mxu0 %v3923_v24 }
 0x933   :  { %3619 = vmatpush3.msra.mxu0 %v3227_v31 }
 0x934   :  { %3620 = vmatprep.subr.mxu0 %v3923_v24 }
 0x935   :  { %3621 = vmatpush3.msra.mxu0 %v3226_v48 }
 0x936   :  { %3622 = vmatprep.subr.mxu0 %v3923_v24 }
 0x9e8   :  { %v2999_v41 = vpop.f32.mrf.mxu0 }
 0x9e9   :  { %v3000_v33 = vadd.f32 %v2999_v41, %v2926_v40  ;;  %v3225_v40 = vld [vmem:[%s5123_s16 + $0x40] sm:$0xff]  ;;  %v3223_v41 = vld [vmem:[%s5123_s16 + $0x30] sm:$0xff] }
 0x9ea   :  { %v3001_v0 = vpop.f32.mrf.mxu0  ;;  %3623 = vmatpush3.msra.mxu0 %v3225_v40 }
 0x9eb   :  { %v3004_v58 = vmax.f32 %v3000_v33, 0.0  ;;  %v3002_v17 = vadd.f32 %v3001_v0, %v2930_v52  ;;  %3624 = vmatprep.subr.mxu0 %v3923_v24  ;;  %v3224_v52 = vld [vmem:[%s5123_s16 + $0x38] sm:$0xff]  ;;  %v3222_v33 = vld [vmem:[%s5123_s16 + $0x28] sm:$0xff]  ;;  %v3221_v0 = vld [vmem:[%s5123_s16 + $0x20] sm:$0xff] }
 0x9ec   :  { %3625 = vmatpush3.msra.mxu0 %v3224_v52 }
 0x9ed   :  { %v3006_v39 = vrot.slane %v3004_v58, 4  ;;  %v3005_v43 = vmax.f32 %v3002_v17, 0.0  ;;  %3626 = vmatprep.subr.mxu0 %v3923_v24  ;;  %v3219_v17 = vld [vmem:[%s5123_s16 + $0x10] sm:$0xff] }
 0x9ee   :  { %3627 = vmatpush3.msra.mxu0 %v3223_v41 }
 0x9ef   :  { %v3007_v26 = vadd.f32 %v3006_v39, %v3004_v58  ;;  %v3012_v63 = vrot.slane %v3005_v43, 4  ;;  %3628 = vmatprep.subr.mxu0 %v3923_v24  ;;  %v3218_v39 = vld [vmem:[%s5123_s16 + $0x8] sm:$0xff] }
 0x9f0   :  { %3629 = vmatpush3.msra.mxu0 %v3222_v33 }
 0x9f1   :  { %v3008_v27 = vrot.slane %v3007_v26, 2  ;;  %v3013_v37 = vadd.f32 %v3012_v63, %v3005_v43  ;;  %3630 = vmatprep.subr.mxu0 %v3923_v24  ;;  %v3432_v63 = vld [vmem:[%s5124_s13] ss:$0 sm:$0xff] }
 0x9f2   :  { %3631 = vmatpush3.msra.mxu0 %v3221_v0 }
 0x9f3   :  { %v3009_v38 = vadd.f32 %v3008_v27, %v3007_v26  ;;  %v3014_v44 = vrot.slane %v3013_v37, 2  ;;  %3632 = vmatprep.subr.mxu0 %v3923_v24 }
 0x9f5   :  { %v3010_v42 = vrot.slane %v3009_v38, 1  ;;  %v3015_v36 = vadd.f32 %v3014_v44, %v3013_v37 }
 0x9f7   :  { %v3011_v4 = vadd.f32 %v3010_v42, %v3009_v38  ;;  %v3016_v59 = vrot.slane %v3015_v36, 1 }
 0x9f9   :  { %v3018_v45 = vmul.f32 0.125, %v3011_v4  ;;  %v3017_v18 = vadd.f32 %v3016_v59, %v3015_v36 }
 0x9fb   :  { %v3020_v60 = vsub.f32 %v3004_v58, %v3018_v45  ;;  %v3019_v46 = vmul.f32 0.125, %v3017_v18  ;;  %v3220_v58 = vld [vmem:[%s5123_s16 + $0x18] sm:$0xff] }
 0x9fc   :  { %3633 = vmatpush3.msra.mxu0 %v3220_v58 }
 0x9fd   :  { %v3022_v55 = vmul.f32 %v3020_v60, %v3020_v60  ;;  %v3021_v47 = vsub.f32 %v3005_v43, %v3019_v46  ;;  %3634 = vmatprep.subr.mxu0 %v3923_v24  ;;  %v3217_v43 = vld [vmem:[%s5123_s16] sm:$0xff] }
 0x9fe   :  { %3635 = vmatpush3.msra.mxu0 %v3219_v17 }
 0x9ff   :  { %v3024_v30 = vrot.slane %v3022_v55, 4  ;;  %v3023_v1 = vmul.f32 %v3021_v47, %v3021_v47  ;;  %3636 = vmatprep.subr.mxu0 %v3923_v24 }
 0xa00   :  { %3637 = vmatpush3.msra.mxu0 %v3218_v39 }
 0xa01   :  { %v3025_v5 = vadd.f32 %v3024_v30, %v3022_v55  ;;  %v3030_v25 = vrot.slane %v3023_v1, 4  ;;  %3638 = vmatprep.subr.mxu0 %v3923_v24 }
 0xa02   :  { %3639 = vmatpush3.msra.mxu0 %v3217_v43 }
 0xa03   :  { %v3026_v49 = vrot.slane %v3025_v5, 2  ;;  %v3031_v10 = vadd.f32 %v3030_v25, %v3023_v1 }
 0xa05   :  { %v3027_v50 = vadd.f32 %v3026_v49, %v3025_v5  ;;  %v3032_v6 = vrot.slane %v3031_v10, 2 }
 0xa07   :  { %v3028_v13 = vrot.slane %v3027_v50, 1  ;;  %v3033_v19 = vadd.f32 %v3032_v6, %v3031_v10  ;;  %v3433_v6 = vld [vmem:[%s5125_s14] ss:$0 sm:$0xff] }
 0xa09   :  { %v3029_v3 = vadd.f32 %v3028_v13, %v3027_v50  ;;  %v3034_v7 = vrot.slane %v3033_v19, 1 }
 0xa0b   :  { %v3036_v20 = vmul.f32 0.125, %v3029_v3  ;;  %v3035_v2 = vadd.f32 %v3034_v7, %v3033_v19  ;;  %v3434_v19 = vld [vmem:[%s5126_s15] ss:$0 sm:$0xff] }
 0xa0d   :  { %v3038_v51 = vadd.f32 1e-05, %v3036_v20  ;;  %v3037_v54 = vmul.f32 0.125, %v3035_v2  ;;  %v3435_v20 = vld [vmem:[%s5127_s17] ss:$0 sm:$0xff] }
 0xa0f   :  { %3913 = vrsqrt.f32 %v3038_v51  ;;  %v3039_v62 = vadd.f32 1e-05, %v3037_v54 }
 0xa11   :  { %3915 = vrsqrt.f32 %v3039_v62 }
 0xa1c   :  { %v3914_v57 = vpop.eup %3913 }
 0xa1d   :  { %v3042_v61 = vmul.f32 %v3914_v57, %v3020_v60 }
 0xa1e   :  { %v3916_v9 = vpop.eup %3915 }
 0xa1f   :  { %v3043_v11 = vmul.f32 %v3916_v9, %v3021_v47  ;;  %v3056_v8 = vmul.f32 %v3049_v28, %v3042_v61 }
 0xa21   :  { %v3057_v32 = vmul.f32 %v3053_v56, %v3043_v11  ;;  %v3070_v14 = vadd.f32 %v3063_v12, %v3056_v8 }
 0xa23   :  { %v3071_v29 = vadd.f32 %v3067_v34, %v3057_v32 }
 0xa25   :  { %3175 = vmatprep.mubr.f32.mxu1 %v3071_v29 }
 0xa26   :  { %3176 = vmatmul.mubr.f32.vlgmr.msra.gmra.mxu1 %v3070_v14 }
 0xae6   :  { %v3504_v26 = vpop.f32.mrf.mxu1 }
 0xae8   :  { %v3505_v27 = vpop.f32.mrf.mxu1 }
 0xae9   :  { %v3506_v37 = vadd.f32 %v3505_v27, %v3504_v26 }
 0xaeb   :  { %v3178_v38 = vadd.f32 %v3506_v37, %v3432_v63 }
 0xaed   :  { %v3181_v44 = vmax.f32 %v3178_v38, 0.0 }
 0xaef   :  { %v3182_v42 = vrot.slane %v3181_v44, 4 }
 0xaf1   :  { %v3183_v36 = vadd.f32 %v3182_v42, %v3181_v44 }
 0xaf3   :  { %v3184_v4 = vrot.slane %v3183_v36, 2 }
 0xaf5   :  { %v3185_v59 = vadd.f32 %v3184_v4, %v3183_v36 }
 0xaf7   :  { %v3186_v45 = vrot.slane %v3185_v59, 1 }
 0xaf9   :  { %v3187_v18 = vadd.f32 %v3186_v45, %v3185_v59 }
 0xafb   :  { %v3188_v60 = vmul.f32 0.125, %v3187_v18 }
 0xafd   :  { %v3189_v46 = vsub.f32 %v3181_v44, %v3188_v60 }
 0xaff   :  { %v3190_v55 = vmul.f32 %v3189_v46, %v3189_v46 }
 0xb01   :  { %v3191_v24 = vrot.slane %v3190_v55, 4 }
 0xb03   :  { %v3192_v47 = vadd.f32 %v3191_v24, %v3190_v55 }
 0xb05   :  { %v3193_v30 = vrot.slane %v3192_v47, 2 }
 0xb07   :  { %v3194_v1 = vadd.f32 %v3193_v30, %v3192_v47 }
 0xb09   :  { %v3195_v5 = vrot.slane %v3194_v1, 1 }
 0xb0b   :  { %v3196_v25 = vadd.f32 %v3195_v5, %v3194_v1 }
 0xb0d   :  { %v3197_v49 = vmul.f32 0.125, %v3196_v25 }
 0xb0f   :  { %v3198_v10 = vadd.f32 1e-05, %v3197_v49 }
 0xb11   :  { %3917 = vrsqrt.f32 %v3198_v10 }
 0xb1e   :  { %v3918_v50 = vpop.eup %3917 }
 0xb1f   :  { %v3200_v13 = vmul.f32 %v3918_v50, %v3189_v46 }
 0xb21   :  { %v3208_v3 = vmul.f32 %v3433_v6, %v3200_v13 }
 0xb23   :  { %v3216_v7 = vadd.f32 %v3434_v19, %v3208_v3 }
 0xb25   :  { %3641 = vmatmul.mubr.f32.vlgmr.msra.gmra.mxu0 %v3216_v7 }
 0xbe5   :  { %v3306_v2 = vpop.f32.mrf.mxu0 }
 0xbe6   :  { %v3307_v51 = vadd.f32 %v3435_v20, %v3306_v2 }
 0xbe7   :  { %v3642_v54 = vpop.f32.mrf.mxu0 }
 0xbe8   :  { %v3310_v62 = vmax.f32 %v3307_v51, 0.0 }
 0xbea   :  { %3312 = vst.msk [vmem:[%s5128_s18] sm:$0xff] %vm3311_vm12, %v3310_v62 }

</bundles_post_ra>
